<compile_context>
chip_gen: v5e
topology: v5e:2x2
jax: 0.10.0
libtpu: 0.0.40
codegen_flags: <defaults>
</compile_context>

<pallas_src>
import math
from functools import partial

import jax
import jax.numpy as jnp
from jax import lax
from jax.experimental import pallas as pl
from jax.experimental.pallas import tpu as pltpu

_SCALE = 0.7071067811865476  # sqrt(0.5)


def _round_up(n, m):
    return ((n + m - 1) // m) * m


def _sinusoidal_pe(max_len, d_model):
    # TODO(synk): the PositionalEncoding class is not part of the provided
    # source; the standard sinusoidal table is assumed with
    # pos_encoding(x) == x + pe (eval mode), so pos_encoding(x) + x == 2*x + pe.
    pos = jnp.arange(max_len, dtype=jnp.float32)[:, None]
    div = jnp.exp(jnp.arange(0, d_model, 2, dtype=jnp.float32)
                  * (-math.log(10000.0) / d_model))
    pe = jnp.zeros((max_len, d_model), dtype=jnp.float32)
    pe = pe.at[:, 0::2].set(jnp.sin(pos * div))
    pe = pe.at[:, 1::2].set(jnp.cos(pos * div))
    return pe


def _pad_to(a, shape):
    return jnp.pad(a, [(0, s - d) for d, s in zip(a.shape, shape)])


def _pad_conv_weights(wc, bc, H, H_pad):
    """(L,K,H,2H)/(L,1,2H) -> im2col layout (L, K*H_pad, 2*H_pad)/(L,1,2*H_pad).

    The two GLU halves are padded independently so the split stays at lane H_pad
    (padded linear channels are 0, padded gate channels multiply them -> 0)."""
    L_, K_ = wc.shape[0], wc.shape[1]
    dh = H_pad - H
    w = jnp.concatenate(
        [jnp.pad(wc[..., :H], ((0, 0), (0, 0), (0, dh), (0, dh))),
         jnp.pad(wc[..., H:], ((0, 0), (0, 0), (0, dh), (0, dh)))], axis=-1)
    b = jnp.concatenate(
        [jnp.pad(bc[..., :H], ((0, 0), (0, 0), (0, dh))),
         jnp.pad(bc[..., H:], ((0, 0), (0, 0), (0, dh)))], axis=-1)
    return w.reshape(L_, K_ * H_pad, 2 * H_pad), b


def _conv_seq2seq_kernel(num_layers, kernel_size, tgt_pad_idx, s_len,
                         pad_l, pad_l8, pad_d8,
                         x_ref, trg_ref, pe_src_ref, pe_tgt_ref,
                         ew_e2h_ref, eb_e2h_ref, ew_h2e_ref, eb_h2e_ref,
                         ewc_ref, ebc_ref,
                         dw_e2h_ref, db_e2h_ref, dw_h2e_ref, db_h2e_ref,
                         dw_ah2e_ref, db_ah2e_ref, dw_ae2h_ref, db_ae2h_ref,
                         dwc_ref, dbc_ref,
                         out_ref, attn_ref,
                         xp_enc_ref, xp_dec_ref):
    f32, bf16 = jnp.float32, jnp.bfloat16
    scale = jnp.float32(_SCALE)
    K, L = kernel_size, num_layers

    x_src = x_ref[...]                       # (Bb, S8, Fp) f32
    trg = trg_ref[...]                       # (Bb, T8, Fp) f32
    Bb, S8, Fp = x_src.shape
    T8 = trg.shape[1]
    Hp = ew_e2h_ref.shape[1]
    Sp = attn_ref.shape[2]                   # lane-dense attention key axis
    rows_e, rows_d = Bb * S8, Bb * T8

    def mm(a, w_ref, b_ref):
        """f32 activations -> bf16 into the MXU, f32 accumulation, f32 bias."""
        return jnp.dot(a.astype(bf16), w_ref[...],
                       preferred_element_type=f32) + b_ref[...]

    def conv_glu(xp_ref, tap0, n_rows, wc_ref, bc_ref, layer):
        # im2col: K row-shifted views concatenated along (128-aligned) lanes,
        # then ONE MXU matmul per layer contracting over K*Hp.
        taps = [xp_ref[:, pl.ds(tap0 + k, n_rows), :] for k in range(K)]
        slab = jnp.concatenate(taps, axis=-1).reshape(Bb * n_rows, K * Hp)
        y = jnp.dot(slab.astype(bf16), wc_ref[layer],
                    preferred_element_type=f32) + bc_ref[layer]
        # GLU: split lands exactly on a 128-lane boundary (Hp multiple of 128).
        return y[:, :Hp] * jax.nn.sigmoid(y[:, Hp:])

    # ============================= Encoder =============================
    # combined = dropout(pos_encoding(x) + x) -> 2*x + pe in eval mode.
    comb_e = (x_src + x_src) + pe_src_ref[...]
    comb_e2 = comb_e.reshape(rows_e, Fp)
    ex = mm(comb_e2, ew_e2h_ref, eb_e2h_ref)               # (rows_e, Hp)

    # Only the pad rows are initialised; the body is rewritten per layer.
    enc_rows = xp_enc_ref.shape[1]
    if pad_l8 > 0:
        xp_enc_ref[:, pl.ds(0, pad_l8), :] = jnp.zeros((Bb, pad_l8, Hp), f32)
    tail = enc_rows - pad_l8 - S8
    if tail > 0:
        xp_enc_ref[:, pl.ds(pad_l8 + S8, tail), :] = jnp.zeros((Bb, tail, Hp), f32)

    # Rows >= s_len are zeroed each layer so the right conv boundary sees the
    # reference zero padding and padded rows never contaminate valid positions.
    valid_src = lax.broadcasted_iota(jnp.int32, (Bb, S8, Hp), 1) < s_len

    # TODO(synk): for large L switch to lax.fori_loop with dynamic layer index
    # (ewc_ref[layer]) to bound live ranges.
    for layer in range(L):
        xp_enc_ref[:, pl.ds(pad_l8, S8), :] = jnp.where(
            valid_src, ex.reshape(Bb, S8, Hp), 0.0)
        g = conv_glu(xp_enc_ref, pad_l8 - pad_l, S8, ewc_ref, ebc_ref, layer)
        ex = (g + ex) * scale

    enc_x = mm(ex, ew_h2e_ref, eb_h2e_ref)                 # (rows_e, Fp)
    enc_comb = (enc_x + comb_e2) * scale

    # Keys/values only are zero-padded S8 -> Sp (128 lanes) for the attention
    # einsums / lane-dense attn output; the encoder stack above ran at S8 rows.
    if Sp > S8:
        zpad = jnp.zeros((Bb, Sp - S8, Fp), f32)
        enc_conv3 = jnp.concatenate(
            [enc_x.reshape(Bb, S8, Fp), zpad], axis=1).astype(bf16)
        enc_comb3 = jnp.concatenate(
            [enc_comb.reshape(Bb, S8, Fp), zpad], axis=1).astype(bf16)
    else:
        enc_conv3 = enc_x.reshape(Bb, S8, Fp).astype(bf16)
        enc_comb3 = enc_comb.reshape(Bb, S8, Fp).astype(bf16)

    # ============================= Decoder =============================
    comb_d = (trg + trg) + pe_tgt_ref[...]
    comb_d2 = comb_d.reshape(rows_d, Fp)
    dx = mm(comb_d2, dw_e2h_ref, db_e2h_ref)               # (rows_d, Hp)

    if pad_d8 > 0:   # causal left-pad rows, written once (value = tgt_pad_idx)
        xp_dec_ref[:, pl.ds(0, pad_d8), :] = jnp.full(
            (Bb, pad_d8, Hp), tgt_pad_idx, f32)

    key_valid = lax.broadcasted_iota(jnp.int32, (Bb, T8, Sp), 2) < s_len
    neg_big = jnp.float32(-1e30)
    attn = jnp.zeros((Bb, T8, Sp), f32)

    for layer in range(L):
        xp_dec_ref[:, pl.ds(pad_d8, T8), :] = dx.reshape(Bb, T8, Hp)
        g = conv_glu(xp_dec_ref, pad_d8 - (K - 1), T8, dwc_ref, dbc_ref, layer)

        # _calc_attn -- note: the alaapNet source really uses the GLU output g
        # (its `convd`) as the residual around the attention, so that is kept.
        conv_x = mm(g, dw_ah2e_ref, db_ah2e_ref)           # (rows_d, Fp)
        comb = ((conv_x + comb_d2) * scale).reshape(Bb, T8, Fp).astype(bf16)
        energy = jnp.einsum('btf,bsf->bts', comb, enc_conv3,
                            preferred_element_type=f32)    # (Bb, T8, Sp)
        energy = jnp.where(key_valid, energy, neg_big)     # mask padded keys
        m = jnp.max(energy, axis=-1, keepdims=True)
        p = jnp.exp(energy - m)
        attn = p * (1.0 / jnp.sum(p, axis=-1, keepdims=True))  # exact softmax
        attn_enc = jnp.einsum('bts,bsf->btf', attn.astype(bf16), enc_comb3,
                              preferred_element_type=f32)  # (Bb, T8, Fp)
        ae = mm(attn_enc.reshape(rows_d, Fp), dw_ae2h_ref, db_ae2h_ref)
        convd = (g + ae) * scale
        dx = (g + convd) * scale

    out = mm(dx, dw_h2e_ref, db_h2e_ref)                   # (rows_d, Fp)
    out_ref[...] = out.reshape(Bb, T8, Fp)
    # TODO(synk): emit attn (and out) in bf16 if downstream tolerates it.
    attn_ref[...] = attn


def conv_seq2seq_forward(x, trg, params, *, num_layers, kernel_size,
                         tgt_pad_idx, max_len, b_blk=1):
    """ConvSeq2Seq.forward(x, trg) -> (out, attn) via one fused Pallas call."""
    f32, bf16 = jnp.float32, jnp.bfloat16
    B, S, F = x.shape
    _, T, _ = trg.shape
    H = params["e_we2h"].shape[1]
    K, L = kernel_size, num_layers
    assert K % 2 == 1, "Kernel size must be odd!"
    assert S <= max_len and T <= max_len
    assert B % b_blk == 0

    # Compute padding (sublane) is decoupled from lane padding.
    S8, T8 = _round_up(S, 8), _round_up(T, 8)
    S_pad = _round_up(S, 128)          # lane-dense attention key axis
    F_pad = _round_up(F, 128)          # lane-aligned feature axis
    H_pad = _round_up(H, 128)          # lane-aligned hidden axis / GLU split

    pad_l = (K - 1) // 2               # encoder "same" padding
    pad_l8 = _round_up(pad_l, 8)       # left-pad regions rounded to 8 sublanes
    pad_d8 = _round_up(K - 1, 8)       # so the per-layer body store is aligned
    rows_enc = _round_up(pad_l8 + S8 + pad_l, 8)
    rows_dec = pad_d8 + T8

    pe = _sinusoidal_pe(max_len, F)
    x_p = _pad_to(x.astype(f32), (B, S8, F_pad))
    trg_p = _pad_to(trg.astype(f32), (B, T8, F_pad))
    pe_src = _pad_to(pe[:S], (S8, F_pad))
    pe_tgt = _pad_to(pe[:T], (T8, F_pad))

    def w2(name, shape):
        return _pad_to(params[name], shape).astype(bf16)

    def b2(name, shape):
        return _pad_to(params[name], shape).astype(f32)

    ewc, ebc = _pad_conv_weights(params["e_wc"], params["e_bc"], H, H_pad)
    dwc, dbc = _pad_conv_weights(params["d_wc"], params["d_bc"], H, H_pad)

    operands = (
        x_p, trg_p, pe_src, pe_tgt,
        w2("e_we2h", (F_pad, H_pad)), b2("e_be2h", (1, H_pad)),
        w2("e_wh2e", (H_pad, F_pad)), b2("e_bh2e", (1, F_pad)),
        ewc.astype(bf16), ebc.astype(f32),
        w2("d_we2h", (F_pad, H_pad)), b2("d_be2h", (1, H_pad)),
        w2("d_wh2e", (H_pad, F_pad)), b2("d_bh2e", (1, F_pad)),
        w2("d_wah2e", (H_pad, F_pad)), b2("d_bah2e", (1, F_pad)),
        w2("d_wae2h", (F_pad, H_pad)), b2("d_bae2h", (1, H_pad)),
        dwc.astype(bf16), dbc.astype(f32),
    )

    def bmap3(i):
        return (i, 0, 0)

    def cmap2(i):
        return (0, 0)

    def cmap3(i):
        return (0, 0, 0)

    in_specs = [
        pl.BlockSpec((b_blk, S8, F_pad), bmap3),
        pl.BlockSpec((b_blk, T8, F_pad), bmap3),
        pl.BlockSpec((S8, F_pad), cmap2),
        pl.BlockSpec((T8, F_pad), cmap2),
    ]
    for a in operands[4:]:
        in_specs.append(pl.BlockSpec(a.shape, cmap2 if a.ndim == 2 else cmap3))

    out_specs = (
        pl.BlockSpec((b_blk, T8, F_pad), bmap3),
        pl.BlockSpec((b_blk, T8, S_pad), bmap3),
    )
    out_shape = (
        jax.ShapeDtypeStruct((B, T8, F_pad), f32),
        jax.ShapeDtypeStruct((B, T8, S_pad), f32),
    )
    scratch_shapes = [
        pltpu.VMEM((b_blk, rows_enc, H_pad), f32),   # encoder "same"-pad buffer
        pltpu.VMEM((b_blk, rows_dec, H_pad), f32),   # decoder causal-pad buffer
    ]

    # Explicit VMEM budget (v7x: 64 MiB physical / 32 MiB scoped default;
    # v5e: 16 MiB scoped default).  Keep under ~56 MiB.
    def nbytes(a):
        return int(a.size) * a.dtype.itemsize

    weight_bytes = sum(nbytes(a) for a in operands[2:])      # resident (pe + weights)
    step_io = 4 * b_blk * (S8 * F_pad + 3 * T8 * F_pad + T8 * S_pad)
    scratch_bytes = 4 * b_blk * (rows_enc + rows_dec) * H_pad
    live_bytes = 4 * b_blk * (2 * S_pad * F_pad + 3 * T8 * S_pad
                              + (S8 + T8) * (K + 4) * H_pad
                              + 4 * (S8 + T8) * F_pad)
    vmem_limit = int(min(56 << 20, max(32 << 20,
                                       2 * step_io + weight_bytes
                                       + scratch_bytes + live_bytes + (4 << 20))))

    kernel = partial(_conv_seq2seq_kernel, L, K, float(tgt_pad_idx), S,
                     pad_l, pad_l8, pad_d8)
    out_pad, attn_pad = pl.pallas_call(
        kernel,
        grid=(B // b_blk,),                 # independent batch blocks
        in_specs=in_specs,
        out_specs=out_specs,
        out_shape=out_shape,
        scratch_shapes=scratch_shapes,
        compiler_params=pltpu.CompilerParams(
            dimension_semantics=("parallel",),
            vmem_limit_bytes=vmem_limit),
    )(*operands)

    return out_pad[:, :T, :F], attn_pad[:, :T, :S]


def _reference_forward(x, trg, params, *, num_layers, kernel_size,
                       tgt_pad_idx, max_len):
    """Pure-JAX f32 mirror of the PyTorch module (eval mode), for validation."""
    scale = jnp.float32(_SCALE)
    K = kernel_size
    B, S, Fd = x.shape
    T = trg.shape[1]
    H = params["e_we2h"].shape[1]
    pe = _sinusoidal_pe(max_len, Fd)

    def lin(v, w, b):
        return v @ w + b

    def conv_glu(v, wc, bc, left, right, pad_val):
        n = v.shape[1]
        vp = jnp.pad(v, ((0, 0), (left, right), (0, 0)), constant_values=pad_val)
        y = sum(vp[:, k:k + n, :] @ wc[k] for k in range(K)) + bc
        return y[..., :H] * jax.nn.sigmoid(y[..., H:])

    # Encoder
    comb_e = (x + pe[:S]) + x
    ex = lin(comb_e, params["e_we2h"], params["e_be2h"])
    pad_l = (K - 1) // 2
    for l in range(num_layers):
        g = conv_glu(ex, params["e_wc"][l], params["e_bc"][l], pad_l, pad_l, 0.0)
        ex = (g + ex) * scale
    enc_x = lin(ex, params["e_wh2e"], params["e_bh2e"])
    enc_comb = (enc_x + comb_e) * scale

    # Decoder
    comb_d = (trg + pe[:T]) + trg
    dx = lin(comb_d, params["d_we2h"], params["d_be2h"])
    attn = None
    for l in range(num_layers):
        g = conv_glu(dx, params["d_wc"][l], params["d_bc"][l],
                     K - 1, 0, float(tgt_pad_idx))
        conv_x = lin(g, params["d_wah2e"], params["d_bah2e"])
        comb = (conv_x + comb_d) * scale
        energy = jnp.einsum('btf,bsf->bts', comb, enc_x)
        attn = jax.nn.softmax(energy, axis=-1)
        attn_enc = jnp.einsum('bts,bsf->btf', attn, enc_comb)
        ae = lin(attn_enc, params["d_wae2h"], params["d_bae2h"])
        convd = (g + ae) * scale
        dx = (g + convd) * scale
    out = lin(dx, params["d_wh2e"], params["d_bh2e"])
    return out, attn


if __name__ == "__main__":
    # Small shapes: batch=2, src_len=10, tgt_len=8, feature=16, hidden=32,
    # 2 conv layers, kernel_size=3.
    B, S, T = 2, 10, 8
    F, H, L, K = 16, 32, 2, 3
    tgt_pad_idx = 0
    max_len = 50

    key = jax.random.PRNGKey(0)
    ks = iter(jax.random.split(key, 32))

    def linear(fin, fout):
        # PyTorch Linear weight is (out, in); stored here pre-transposed (in, out).
        bound = 1.0 / math.sqrt(fin)
        w_ = jax.random.uniform(next(ks), (fin, fout), jnp.float32, -bound, bound)
        b_ = jax.random.uniform(next(ks), (1, fout), jnp.float32, -bound, bound)
        return w_, b_

    def conv_stack():
        # PyTorch Conv1d weight is (2H, H, K) per layer; stored pre-transposed
        # as (L, K, H, 2H).
        bound = 1.0 / math.sqrt(H * K)
        w_ = jax.random.uniform(next(ks), (L, K, H, 2 * H), jnp.float32, -bound, bound)
        b_ = jax.random.uniform(next(ks), (L, 1, 2 * H), jnp.float32, -bound, bound)
        return w_, b_

    params = {}
    params["e_we2h"], params["e_be2h"] = linear(F, H)
    params["e_wh2e"], params["e_bh2e"] = linear(H, F)
    params["e_wc"], params["e_bc"] = conv_stack()
    params["d_we2h"], params["d_be2h"] = linear(F, H)
    params["d_wh2e"], params["d_bh2e"] = linear(H, F)
    params["d_wah2e"], params["d_bah2e"] = linear(H, F)
    params["d_wae2h"], params["d_bae2h"] = linear(F, H)
    params["d_wc"], params["d_bc"] = conv_stack()

    x = jax.random.normal(next(ks), (B, S, F), jnp.float32)
    trg = jax.random.normal(next(ks), (B, T, F), jnp.float32)

    out, attn = conv_seq2seq_forward(
        x, trg, params, num_layers=L, kernel_size=K,
        tgt_pad_idx=tgt_pad_idx, max_len=max_len)
    jax.block_until_ready((out, attn))

    assert out.shape == (B, T, F)
    assert attn.shape == (B, T, S)
    assert bool(jnp.all(jnp.isfinite(out)))
    # Attention rows are an exact softmax over the (unpadded) source positions.
    assert bool(jnp.allclose(jnp.sum(attn, axis=-1), 1.0, atol=1e-3))

    # Pure-JAX f32 reference; the kernel feeds bf16 into the MXU, so compare
    # with a bf16-scale tolerance.
    ref_out, ref_attn = _reference_forward(
        x, trg, params, num_layers=L, kernel_size=K,
        tgt_pad_idx=tgt_pad_idx, max_len=max_len)
    out_err = float(jnp.max(jnp.abs(out - ref_out)))
    out_mag = float(jnp.max(jnp.abs(ref_out))) + 1e-6
    attn_err = float(jnp.max(jnp.abs(attn - ref_attn)))
    assert out_err <= 0.1 * out_mag, (out_err, out_mag)
    assert attn_err <= 0.05, attn_err
    print("KERNEL_OK")
</pallas_src>

<mosaic_0001>
module attributes {stable_mosaic.version = 11 : i64} {
  func.func @_conv_seq2seq_kernel(%arg0: i32, %arg1: memref<1x16x128xf32, #tpu.memory_space<vmem>>, %arg2: memref<1x8x128xf32, #tpu.memory_space<vmem>>, %arg3: memref<16x128xf32, #tpu.memory_space<vmem>>, %arg4: memref<8x128xf32, #tpu.memory_space<vmem>>, %arg5: memref<128x128xbf16, #tpu.memory_space<vmem>>, %arg6: memref<1x128xf32, #tpu.memory_space<vmem>>, %arg7: memref<128x128xbf16, #tpu.memory_space<vmem>>, %arg8: memref<1x128xf32, #tpu.memory_space<vmem>>, %arg9: memref<2x384x256xbf16, #tpu.memory_space<vmem>>, %arg10: memref<2x1x256xf32, #tpu.memory_space<vmem>>, %arg11: memref<128x128xbf16, #tpu.memory_space<vmem>>, %arg12: memref<1x128xf32, #tpu.memory_space<vmem>>, %arg13: memref<128x128xbf16, #tpu.memory_space<vmem>>, %arg14: memref<1x128xf32, #tpu.memory_space<vmem>>, %arg15: memref<128x128xbf16, #tpu.memory_space<vmem>>, %arg16: memref<1x128xf32, #tpu.memory_space<vmem>>, %arg17: memref<128x128xbf16, #tpu.memory_space<vmem>>, %arg18: memref<1x128xf32, #tpu.memory_space<vmem>>, %arg19: memref<2x384x256xbf16, #tpu.memory_space<vmem>>, %arg20: memref<2x1x256xf32, #tpu.memory_space<vmem>>, %arg21: memref<1x8x128xf32, #tpu.memory_space<vmem>>, %arg22: memref<1x8x128xf32, #tpu.memory_space<vmem>>, %arg23: memref<1x32x128xf32, #tpu.memory_space<vmem>>, %arg24: memref<1x16x128xf32, #tpu.memory_space<vmem>>) attributes {dimension_semantics = [#tpu.dimension_semantics<parallel>], iteration_bounds = array<i64: 2>, scalar_prefetch = 0 : i64, scratch_operands = 2 : i64, tpu.core_type = #tpu.core_type<tc>, window_params = [{transform_indices = @transform_0, window_bounds = array<i64: 1, 16, 128>}, {transform_indices = @transform_1, window_bounds = array<i64: 1, 8, 128>}, {pipeline_mode = #tpu.pipeline_mode<synchronous>, transform_indices = @transform_2, window_bounds = array<i64: 16, 128>}, {pipeline_mode = #tpu.pipeline_mode<synchronous>, transform_indices = @transform_3, window_bounds = array<i64: 8, 128>}, {pipeline_mode = #tpu.pipeline_mode<synchronous>, transform_indices = @transform_4, window_bounds = array<i64: 128, 128>}, {pipeline_mode = #tpu.pipeline_mode<synchronous>, transform_indices = @transform_5, window_bounds = array<i64: 1, 128>}, {pipeline_mode = #tpu.pipeline_mode<synchronous>, transform_indices = @transform_6, window_bounds = array<i64: 128, 128>}, {pipeline_mode = #tpu.pipeline_mode<synchronous>, transform_indices = @transform_7, window_bounds = array<i64: 1, 128>}, {pipeline_mode = #tpu.pipeline_mode<synchronous>, transform_indices = @transform_8, window_bounds = array<i64: 2, 384, 256>}, {pipeline_mode = #tpu.pipeline_mode<synchronous>, transform_indices = @transform_9, window_bounds = array<i64: 2, 1, 256>}, {pipeline_mode = #tpu.pipeline_mode<synchronous>, transform_indices = @transform_10, window_bounds = array<i64: 128, 128>}, {pipeline_mode = #tpu.pipeline_mode<synchronous>, transform_indices = @transform_11, window_bounds = array<i64: 1, 128>}, {pipeline_mode = #tpu.pipeline_mode<synchronous>, transform_indices = @transform_12, window_bounds = array<i64: 128, 128>}, {pipeline_mode = #tpu.pipeline_mode<synchronous>, transform_indices = @transform_13, window_bounds = array<i64: 1, 128>}, {pipeline_mode = #tpu.pipeline_mode<synchronous>, transform_indices = @transform_14, window_bounds = array<i64: 128, 128>}, {pipeline_mode = #tpu.pipeline_mode<synchronous>, transform_indices = @transform_15, window_bounds = array<i64: 1, 128>}, {pipeline_mode = #tpu.pipeline_mode<synchronous>, transform_indices = @transform_16, window_bounds = array<i64: 128, 128>}, {pipeline_mode = #tpu.pipeline_mode<synchronous>, transform_indices = @transform_17, window_bounds = array<i64: 1, 128>}, {pipeline_mode = #tpu.pipeline_mode<synchronous>, transform_indices = @transform_18, window_bounds = array<i64: 2, 384, 256>}, {pipeline_mode = #tpu.pipeline_mode<synchronous>, transform_indices = @transform_19, window_bounds = array<i64: 2, 1, 256>}, {transform_indices = @transform_20, window_bounds = array<i64: 1, 8, 128>}, {transform_indices = @transform_21, window_bounds = array<i64: 1, 8, 128>}]} {
    %c0 = arith.constant 0 : index
    %c0_0 = arith.constant 0 : index
    %c0_1 = arith.constant 0 : index
    %0 = vector.load %arg1[%c0, %c0_0, %c0_1] : memref<1x16x128xf32, #tpu.memory_space<vmem>>, vector<1x16x128xf32>
    %c0_2 = arith.constant 0 : index
    %c0_3 = arith.constant 0 : index
    %c0_4 = arith.constant 0 : index
    %1 = vector.load %arg2[%c0_2, %c0_3, %c0_4] : memref<1x8x128xf32, #tpu.memory_space<vmem>>, vector<1x8x128xf32>
    %2 = arith.addf %0, %0 : vector<1x16x128xf32>
    %c0_5 = arith.constant 0 : index
    %c0_6 = arith.constant 0 : index
    %3 = vector.load %arg3[%c0_5, %c0_6] : memref<16x128xf32, #tpu.memory_space<vmem>>, vector<16x128xf32>
    %4 = vector.shape_cast %3 : vector<16x128xf32> to vector<1x16x128xf32>
    %5 = arith.addf %2, %4 : vector<1x16x128xf32>
    %6 = vector.shape_cast %5 : vector<1x16x128xf32> to vector<16x128xf32>
    %7 = arith.truncf %6 : vector<16x128xf32> to vector<16x128xbf16>
    %c0_7 = arith.constant 0 : index
    %c0_8 = arith.constant 0 : index
    %8 = vector.load %arg5[%c0_7, %c0_8] : memref<128x128xbf16, #tpu.memory_space<vmem>>, vector<128x128xbf16>
    %cst = arith.constant dense<0.000000e+00> : vector<16x128xf32>
    %9 = tpu.matmul %7, %8, %cst {dimension_numbers = #tpu.dot_dimension_numbers<[1], [0], [0], [1], [0, 0, 1, 1], [], []>} : vector<16x128xbf16>, vector<128x128xbf16>, vector<16x128xf32> -> vector<16x128xf32>
    %c0_9 = arith.constant 0 : index
    %c0_10 = arith.constant 0 : index
    %10 = vector.load %arg6[%c0_9, %c0_10] : memref<1x128xf32, #tpu.memory_space<vmem>>, vector<1x128xf32>
    %11 = vector.broadcast %10 : vector<1x128xf32> to vector<16x128xf32>
    %12 = arith.addf %9, %11 : vector<16x128xf32>
    %cst_11 = arith.constant 0.000000e+00 : f32
    %13 = vector.broadcast %cst_11 : f32 to vector<1x8x128xf32>
    %c0_12 = arith.constant 0 : index
    %c0_13 = arith.constant 0 : index
    %c0_14 = arith.constant 0 : index
    %14 = vector.load %arg23[%c0_12, %c0_13, %c0_14] : memref<1x32x128xf32, #tpu.memory_space<vmem>>, vector<1x8x128xf32>
    tpu.vector_store %arg23[%c0_12, %c0_13, %c0_14], %13 {strides = array<i32>} : memref<1x32x128xf32, #tpu.memory_space<vmem>>, vector<1x8x128xf32>,
    %cst_15 = arith.constant 0.000000e+00 : f32
    %15 = vector.broadcast %cst_15 : f32 to vector<1x8x128xf32>
    %c0_16 = arith.constant 0 : index
    %c24 = arith.constant 24 : index
    %c0_17 = arith.constant 0 : index
    %16 = vector.load %arg23[%c0_16, %c24, %c0_17] : memref<1x32x128xf32, #tpu.memory_space<vmem>>, vector<1x8x128xf32>
    tpu.vector_store %arg23[%c0_16, %c24, %c0_17], %15 {strides = array<i32>} : memref<1x32x128xf32, #tpu.memory_space<vmem>>, vector<1x8x128xf32>,
    %17 = tpu.iota {dimensions = array<i32: 1>} : vector<1x16x128xi32>
    %c10_i32 = arith.constant 10 : i32
    %18 = vector.broadcast %c10_i32 : i32 to vector<1x16x128xi32>
    %19 = arith.cmpi slt, %17, %18 : vector<1x16x128xi32>
    %20 = vector.shape_cast %12 : vector<16x128xf32> to vector<1x16x128xf32>
    %cst_18 = arith.constant 0.000000e+00 : f32
    %21 = vector.broadcast %cst_18 : f32 to vector<1x16x128xf32>
    %22 = arith.select %19, %20, %21 : vector<1x16x128xi1>, vector<1x16x128xf32>
    %c0_19 = arith.constant 0 : index
    %c8 = arith.constant 8 : index
    %c0_20 = arith.constant 0 : index
    %23 = vector.load %arg23[%c0_19, %c8, %c0_20] : memref<1x32x128xf32, #tpu.memory_space<vmem>>, vector<1x16x128xf32>
    tpu.vector_store %arg23[%c0_19, %c8, %c0_20], %22 {strides = array<i32>} : memref<1x32x128xf32, #tpu.memory_space<vmem>>, vector<1x16x128xf32>,
    %c0_21 = arith.constant 0 : index
    %c7 = arith.constant 7 : index
    %c0_22 = arith.constant 0 : index
    %24 = vector.load %arg23[%c0_21, %c7, %c0_22] : memref<1x32x128xf32, #tpu.memory_space<vmem>>, vector<1x16x128xf32>
    %c0_23 = arith.constant 0 : index
    %c8_24 = arith.constant 8 : index
    %c0_25 = arith.constant 0 : index
    %25 = vector.load %arg23[%c0_23, %c8_24, %c0_25] : memref<1x32x128xf32, #tpu.memory_space<vmem>>, vector<1x16x128xf32>
    %c0_26 = arith.constant 0 : index
    %c9 = arith.constant 9 : index
    %c0_27 = arith.constant 0 : index
    %26 = vector.load %arg23[%c0_26, %c9, %c0_27] : memref<1x32x128xf32, #tpu.memory_space<vmem>>, vector<1x16x128xf32>
    %27 = tpu.concatenate %24, %25, %26 in 2 : vector<1x16x128xf32>, vector<1x16x128xf32>, vector<1x16x128xf32> -> vector<1x16x384xf32>
    %28 = vector.shape_cast %27 : vector<1x16x384xf32> to vector<16x384xf32>
    %29 = arith.truncf %28 : vector<16x384xf32> to vector<16x384xbf16>
    %c0_28 = arith.constant 0 : index
    %c0_29 = arith.constant 0 : index
    %c0_30 = arith.constant 0 : index
    %30 = vector.load %arg9[%c0_28, %c0_29, %c0_30] : memref<2x384x256xbf16, #tpu.memory_space<vmem>>, vector<1x384x256xbf16>
    %31 = vector.shape_cast %30 : vector<1x384x256xbf16> to vector<384x256xbf16>
    %cst_31 = arith.constant dense<0.000000e+00> : vector<16x256xf32>
    %32 = tpu.matmul %29, %31, %cst_31 {dimension_numbers = #tpu.dot_dimension_numbers<[1], [0], [0], [1], [0, 0, 1, 1], [], []>} : vector<16x384xbf16>, vector<384x256xbf16>, vector<16x256xf32> -> vector<16x256xf32>
    %c0_32 = arith.constant 0 : index
    %c0_33 = arith.constant 0 : index
    %c0_34 = arith.constant 0 : index
    %33 = vector.load %arg10[%c0_32, %c0_33, %c0_34] : memref<2x1x256xf32, #tpu.memory_space<vmem>>, vector<1x1x256xf32>
    %34 = vector.shape_cast %33 : vector<1x1x256xf32> to vector<1x256xf32>
    %35 = vector.broadcast %34 : vector<1x256xf32> to vector<16x256xf32>
    %36 = arith.addf %32, %35 : vector<16x256xf32>
    %37 = vector.extract_strided_slice %36 {offsets = [0, 0], sizes = [16, 128], strides = [1, 1]} : vector<16x256xf32> to vector<16x128xf32>
    %38 = vector.extract_strided_slice %36 {offsets = [0, 128], sizes = [16, 128], strides = [1, 1]} : vector<16x256xf32> to vector<16x128xf32>
    %39 = arith.negf %38 : vector<16x128xf32>
    %40 = math.exp %39 : vector<16x128xf32>
    %cst_35 = arith.constant 1.000000e+00 : f32
    %41 = vector.broadcast %cst_35 : f32 to vector<16x128xf32>
    %42 = arith.addf %41, %40 : vector<16x128xf32>
    %43 = arith.divf %41, %42 : vector<16x128xf32>
    %44 = arith.mulf %37, %43 : vector<16x128xf32>
    %45 = arith.addf %44, %12 : vector<16x128xf32>
    %cst_36 = arith.constant 0.707106769 : f32
    %46 = vector.broadcast %cst_36 : f32 to vector<16x128xf32>
    %47 = arith.mulf %45, %46 : vector<16x128xf32>
    %48 = vector.shape_cast %47 : vector<16x128xf32> to vector<1x16x128xf32>
    %cst_37 = arith.constant 0.000000e+00 : f32
    %49 = vector.broadcast %cst_37 : f32 to vector<1x16x128xf32>
    %50 = arith.select %19, %48, %49 : vector<1x16x128xi1>, vector<1x16x128xf32>
    %c0_38 = arith.constant 0 : index
    %c8_39 = arith.constant 8 : index
    %c0_40 = arith.constant 0 : index
    %51 = vector.load %arg23[%c0_38, %c8_39, %c0_40] : memref<1x32x128xf32, #tpu.memory_space<vmem>>, vector<1x16x128xf32>
    tpu.vector_store %arg23[%c0_38, %c8_39, %c0_40], %50 {strides = array<i32>} : memref<1x32x128xf32, #tpu.memory_space<vmem>>, vector<1x16x128xf32>,
    %c0_41 = arith.constant 0 : index
    %c7_42 = arith.constant 7 : index
    %c0_43 = arith.constant 0 : index
    %52 = vector.load %arg23[%c0_41, %c7_42, %c0_43] : memref<1x32x128xf32, #tpu.memory_space<vmem>>, vector<1x16x128xf32>
    %c0_44 = arith.constant 0 : index
    %c8_45 = arith.constant 8 : index
    %c0_46 = arith.constant 0 : index
    %53 = vector.load %arg23[%c0_44, %c8_45, %c0_46] : memref<1x32x128xf32, #tpu.memory_space<vmem>>, vector<1x16x128xf32>
    %c0_47 = arith.constant 0 : index
    %c9_48 = arith.constant 9 : index
    %c0_49 = arith.constant 0 : index
    %54 = vector.load %arg23[%c0_47, %c9_48, %c0_49] : memref<1x32x128xf32, #tpu.memory_space<vmem>>, vector<1x16x128xf32>
    %55 = tpu.concatenate %52, %53, %54 in 2 : vector<1x16x128xf32>, vector<1x16x128xf32>, vector<1x16x128xf32> -> vector<1x16x384xf32>
    %56 = vector.shape_cast %55 : vector<1x16x384xf32> to vector<16x384xf32>
    %57 = arith.truncf %56 : vector<16x384xf32> to vector<16x384xbf16>
    %c1 = arith.constant 1 : index
    %c0_50 = arith.constant 0 : index
    %c0_51 = arith.constant 0 : index
    %58 = vector.load %arg9[%c1, %c0_50, %c0_51] : memref<2x384x256xbf16, #tpu.memory_space<vmem>>, vector<1x384x256xbf16>
    %59 = vector.shape_cast %58 : vector<1x384x256xbf16> to vector<384x256xbf16>
    %cst_52 = arith.constant dense<0.000000e+00> : vector<16x256xf32>
    %60 = tpu.matmul %57, %59, %cst_52 {dimension_numbers = #tpu.dot_dimension_numbers<[1], [0], [0], [1], [0, 0, 1, 1], [], []>} : vector<16x384xbf16>, vector<384x256xbf16>, vector<16x256xf32> -> vector<16x256xf32>
    %c1_53 = arith.constant 1 : index
    %c0_54 = arith.constant 0 : index
    %c0_55 = arith.constant 0 : index
    %61 = vector.load %arg10[%c1_53, %c0_54, %c0_55] : memref<2x1x256xf32, #tpu.memory_space<vmem>>, vector<1x1x256xf32>
    %62 = vector.shape_cast %61 : vector<1x1x256xf32> to vector<1x256xf32>
    %63 = vector.broadcast %62 : vector<1x256xf32> to vector<16x256xf32>
    %64 = arith.addf %60, %63 : vector<16x256xf32>
    %65 = vector.extract_strided_slice %64 {offsets = [0, 0], sizes = [16, 128], strides = [1, 1]} : vector<16x256xf32> to vector<16x128xf32>
    %66 = vector.extract_strided_slice %64 {offsets = [0, 128], sizes = [16, 128], strides = [1, 1]} : vector<16x256xf32> to vector<16x128xf32>
    %67 = arith.negf %66 : vector<16x128xf32>
    %68 = math.exp %67 : vector<16x128xf32>
    %cst_56 = arith.constant 1.000000e+00 : f32
    %69 = vector.broadcast %cst_56 : f32 to vector<16x128xf32>
    %70 = arith.addf %69, %68 : vector<16x128xf32>
    %71 = arith.divf %69, %70 : vector<16x128xf32>
    %72 = arith.mulf %65, %71 : vector<16x128xf32>
    %73 = arith.addf %72, %47 : vector<16x128xf32>
    %cst_57 = arith.constant 0.707106769 : f32
    %74 = vector.broadcast %cst_57 : f32 to vector<16x128xf32>
    %75 = arith.mulf %73, %74 : vector<16x128xf32>
    %76 = arith.truncf %75 : vector<16x128xf32> to vector<16x128xbf16>
    %c0_58 = arith.constant 0 : index
    %c0_59 = arith.constant 0 : index
    %77 = vector.load %arg7[%c0_58, %c0_59] : memref<128x128xbf16, #tpu.memory_space<vmem>>, vector<128x128xbf16>
    %cst_60 = arith.constant dense<0.000000e+00> : vector<16x128xf32>
    %78 = tpu.matmul %76, %77, %cst_60 {dimension_numbers = #tpu.dot_dimension_numbers<[1], [0], [0], [1], [0, 0, 1, 1], [], []>} : vector<16x128xbf16>, vector<128x128xbf16>, vector<16x128xf32> -> vector<16x128xf32>
    %c0_61 = arith.constant 0 : index
    %c0_62 = arith.constant 0 : index
    %79 = vector.load %arg8[%c0_61, %c0_62] : memref<1x128xf32, #tpu.memory_space<vmem>>, vector<1x128xf32>
    %80 = vector.broadcast %79 : vector<1x128xf32> to vector<16x128xf32>
    %81 = arith.addf %78, %80 : vector<16x128xf32>
    %82 = arith.addf %81, %6 : vector<16x128xf32>
    %cst_63 = arith.constant 0.707106769 : f32
    %83 = vector.broadcast %cst_63 : f32 to vector<16x128xf32>
    %84 = arith.mulf %82, %83 : vector<16x128xf32>
    %cst_64 = arith.constant 0.000000e+00 : f32
    %85 = vector.broadcast %cst_64 : f32 to vector<1x112x128xf32>
    %86 = vector.shape_cast %81 : vector<16x128xf32> to vector<1x16x128xf32>
    %87 = tpu.concatenate %86, %85 in 1 : vector<1x16x128xf32>, vector<1x112x128xf32> -> vector<1x128x128xf32>
    %88 = arith.truncf %87 : vector<1x128x128xf32> to vector<1x128x128xbf16>
    %89 = vector.shape_cast %84 : vector<16x128xf32> to vector<1x16x128xf32>
    %90 = tpu.concatenate %89, %85 in 1 : vector<1x16x128xf32>, vector<1x112x128xf32> -> vector<1x128x128xf32>
    %91 = arith.truncf %90 : vector<1x128x128xf32> to vector<1x128x128xbf16>
    %92 = arith.addf %1, %1 : vector<1x8x128xf32>
    %c0_65 = arith.constant 0 : index
    %c0_66 = arith.constant 0 : index
    %93 = vector.load %arg4[%c0_65, %c0_66] : memref<8x128xf32, #tpu.memory_space<vmem>>, vector<8x128xf32>
    %94 = vector.shape_cast %93 : vector<8x128xf32> to vector<1x8x128xf32>
    %95 = arith.addf %92, %94 : vector<1x8x128xf32>
    %96 = vector.shape_cast %95 : vector<1x8x128xf32> to vector<8x128xf32>
    %97 = arith.truncf %96 : vector<8x128xf32> to vector<8x128xbf16>
    %c0_67 = arith.constant 0 : index
    %c0_68 = arith.constant 0 : index
    %98 = vector.load %arg11[%c0_67, %c0_68] : memref<128x128xbf16, #tpu.memory_space<vmem>>, vector<128x128xbf16>
    %cst_69 = arith.constant dense<0.000000e+00> : vector<8x128xf32>
    %99 = tpu.matmul %97, %98, %cst_69 {dimension_numbers = #tpu.dot_dimension_numbers<[1], [0], [0], [1], [0, 0, 1, 1], [], []>} : vector<8x128xbf16>, vector<128x128xbf16>, vector<8x128xf32> -> vector<8x128xf32>
    %c0_70 = arith.constant 0 : index
    %c0_71 = arith.constant 0 : index
    %100 = vector.load %arg12[%c0_70, %c0_71] : memref<1x128xf32, #tpu.memory_space<vmem>>, vector<1x128xf32>
    %101 = vector.broadcast %100 : vector<1x128xf32> to vector<8x128xf32>
    %102 = arith.addf %99, %101 : vector<8x128xf32>
    %cst_72 = arith.constant 0.000000e+00 : f32
    %103 = vector.broadcast %cst_72 : f32 to vector<1x8x128xf32>
    %c0_73 = arith.constant 0 : index
    %c0_74 = arith.constant 0 : index
    %c0_75 = arith.constant 0 : index
    %104 = vector.load %arg24[%c0_73, %c0_74, %c0_75] : memref<1x16x128xf32, #tpu.memory_space<vmem>>, vector<1x8x128xf32>
    tpu.vector_store %arg24[%c0_73, %c0_74, %c0_75], %103 {strides = array<i32>} : memref<1x16x128xf32, #tpu.memory_space<vmem>>, vector<1x8x128xf32>,
    %105 = tpu.iota {dimensions = array<i32: 2>} : vector<1x8x128xi32>
    %c10_i32_76 = arith.constant 10 : i32
    %106 = vector.broadcast %c10_i32_76 : i32 to vector<1x8x128xi32>
    %107 = arith.cmpi slt, %105, %106 : vector<1x8x128xi32>
    %108 = vector.shape_cast %102 : vector<8x128xf32> to vector<1x8x128xf32>
    %c0_77 = arith.constant 0 : index
    %c8_78 = arith.constant 8 : index
    %c0_79 = arith.constant 0 : index
    %109 = vector.load %arg24[%c0_77, %c8_78, %c0_79] : memref<1x16x128xf32, #tpu.memory_space<vmem>>, vector<1x8x128xf32>
    tpu.vector_store %arg24[%c0_77, %c8_78, %c0_79], %108 {strides = array<i32>} : memref<1x16x128xf32, #tpu.memory_space<vmem>>, vector<1x8x128xf32>,
    %c0_80 = arith.constant 0 : index
    %c6 = arith.constant 6 : index
    %c0_81 = arith.constant 0 : index
    %110 = vector.load %arg24[%c0_80, %c6, %c0_81] : memref<1x16x128xf32, #tpu.memory_space<vmem>>, vector<1x8x128xf32>
    %c0_82 = arith.constant 0 : index
    %c7_83 = arith.constant 7 : index
    %c0_84 = arith.constant 0 : index
    %111 = vector.load %arg24[%c0_82, %c7_83, %c0_84] : memref<1x16x128xf32, #tpu.memory_space<vmem>>, vector<1x8x128xf32>
    %c0_85 = arith.constant 0 : index
    %c8_86 = arith.constant 8 : index
    %c0_87 = arith.constant 0 : index
    %112 = vector.load %arg24[%c0_85, %c8_86, %c0_87] : memref<1x16x128xf32, #tpu.memory_space<vmem>>, vector<1x8x128xf32>
    %113 = tpu.concatenate %110, %111, %112 in 2 : vector<1x8x128xf32>, vector<1x8x128xf32>, vector<1x8x128xf32> -> vector<1x8x384xf32>
    %114 = vector.shape_cast %113 : vector<1x8x384xf32> to vector<8x384xf32>
    %115 = arith.truncf %114 : vector<8x384xf32> to vector<8x384xbf16>
    %c0_88 = arith.constant 0 : index
    %c0_89 = arith.constant 0 : index
    %c0_90 = arith.constant 0 : index
    %116 = vector.load %arg19[%c0_88, %c0_89, %c0_90] : memref<2x384x256xbf16, #tpu.memory_space<vmem>>, vector<1x384x256xbf16>
    %117 = vector.shape_cast %116 : vector<1x384x256xbf16> to vector<384x256xbf16>
    %cst_91 = arith.constant dense<0.000000e+00> : vector<8x256xf32>
    %118 = tpu.matmul %115, %117, %cst_91 {dimension_numbers = #tpu.dot_dimension_numbers<[1], [0], [0], [1], [0, 0, 1, 1], [], []>} : vector<8x384xbf16>, vector<384x256xbf16>, vector<8x256xf32> -> vector<8x256xf32>
    %c0_92 = arith.constant 0 : index
    %c0_93 = arith.constant 0 : index
    %c0_94 = arith.constant 0 : index
    %119 = vector.load %arg20[%c0_92, %c0_93, %c0_94] : memref<2x1x256xf32, #tpu.memory_space<vmem>>, vector<1x1x256xf32>
    %120 = vector.shape_cast %119 : vector<1x1x256xf32> to vector<1x256xf32>
    %121 = vector.broadcast %120 : vector<1x256xf32> to vector<8x256xf32>
    %122 = arith.addf %118, %121 : vector<8x256xf32>
    %123 = vector.extract_strided_slice %122 {offsets = [0, 0], sizes = [8, 128], strides = [1, 1]} : vector<8x256xf32> to vector<8x128xf32>
    %124 = vector.extract_strided_slice %122 {offsets = [0, 128], sizes = [8, 128], strides = [1, 1]} : vector<8x256xf32> to vector<8x128xf32>
    %125 = arith.negf %124 : vector<8x128xf32>
    %126 = math.exp %125 : vector<8x128xf32>
    %cst_95 = arith.constant 1.000000e+00 : f32
    %127 = vector.broadcast %cst_95 : f32 to vector<8x128xf32>
    %128 = arith.addf %127, %126 : vector<8x128xf32>
    %129 = arith.divf %127, %128 : vector<8x128xf32>
    %130 = arith.mulf %123, %129 : vector<8x128xf32>
    %131 = arith.truncf %130 : vector<8x128xf32> to vector<8x128xbf16>
    %c0_96 = arith.constant 0 : index
    %c0_97 = arith.constant 0 : index
    %132 = vector.load %arg15[%c0_96, %c0_97] : memref<128x128xbf16, #tpu.memory_space<vmem>>, vector<128x128xbf16>
    %cst_98 = arith.constant dense<0.000000e+00> : vector<8x128xf32>
    %133 = tpu.matmul %131, %132, %cst_98 {dimension_numbers = #tpu.dot_dimension_numbers<[1], [0], [0], [1], [0, 0, 1, 1], [], []>} : vector<8x128xbf16>, vector<128x128xbf16>, vector<8x128xf32> -> vector<8x128xf32>
    %c0_99 = arith.constant 0 : index
    %c0_100 = arith.constant 0 : index
    %134 = vector.load %arg16[%c0_99, %c0_100] : memref<1x128xf32, #tpu.memory_space<vmem>>, vector<1x128xf32>
    %135 = vector.broadcast %134 : vector<1x128xf32> to vector<8x128xf32>
    %136 = arith.addf %133, %135 : vector<8x128xf32>
    %137 = arith.addf %136, %96 : vector<8x128xf32>
    %cst_101 = arith.constant 0.707106769 : f32
    %138 = vector.broadcast %cst_101 : f32 to vector<8x128xf32>
    %139 = arith.mulf %137, %138 : vector<8x128xf32>
    %140 = vector.shape_cast %139 : vector<8x128xf32> to vector<1x8x128xf32>
    %141 = arith.truncf %140 : vector<1x8x128xf32> to vector<1x8x128xbf16>
    "tpu.trace_start"() <{level = 10 : i32, message = "btf,bsf->bts"}> : () -> ()
    %cst_102 = arith.constant dense<0.000000e+00> : vector<1x8x128xf32>
    %142 = tpu.matmul %141, %88, %cst_102 {dimension_numbers = #tpu.dot_dimension_numbers<[2], [2], [1], [1], [0, 0, 0, 1, 1, 1], [0], [0]>} : vector<1x8x128xbf16>, vector<1x128x128xbf16>, vector<1x8x128xf32> -> vector<1x8x128xf32>
    %cst_103 = arith.constant -1.000000e+30 : f32
    "tpu.trace_stop"() : () -> ()
    %143 = vector.broadcast %cst_103 : f32 to vector<1x8x128xf32>
    %144 = arith.select %107, %142, %143 : vector<1x8x128xi1>, vector<1x8x128xf32>
    %cst_104 = arith.constant dense<0xFF800000> : vector<1x8xf32>
    %145 = vector.multi_reduction <maximumf>, %144, %cst_104 [2] : vector<1x8x128xf32> to vector<1x8xf32>
    %146 = vector.shape_cast %145 : vector<1x8xf32> to vector<1x8x1xf32>
    %147 = vector.broadcast %146 : vector<1x8x1xf32> to vector<1x8x128xf32>
    %148 = arith.subf %144, %147 : vector<1x8x128xf32>
    %149 = math.exp %148 : vector<1x8x128xf32>
    %cst_105 = arith.constant dense<0.000000e+00> : vector<1x8xf32>
    %150 = vector.multi_reduction <add>, %149, %cst_105 [2] : vector<1x8x128xf32> to vector<1x8xf32>
    %151 = vector.shape_cast %150 : vector<1x8xf32> to vector<1x8x1xf32>
    %cst_106 = arith.constant 1.000000e+00 : f32
    %152 = vector.broadcast %cst_106 : f32 to vector<1x8x1xf32>
    %153 = arith.divf %152, %151 : vector<1x8x1xf32>
    %154 = vector.broadcast %153 : vector<1x8x1xf32> to vector<1x8x128xf32>
    %155 = arith.mulf %149, %154 : vector<1x8x128xf32>
    %156 = arith.truncf %155 : vector<1x8x128xf32> to vector<1x8x128xbf16>
    "tpu.trace_start"() <{level = 10 : i32, message = "bts,bsf->btf"}> : () -> ()
    %cst_107 = arith.constant dense<0.000000e+00> : vector<1x8x128xf32>
    %157 = tpu.matmul %156, %91, %cst_107 {dimension_numbers = #tpu.dot_dimension_numbers<[2], [1], [1], [2], [0, 0, 0, 1, 1, 2], [0], [0]>} : vector<1x8x128xbf16>, vector<1x128x128xbf16>, vector<1x8x128xf32> -> vector<1x8x128xf32>
    "tpu.trace_stop"() : () -> ()
    %158 = vector.shape_cast %157 : vector<1x8x128xf32> to vector<8x128xf32>
    %159 = arith.truncf %158 : vector<8x128xf32> to vector<8x128xbf16>
    %c0_108 = arith.constant 0 : index
    %c0_109 = arith.constant 0 : index
    %160 = vector.load %arg17[%c0_108, %c0_109] : memref<128x128xbf16, #tpu.memory_space<vmem>>, vector<128x128xbf16>
    %cst_110 = arith.constant dense<0.000000e+00> : vector<8x128xf32>
    %161 = tpu.matmul %159, %160, %cst_110 {dimension_numbers = #tpu.dot_dimension_numbers<[1], [0], [0], [1], [0, 0, 1, 1], [], []>} : vector<8x128xbf16>, vector<128x128xbf16>, vector<8x128xf32> -> vector<8x128xf32>
    %c0_111 = arith.constant 0 : index
    %c0_112 = arith.constant 0 : index
    %162 = vector.load %arg18[%c0_111, %c0_112] : memref<1x128xf32, #tpu.memory_space<vmem>>, vector<1x128xf32>
    %163 = vector.broadcast %162 : vector<1x128xf32> to vector<8x128xf32>
    %164 = arith.addf %161, %163 : vector<8x128xf32>
    %165 = arith.addf %130, %164 : vector<8x128xf32>
    %cst_113 = arith.constant 0.707106769 : f32
    %166 = vector.broadcast %cst_113 : f32 to vector<8x128xf32>
    %167 = arith.mulf %165, %166 : vector<8x128xf32>
    %168 = arith.addf %130, %167 : vector<8x128xf32>
    %cst_114 = arith.constant 0.707106769 : f32
    %169 = vector.broadcast %cst_114 : f32 to vector<8x128xf32>
    %170 = arith.mulf %168, %169 : vector<8x128xf32>
    %171 = vector.shape_cast %170 : vector<8x128xf32> to vector<1x8x128xf32>
    %c0_115 = arith.constant 0 : index
    %c8_116 = arith.constant 8 : index
    %c0_117 = arith.constant 0 : index
    %172 = vector.load %arg24[%c0_115, %c8_116, %c0_117] : memref<1x16x128xf32, #tpu.memory_space<vmem>>, vector<1x8x128xf32>
    tpu.vector_store %arg24[%c0_115, %c8_116, %c0_117], %171 {strides = array<i32>} : memref<1x16x128xf32, #tpu.memory_space<vmem>>, vector<1x8x128xf32>,
    %c0_118 = arith.constant 0 : index
    %c6_119 = arith.constant 6 : index
    %c0_120 = arith.constant 0 : index
    %173 = vector.load %arg24[%c0_118, %c6_119, %c0_120] : memref<1x16x128xf32, #tpu.memory_space<vmem>>, vector<1x8x128xf32>
    %c0_121 = arith.constant 0 : index
    %c7_122 = arith.constant 7 : index
    %c0_123 = arith.constant 0 : index
    %174 = vector.load %arg24[%c0_121, %c7_122, %c0_123] : memref<1x16x128xf32, #tpu.memory_space<vmem>>, vector<1x8x128xf32>
    %c0_124 = arith.constant 0 : index
    %c8_125 = arith.constant 8 : index
    %c0_126 = arith.constant 0 : index
    %175 = vector.load %arg24[%c0_124, %c8_125, %c0_126] : memref<1x16x128xf32, #tpu.memory_space<vmem>>, vector<1x8x128xf32>
    %176 = tpu.concatenate %173, %174, %175 in 2 : vector<1x8x128xf32>, vector<1x8x128xf32>, vector<1x8x128xf32> -> vector<1x8x384xf32>
    %177 = vector.shape_cast %176 : vector<1x8x384xf32> to vector<8x384xf32>
    %178 = arith.truncf %177 : vector<8x384xf32> to vector<8x384xbf16>
    %c1_127 = arith.constant 1 : index
    %c0_128 = arith.constant 0 : index
    %c0_129 = arith.constant 0 : index
    %179 = vector.load %arg19[%c1_127, %c0_128, %c0_129] : memref<2x384x256xbf16, #tpu.memory_space<vmem>>, vector<1x384x256xbf16>
    %180 = vector.shape_cast %179 : vector<1x384x256xbf16> to vector<384x256xbf16>
    %cst_130 = arith.constant dense<0.000000e+00> : vector<8x256xf32>
    %181 = tpu.matmul %178, %180, %cst_130 {dimension_numbers = #tpu.dot_dimension_numbers<[1], [0], [0], [1], [0, 0, 1, 1], [], []>} : vector<8x384xbf16>, vector<384x256xbf16>, vector<8x256xf32> -> vector<8x256xf32>
    %c1_131 = arith.constant 1 : index
    %c0_132 = arith.constant 0 : index
    %c0_133 = arith.constant 0 : index
    %182 = vector.load %arg20[%c1_131, %c0_132, %c0_133] : memref<2x1x256xf32, #tpu.memory_space<vmem>>, vector<1x1x256xf32>
    %183 = vector.shape_cast %182 : vector<1x1x256xf32> to vector<1x256xf32>
    %184 = vector.broadcast %183 : vector<1x256xf32> to vector<8x256xf32>
    %185 = arith.addf %181, %184 : vector<8x256xf32>
    %186 = vector.extract_strided_slice %185 {offsets = [0, 0], sizes = [8, 128], strides = [1, 1]} : vector<8x256xf32> to vector<8x128xf32>
    %187 = vector.extract_strided_slice %185 {offsets = [0, 128], sizes = [8, 128], strides = [1, 1]} : vector<8x256xf32> to vector<8x128xf32>
    %188 = arith.negf %187 : vector<8x128xf32>
    %189 = math.exp %188 : vector<8x128xf32>
    %cst_134 = arith.constant 1.000000e+00 : f32
    %190 = vector.broadcast %cst_134 : f32 to vector<8x128xf32>
    %191 = arith.addf %190, %189 : vector<8x128xf32>
    %192 = arith.divf %190, %191 : vector<8x128xf32>
    %193 = arith.mulf %186, %192 : vector<8x128xf32>
    %194 = arith.truncf %193 : vector<8x128xf32> to vector<8x128xbf16>
    %c0_135 = arith.constant 0 : index
    %c0_136 = arith.constant 0 : index
    %195 = vector.load %arg15[%c0_135, %c0_136] : memref<128x128xbf16, #tpu.memory_space<vmem>>, vector<128x128xbf16>
    %cst_137 = arith.constant dense<0.000000e+00> : vector<8x128xf32>
    %196 = tpu.matmul %194, %195, %cst_137 {dimension_numbers = #tpu.dot_dimension_numbers<[1], [0], [0], [1], [0, 0, 1, 1], [], []>} : vector<8x128xbf16>, vector<128x128xbf16>, vector<8x128xf32> -> vector<8x128xf32>
    %c0_138 = arith.constant 0 : index
    %c0_139 = arith.constant 0 : index
    %197 = vector.load %arg16[%c0_138, %c0_139] : memref<1x128xf32, #tpu.memory_space<vmem>>, vector<1x128xf32>
    %198 = vector.broadcast %197 : vector<1x128xf32> to vector<8x128xf32>
    %199 = arith.addf %196, %198 : vector<8x128xf32>
    %200 = arith.addf %199, %96 : vector<8x128xf32>
    %cst_140 = arith.constant 0.707106769 : f32
    %201 = vector.broadcast %cst_140 : f32 to vector<8x128xf32>
    %202 = arith.mulf %200, %201 : vector<8x128xf32>
    %203 = vector.shape_cast %202 : vector<8x128xf32> to vector<1x8x128xf32>
    %204 = arith.truncf %203 : vector<1x8x128xf32> to vector<1x8x128xbf16>
    "tpu.trace_start"() <{level = 10 : i32, message = "btf,bsf->bts"}> : () -> ()
    %cst_141 = arith.constant dense<0.000000e+00> : vector<1x8x128xf32>
    %205 = tpu.matmul %204, %88, %cst_141 {dimension_numbers = #tpu.dot_dimension_numbers<[2], [2], [1], [1], [0, 0, 0, 1, 1, 1], [0], [0]>} : vector<1x8x128xbf16>, vector<1x128x128xbf16>, vector<1x8x128xf32> -> vector<1x8x128xf32>
    %cst_142 = arith.constant -1.000000e+30 : f32
    "tpu.trace_stop"() : () -> ()
    %206 = vector.broadcast %cst_142 : f32 to vector<1x8x128xf32>
    %207 = arith.select %107, %205, %206 : vector<1x8x128xi1>, vector<1x8x128xf32>
    %cst_143 = arith.constant dense<0xFF800000> : vector<1x8xf32>
    %208 = vector.multi_reduction <maximumf>, %207, %cst_143 [2] : vector<1x8x128xf32> to vector<1x8xf32>
    %209 = vector.shape_cast %208 : vector<1x8xf32> to vector<1x8x1xf32>
    %210 = vector.broadcast %209 : vector<1x8x1xf32> to vector<1x8x128xf32>
    %211 = arith.subf %207, %210 : vector<1x8x128xf32>
    %212 = math.exp %211 : vector<1x8x128xf32>
    %cst_144 = arith.constant dense<0.000000e+00> : vector<1x8xf32>
    %213 = vector.multi_reduction <add>, %212, %cst_144 [2] : vector<1x8x128xf32> to vector<1x8xf32>
    %214 = vector.shape_cast %213 : vector<1x8xf32> to vector<1x8x1xf32>
    %cst_145 = arith.constant 1.000000e+00 : f32
    %215 = vector.broadcast %cst_145 : f32 to vector<1x8x1xf32>
    %216 = arith.divf %215, %214 : vector<1x8x1xf32>
    %217 = vector.broadcast %216 : vector<1x8x1xf32> to vector<1x8x128xf32>
    %218 = arith.mulf %212, %217 : vector<1x8x128xf32>
    %219 = arith.truncf %218 : vector<1x8x128xf32> to vector<1x8x128xbf16>
    "tpu.trace_start"() <{level = 10 : i32, message = "bts,bsf->btf"}> : () -> ()
    %cst_146 = arith.constant dense<0.000000e+00> : vector<1x8x128xf32>
    %220 = tpu.matmul %219, %91, %cst_146 {dimension_numbers = #tpu.dot_dimension_numbers<[2], [1], [1], [2], [0, 0, 0, 1, 1, 2], [0], [0]>} : vector<1x8x128xbf16>, vector<1x128x128xbf16>, vector<1x8x128xf32> -> vector<1x8x128xf32>
    "tpu.trace_stop"() : () -> ()
    %221 = vector.shape_cast %220 : vector<1x8x128xf32> to vector<8x128xf32>
    %222 = arith.truncf %221 : vector<8x128xf32> to vector<8x128xbf16>
    %c0_147 = arith.constant 0 : index
    %c0_148 = arith.constant 0 : index
    %223 = vector.load %arg17[%c0_147, %c0_148] : memref<128x128xbf16, #tpu.memory_space<vmem>>, vector<128x128xbf16>
    %cst_149 = arith.constant dense<0.000000e+00> : vector<8x128xf32>
    %224 = tpu.matmul %222, %223, %cst_149 {dimension_numbers = #tpu.dot_dimension_numbers<[1], [0], [0], [1], [0, 0, 1, 1], [], []>} : vector<8x128xbf16>, vector<128x128xbf16>, vector<8x128xf32> -> vector<8x128xf32>
    %c0_150 = arith.constant 0 : index
    %c0_151 = arith.constant 0 : index
    %225 = vector.load %arg18[%c0_150, %c0_151] : memref<1x128xf32, #tpu.memory_space<vmem>>, vector<1x128xf32>
    %226 = vector.broadcast %225 : vector<1x128xf32> to vector<8x128xf32>
    %227 = arith.addf %224, %226 : vector<8x128xf32>
    %228 = arith.addf %193, %227 : vector<8x128xf32>
    %cst_152 = arith.constant 0.707106769 : f32
    %229 = vector.broadcast %cst_152 : f32 to vector<8x128xf32>
    %230 = arith.mulf %228, %229 : vector<8x128xf32>
    %231 = arith.addf %193, %230 : vector<8x128xf32>
    %cst_153 = arith.constant 0.707106769 : f32
    %232 = vector.broadcast %cst_153 : f32 to vector<8x128xf32>
    %233 = arith.mulf %231, %232 : vector<8x128xf32>
    %234 = arith.truncf %233 : vector<8x128xf32> to vector<8x128xbf16>
    %c0_154 = arith.constant 0 : index
    %c0_155 = arith.constant 0 : index
    %235 = vector.load %arg13[%c0_154, %c0_155] : memref<128x128xbf16, #tpu.memory_space<vmem>>, vector<128x128xbf16>
    %cst_156 = arith.constant dense<0.000000e+00> : vector<8x128xf32>
    %236 = tpu.matmul %234, %235, %cst_156 {dimension_numbers = #tpu.dot_dimension_numbers<[1], [0], [0], [1], [0, 0, 1, 1], [], []>} : vector<8x128xbf16>, vector<128x128xbf16>, vector<8x128xf32> -> vector<8x128xf32>
    %c0_157 = arith.constant 0 : index
    %c0_158 = arith.constant 0 : index
    %237 = vector.load %arg14[%c0_157, %c0_158] : memref<1x128xf32, #tpu.memory_space<vmem>>, vector<1x128xf32>
    %238 = vector.broadcast %237 : vector<1x128xf32> to vector<8x128xf32>
    %239 = arith.addf %236, %238 : vector<8x128xf32>
    %240 = vector.shape_cast %239 : vector<8x128xf32> to vector<1x8x128xf32>
    %c0_159 = arith.constant 0 : index
    %c0_160 = arith.constant 0 : index
    %c0_161 = arith.constant 0 : index
    %241 = vector.load %arg21[%c0_159, %c0_160, %c0_161] : memref<1x8x128xf32, #tpu.memory_space<vmem>>, vector<1x8x128xf32>
    tpu.vector_store %arg21[%c0_159, %c0_160, %c0_161], %240 {strides = array<i32>} : memref<1x8x128xf32, #tpu.memory_space<vmem>>, vector<1x8x128xf32>,
    %c0_162 = arith.constant 0 : index
    %c0_163 = arith.constant 0 : index
    %c0_164 = arith.constant 0 : index
    %242 = vector.load %arg22[%c0_162, %c0_163, %c0_164] : memref<1x8x128xf32, #tpu.memory_space<vmem>>, vector<1x8x128xf32>
    tpu.vector_store %arg22[%c0_162, %c0_163, %c0_164], %218 {strides = array<i32>} : memref<1x8x128xf32, #tpu.memory_space<vmem>>, vector<1x8x128xf32>,
    return
  }
  func.func @transform_0(%arg0: i32) -> (i32, i32, i32) {
    %c0_i32 = arith.constant 0 : i32
    %c0_i32_0 = arith.constant 0 : i32
    %c0_i32_1 = arith.constant 0 : i32
    return %arg0, %c0_i32, %c0_i32_0 : i32, i32, i32
  }
  func.func @transform_1(%arg0: i32) -> (i32, i32, i32) {
    %c0_i32 = arith.constant 0 : i32
    %c0_i32_0 = arith.constant 0 : i32
    %c0_i32_1 = arith.constant 0 : i32
    return %arg0, %c0_i32, %c0_i32_0 : i32, i32, i32
  }
  func.func @transform_2(%arg0: i32) -> (i32, i32) {
    %c0_i32 = arith.constant 0 : i32
    %c0_i32_0 = arith.constant 0 : i32
    %c0_i32_1 = arith.constant 0 : i32
    return %c0_i32, %c0_i32_0 : i32, i32
  }
  func.func @transform_3(%arg0: i32) -> (i32, i32) {
    %c0_i32 = arith.constant 0 : i32
    %c0_i32_0 = arith.constant 0 : i32
    %c0_i32_1 = arith.constant 0 : i32
    return %c0_i32, %c0_i32_0 : i32, i32
  }
  func.func @transform_4(%arg0: i32) -> (i32, i32) {
    %c0_i32 = arith.constant 0 : i32
    %c0_i32_0 = arith.constant 0 : i32
    %c0_i32_1 = arith.constant 0 : i32
    return %c0_i32, %c0_i32_0 : i32, i32
  }
  func.func @transform_5(%arg0: i32) -> (i32, i32) {
    %c0_i32 = arith.constant 0 : i32
    %c0_i32_0 = arith.constant 0 : i32
    %c0_i32_1 = arith.constant 0 : i32
    return %c0_i32, %c0_i32_0 : i32, i32
  }
  func.func @transform_6(%arg0: i32) -> (i32, i32) {
    %c0_i32 = arith.constant 0 : i32
    %c0_i32_0 = arith.constant 0 : i32
    %c0_i32_1 = arith.constant 0 : i32
    return %c0_i32, %c0_i32_0 : i32, i32
  }
  func.func @transform_7(%arg0: i32) -> (i32, i32) {
    %c0_i32 = arith.constant 0 : i32
    %c0_i32_0 = arith.constant 0 : i32
    %c0_i32_1 = arith.constant 0 : i32
    return %c0_i32, %c0_i32_0 : i32, i32
  }
  func.func @transform_8(%arg0: i32) -> (i32, i32, i32) {
    %c0_i32 = arith.constant 0 : i32
    %c0_i32_0 = arith.constant 0 : i32
    %c0_i32_1 = arith.constant 0 : i32
    %c0_i32_2 = arith.constant 0 : i32
    return %c0_i32, %c0_i32_0, %c0_i32_1 : i32, i32, i32
  }
  func.func @transform_9(%arg0: i32) -> (i32, i32, i32) {
    %c0_i32 = arith.constant 0 : i32
    %c0_i32_0 = arith.constant 0 : i32
    %c0_i32_1 = arith.constant 0 : i32
    %c0_i32_2 = arith.constant 0 : i32
    return %c0_i32, %c0_i32_0, %c0_i32_1 : i32, i32, i32
  }
  func.func @transform_10(%arg0: i32) -> (i32, i32) {
    %c0_i32 = arith.constant 0 : i32
    %c0_i32_0 = arith.constant 0 : i32
    %c0_i32_1 = arith.constant 0 : i32
    return %c0_i32, %c0_i32_0 : i32, i32
  }
  func.func @transform_11(%arg0: i32) -> (i32, i32) {
    %c0_i32 = arith.constant 0 : i32
    %c0_i32_0 = arith.constant 0 : i32
    %c0_i32_1 = arith.constant 0 : i32
    return %c0_i32, %c0_i32_0 : i32, i32
  }
  func.func @transform_12(%arg0: i32) -> (i32, i32) {
    %c0_i32 = arith.constant 0 : i32
    %c0_i32_0 = arith.constant 0 : i32
    %c0_i32_1 = arith.constant 0 : i32
    return %c0_i32, %c0_i32_0 : i32, i32
  }
  func.func @transform_13(%arg0: i32) -> (i32, i32) {
    %c0_i32 = arith.constant 0 : i32
    %c0_i32_0 = arith.constant 0 : i32
    %c0_i32_1 = arith.constant 0 : i32
    return %c0_i32, %c0_i32_0 : i32, i32
  }
  func.func @transform_14(%arg0: i32) -> (i32, i32) {
    %c0_i32 = arith.constant 0 : i32
    %c0_i32_0 = arith.constant 0 : i32
    %c0_i32_1 = arith.constant 0 : i32
    return %c0_i32, %c0_i32_0 : i32, i32
  }
  func.func @transform_15(%arg0: i32) -> (i32, i32) {
    %c0_i32 = arith.constant 0 : i32
    %c0_i32_0 = arith.constant 0 : i32
    %c0_i32_1 = arith.constant 0 : i32
    return %c0_i32, %c0_i32_0 : i32, i32
  }
  func.func @transform_16(%arg0: i32) -> (i32, i32) {
    %c0_i32 = arith.constant 0 : i32
    %c0_i32_0 = arith.constant 0 : i32
    %c0_i32_1 = arith.constant 0 : i32
    return %c0_i32, %c0_i32_0 : i32, i32
  }
  func.func @transform_17(%arg0: i32) -> (i32, i32) {
    %c0_i32 = arith.constant 0 : i32
    %c0_i32_0 = arith.constant 0 : i32
    %c0_i32_1 = arith.constant 0 : i32
    return %c0_i32, %c0_i32_0 : i32, i32
  }
  func.func @transform_18(%arg0: i32) -> (i32, i32, i32) {
    %c0_i32 = arith.constant 0 : i32
    %c0_i32_0 = arith.constant 0 : i32
    %c0_i32_1 = arith.constant 0 : i32
    %c0_i32_2 = arith.constant 0 : i32
    return %c0_i32, %c0_i32_0, %c0_i32_1 : i32, i32, i32
  }
  func.func @transform_19(%arg0: i32) -> (i32, i32, i32) {
    %c0_i32 = arith.constant 0 : i32
    %c0_i32_0 = arith.constant 0 : i32
    %c0_i32_1 = arith.constant 0 : i32
    %c0_i32_2 = arith.constant 0 : i32
    return %c0_i32, %c0_i32_0, %c0_i32_1 : i32, i32, i32
  }
  func.func @transform_20(%arg0: i32) -> (i32, i32, i32) {
    %c0_i32 = arith.constant 0 : i32
    %c0_i32_0 = arith.constant 0 : i32
    %c0_i32_1 = arith.constant 0 : i32
    return %arg0, %c0_i32, %c0_i32_0 : i32, i32, i32
  }
  func.func @transform_21(%arg0: i32) -> (i32, i32, i32) {
    %c0_i32 = arith.constant 0 : i32
    %c0_i32_0 = arith.constant 0 : i32
    %c0_i32_1 = arith.constant 0 : i32
    return %arg0, %c0_i32, %c0_i32_0 : i32, i32, i32
  }
}

</mosaic_0001>

<bundles_post_ra>
// kernel: tpu_custom_call.1
= control target key start
LH: loop header
LB: loop body
LE: loop exit
PB: predicated region body
PF: predicated region fallthrough
CT: control target
= control target key end

     0   :  { %s6446_s0 = inlined_call_operand.hbm [shape: f32[2,16,128], index: 0, kind: input, shape index: {}]   ;;  %s6447_s1 = inlined_call_operand.hbm [shape: f32[2,8,128], index: 1, kind: input, shape index: {}]   ;;  %s6448_s2 = inlined_call_operand.hbm [shape: f32[16,128], index: 2, kind: input, shape index: {}]   ;;  %s6449_s3 = inlined_call_operand.hbm [shape: f32[8,128], index: 3, kind: input, shape index: {}]   ;;  %s6450_s4 = inlined_call_operand.hbm [shape: bf16[128,128], index: 4, kind: input, shape index: {}]   ;;  %s6451_s5 = inlined_call_operand.hbm [shape: f32[1,128], index: 5, kind: input, shape index: {}]   ;;  %s6452_s6 = inlined_call_operand.hbm [shape: bf16[128,128], index: 6, kind: input, shape index: {}]   ;;  %s6453_s7 = inlined_call_operand.hbm [shape: f32[1,128], index: 7, kind: input, shape index: {}]   ;;  %s6454_s8 = inlined_call_operand.hbm [shape: bf16[2,384,256], index: 8, kind: input, shape index: {}]   ;;  %s6455_s9 = inlined_call_operand.vmem [shape: f32[2,1,256], index: 9, kind: input, shape index: {}]   ;;  %s6456_s10 = inlined_call_operand.hbm [shape: bf16[128,128], index: 10, kind: input, shape index: {}]   ;;  %s6457_s11 = inlined_call_operand.vmem [shape: f32[1,128], index: 11, kind: input, shape index: {}]   ;;  %s6458_s12 = inlined_call_operand.hbm [shape: bf16[128,128], index: 12, kind: input, shape index: {}]   ;;  %s6459_s13 = inlined_call_operand.vmem [shape: f32[1,128], index: 13, kind: input, shape index: {}]   ;;  %s6460_s14 = inlined_call_operand.hbm [shape: bf16[128,128], index: 14, kind: input, shape index: {}]   ;;  %s6461_s15 = inlined_call_operand.vmem [shape: f32[1,128], index: 15, kind: input, shape index: {}]   ;;  %s6462_s16 = inlined_call_operand.hbm [shape: bf16[128,128], index: 16, kind: input, shape index: {}]   ;;  %s6463_s17 = inlined_call_operand.vmem [shape: f32[1,128], index: 17, kind: input, shape index: {}]   ;;  %s6464_s18 = inlined_call_operand.hbm [shape: bf16[2,384,256], index: 18, kind: input, shape index: {}]   ;;  %s6465_s19 = inlined_call_operand.vmem [shape: f32[2,1,256], index: 19, kind: input, shape index: {}]   ;;  %s6466_s20 = inlined_call_operand.hbm [shape: f32[2,8,128], index: 20, kind: output, shape index: {0}]   ;;  %s6467_s21 = inlined_call_operand.hbm [shape: f32[2,8,128], index: 21, kind: output, shape index: {1}]  }
   0x1   :  { %6481 = sst [smem:[#allocation43_spill]] %s6446_s0 }
   0x2   :  { %6482 = sst [smem:[#allocation44_spill]] %s6447_s1 }
   0x3   :  { %6483 = sst [smem:[#allocation45_spill]] %s6448_s2 }
   0x4   :  { %6484 = sst [smem:[#allocation46_spill]] %s6449_s3 }
   0x5   :  { %6485 = sst [smem:[#allocation47_spill]] %s6450_s4 }
   0x6   :  { %6486 = sst [smem:[#allocation48_spill]] %s6451_s5 }
   0x7   :  { %6487 = sst [smem:[#allocation49_spill]] %s6452_s6 }
   0x8   :  { %6488 = sst [smem:[#allocation50_spill]] %s6453_s7 }
   0x9   :  { %6489 = sst [smem:[#allocation51_spill]] %s6454_s8 }
   0xa   :  { %6490 = sst [smem:[#allocation52_spill]] %s6456_s10 }
   0xb   :  { %6491 = sst [smem:[#allocation53_spill]] %s6458_s12 }
   0xc   :  { %6492 = sst [smem:[#allocation54_spill]] %s6459_s13 }
   0xd   :  { %6493 = sst [smem:[#allocation55_spill]] %s6460_s14 }
   0xe   :  { %6494 = sst [smem:[#allocation56_spill]] %s6461_s15 }
   0xf   :  { %6495 = sst [smem:[#allocation57_spill]] %s6462_s16 }
  0x10   :  { %6496 = sst [smem:[#allocation58_spill]] %s6463_s17 }
  0x11   :  { %6497 = sst [smem:[#allocation59_spill]] %s6464_s18 }
  0x12   :  { %6498 = sst [smem:[#allocation60_spill]] %s6465_s19 }
  0x13   :  { %6499 = sst [smem:[#allocation61_spill]] %s6466_s20 }
  0x14   :  { %6500 = sst [smem:[#allocation62_spill]] %s6467_s21 }
  0x15   :  { %27 = vsyncpa [#allocation5], 0 }
  0x16   :  { %29 = vsyncpa [#allocation5 + $0x1], 0 }
  0x17   :  { %30 = vsyncpa [#allocation8], 0 }
  0x18   :  { %32 = vsyncpa [#allocation8 + $0x1], 0 }
  0x19   :  { %33 = vsyncpa [#allocation11], 0 }
  0x1a   :  { %34 = vsyncpa [#allocation14], 0 }
  0x1b   :  { %35 = vsyncpa [#allocation17], 0 }
  0x1c   :  { %36 = vsyncpa [#allocation20], 0 }
  0x1d   :  { %37 = vsyncpa [#allocation23], 0 }
  0x1e   :  { %38 = vsyncpa [#allocation26], 0 }
  0x1f   :  { %39 = vsyncpa [#allocation6], 0 }
  0x20   :  { %41 = vsyncpa [#allocation6 + $0x1], 0 }
  0x21   :  { %42 = vsyncpa [#allocation29], 0 }
  0x22   :  { %44 = vsyncpa [#allocation29 + $0x1], 0  ;;  %s5938_s2 = smov 0   ;;  %s5940_s25 = smov 0  }
  0x23   :  { %s5942_s26 = smov 0   ;;  %s5944_s27 = smov 0  }
  0x24 LB: > { %6501 = sst [smem:[#allocation41_spill]] %s5803_s26  ;;  %s5962_s4 = sadd.s32 4294967295, %s5807_s27   ;;  %s5807_s27 = sphi %s5944_s27, %s6541_s27   ;;  %s5803_s26 = sphi %s5942_s26, %s6538_s26   ;;  %s5799_s25 = sphi %s5940_s25, %s6540_s25   ;;  %s5795_s2 = sphi %s5938_s2, %s6539_s2  }
  0x25   : > { %s6502_s29 = sld [smem:[#allocation45_spill]]  ;;  %p3691_p0 = scmp.ge.s32.totalorder %s5807_s27, 1 }
  0x26   : > { %p71_p1 = scmp.eq.s32.totalorder %s5962_s4, 0  ;;  %p537_p2 = scmp.lt.s32.totalorder %s5807_s27, 3 }
  0x27   : > { %s5809_s5 = smov [#allocation9]   ;;  %s6504_s24 = sld [smem:[#allocation46_spill]] }
  0x28   : > { %p5967_p3 = pnand %p3691_p0, %p537_p2  ;;  %s550_s22 = sshll.u32 %s5809_s5, 4  ;;  %s551_s22 = int_to_ptr.vmem [resolvable:$true] %s550_s22 }
  0x29   : > { %s6506_s5 = sld [smem:[#allocation48_spill]]  ;;  %s5810_s21 = smov [#allocation10]  }
  0x2a   : > { %p5078_p4 = pneg %p5967_p3  ;;  %s565_s17 = sshll.u32 %s5810_s21, 4  ;;  %s566_s17 = int_to_ptr.vmem [resolvable:$true] %s565_s17 }
  0x2b   : > { %s548_s0 = sshll.u32 %s6502_s29, 4  ;;  %s6475_s15 = smov 128   ;;  %s549_s0 = int_to_ptr.hbm [resolvable:$true] %s548_s0 }
  0x2c   : > { %p5979_p6 = pnand %p5078_p4, %p71_p1  ;;  %s6477_s19 = smov 8  }
  0x2d   : > { %s563_s3 = sshll.u32 %s6504_s24, 4  ;;  %s6507_s7 = sld [smem:[#allocation50_spill]]  ;;  %s564_s3 = int_to_ptr.hbm [resolvable:$true] %s563_s3 }
  0x2e   : > { %5081 = dma.hbm_to_vmem [thread:$0]  (!%p5979_p6), %s549_s0, 256, %s551_s22, [#allocation8], %s6475_s15, %s6475_s15, %s6477_s19  }
  0x2f   : > { %s589_s20 = sshll.u32 %s6506_s5, 4  ;;  %s5813_s13 = smov [#allocation13]   ;;  %s590_s20 = int_to_ptr.hbm [resolvable:$true] %s589_s20 }
  0x30   : > { %5084 = dma.hbm_to_vmem [thread:$0]  (!%p5979_p6), %s564_s3, 128, %s566_s17, [#allocation11]  }
  0x31   : > { %s591_s29 = sshll.u32 %s5813_s13, 4  ;;  %s5814_s21 = smov [#allocation16]   ;;  %s592_s29 = int_to_ptr.vmem [resolvable:$true] %s591_s29 }
  0x32   : > { %5090 = dma.hbm_to_vmem [thread:$0]  (!%p5979_p6), %s590_s20, 16, %s592_s29, [#allocation14]  }
  0x33   : > { %s615_s24 = sshll.u32 %s6507_s7, 4  ;;  %s617_s5 = sshll.u32 %s5814_s21, 4  ;;  %s616_s24 = int_to_ptr.hbm [resolvable:$true] %s615_s24  ;;  %s618_s5 = int_to_ptr.vmem [resolvable:$true] %s617_s5 }
  0x34   : > { %5096 = dma.hbm_to_vmem [thread:$0]  (!%p5979_p6), %s616_s24, 16, %s618_s5, [#allocation17]  }
  0x35   : > { %s6508_s10 = sld [smem:[#allocation52_spill]]  ;;  %s5815_s3 = smov [#allocation19]  }
  0x36   : > { %s645_s23 = sshll.u32 %s5815_s3, 4  ;;  %s6509_s14 = sld [smem:[#allocation55_spill]]  ;;  %s646_s23 = int_to_ptr.vmem [resolvable:$true] %s645_s23 }
  0x37   : > { %s5816_s20 = smov 64   ;;  %s5817_s29 = smov 4  }
  0x38   : > { %s5818_s24 = smov [#allocation22]   ;;  %s6510_s22 = sld [smem:[#allocation47_spill]] }
  0x39   : > { %s679_s21 = sshll.u32 %s5818_s24, 4  ;;  %s6511_s6 = sld [smem:[#allocation49_spill]]  ;;  %s680_s21 = int_to_ptr.vmem [resolvable:$true] %s679_s21 }
  0x3a   : > { %s5820_s24 = smov [#allocation15]   ;;  %s6512_s8 = sld [smem:[#allocation51_spill]] }
  0x3b   : > { %s643_s17 = sshll.u32 %s6508_s10, 4  ;;  %s602_s5 = sshll.u32 %s5820_s24, 4  ;;  %s644_s17 = int_to_ptr.hbm [resolvable:$true] %s643_s17  ;;  %s603_s5 = int_to_ptr.vmem [resolvable:$true] %s602_s5 }
  0x3c   : > { %s677_s15 = sshll.u32 %s6509_s14, 4  ;;  %s6513_s12 = sld [smem:[#allocation53_spill]]  ;;  %s678_s15 = int_to_ptr.hbm [resolvable:$true] %s677_s15 }
  0x3d   : > { %5102 = dma.hbm_to_vmem [thread:$0]  (!%p5979_p6), %s644_s17, 1024, %s646_s23, [#allocation20], %s5816_s20, %s5816_s20, %s5817_s29  }
  0x3e   : > { %s574_s3 = sshll.u32 %s6510_s22, 4  ;;  %s5819_s17 = smov [#allocation12]   ;;  %s575_s3 = int_to_ptr.hbm [resolvable:$true] %s574_s3 }
  0x3f   : > { %5108 = dma.hbm_to_vmem [thread:$0]  (!%p5979_p6), %s678_s15, 1024, %s680_s21, [#allocation23], %s5816_s20, %s5816_s20, %s5817_s29  }
  0x40   : > { %s600_s19 = sshll.u32 %s6511_s6, 4  ;;  %s576_s23 = sshll.u32 %s5819_s17, 4  ;;  %s601_s19 = int_to_ptr.hbm [resolvable:$true] %s600_s19  ;;  %s577_s23 = int_to_ptr.vmem [resolvable:$true] %s576_s23 }
  0x41   : > { %5087 = dma.hbm_to_vmem [thread:$0]  (!%p5979_p6), %s575_s3, 1024, %s577_s23, [#allocation11], %s5816_s20, %s5816_s20, %s5817_s29  }
  0x42   : > { %s626_s15 = sshll.u32 %s6512_s8, 4  ;;  %s660_s13 = sshll.u32 %s6513_s12, 4  ;;  %s627_s15 = int_to_ptr.hbm [resolvable:$true] %s626_s15  ;;  %s661_s13 = int_to_ptr.hbm [resolvable:$true] %s660_s13 }
  0x43   : > { %5093 = dma.hbm_to_vmem [thread:$0]  (!%p5979_p6), %s601_s19, 1024, %s603_s5, [#allocation14], %s5816_s20, %s5816_s20, %s5817_s29  }
  0x44   : > { %s5821_s17 = smov [#allocation18]   ;;  %s6514_s23 = smov 8  }
  0x45   : > { %s628_s3 = sshll.u32 %s5821_s17, 4  ;;  %s6515_s24 = smov 128   ;;  %s629_s3 = int_to_ptr.vmem [resolvable:$true] %s628_s3 }
  0x46   : > { %5099 = dma.hbm_to_vmem [thread:$0]  (!%p5979_p6), %s627_s15, 12288, %s629_s3, [#allocation17], %s6515_s24, %s6515_s24, %s6514_s23  }
  0x47   : > { %s5822_s0 = smov [#allocation21]   ;;  %s6516_s16 = sld [smem:[#allocation57_spill]] }
  0x48   : > { %s662_s22 = sshll.u32 %s5822_s0, 4  ;;  %s6517_s18 = sld [smem:[#allocation59_spill]]  ;;  %s663_s22 = int_to_ptr.vmem [resolvable:$true] %s662_s22 }
  0x49   : > { %5105 = dma.hbm_to_vmem [thread:$0]  (!%p5979_p6), %s661_s13, 1024, %s663_s22, [#allocation20], %s5816_s20, %s5816_s20, %s5817_s29  }
  0x4a   : > { %s5823_s17 = smov [#allocation24]   ;;  %s5824_s13 = smov [#allocation25]  }
  0x4b   : > { %s696_s6 = sshll.u32 %s5823_s17, 4  ;;  %s713_s3 = sshll.u32 %s5824_s13, 4  ;;  %s697_s6 = int_to_ptr.vmem [resolvable:$true] %s696_s6  ;;  %s714_s3 = int_to_ptr.vmem [resolvable:$true] %s713_s3 }
  0x4c   : > { %s3690_s0 = sadd.s32 4294967294, %s5807_s27   ;;  %s6066_s22 = sadd.s32 1, %s5807_s27  }
  0x4d   : > { %s694_s5 = sshll.u32 %s6516_s16, 4  ;;  %s54_s19 = ssub.s32 %s5807_s27, %s6066_s22  ;;  %s695_s5 = int_to_ptr.hbm [resolvable:$true] %s694_s5 }
  0x4e   : > { %s711_s1 = sshll.u32 %s6517_s18, 4  ;;  %s57_s21 = sadd.s32 1, %s5803_s26  ;;  %s712_s1 = int_to_ptr.hbm [resolvable:$true] %s711_s1 }
  0x4f   : > { %5111 = dma.hbm_to_vmem [thread:$0]  (!%p5979_p6), %s695_s5, 1024, %s697_s6, [#allocation23], %s5816_s20, %s5816_s20, %s5817_s29  }
  0x50   : > { %5114 = dma.hbm_to_vmem [thread:$0]  (!%p5979_p6), %s712_s1, 12288, %s714_s3, [#allocation26], %s6515_s24, %s6515_s24, %s6514_s23  }
  0x51   : > { %p55_p7 = scmp.eq.s32.totalorder %s54_s19, 0  ;;  %p64_p8 = scmp.ne.s32.totalorder %s5803_s26, %s5799_s25 }
  0x52   : > { %p65_p9 = scmp.eq.s32.totalorder %s5807_s27, 0  ;;  %p70_p10 = scmp.ne.s32.totalorder %s5799_s25, %s5795_s2 }
  0x53   : > { %s6077_s20 = scalar_select %p55_p7, %s5803_s26, %s57_s21  }
  0x54   : > { %p6079_p11 = por %p65_p9, %p64_p8  ;;  %p6085_p12 = por %p71_p1, %p70_p10 }
  0x55   : > { %6518 = sst [smem:[#allocation42_spill]] %s6077_s20  ;;  %p498_p13 = scmp.eq.s32.totalorder %s5962_s4, 1 }
  0x56   : > { %p504_p0 = scmp.eq.s32.totalorder %s3690_s0, 1  ;;  %p5141_p2 = scmp.lt.s32.totalorder %s5807_s27, 2 }
  0x57   : > { %s6092_s5 = sand.u32 1, %s5803_s26   ;;  %p6094_p4 = por %p498_p13, %p64_p8 }
  0x58   : > { %p6098_p6 = por %p504_p0, %p70_p10  ;;  %s3705_s17 = sshll.u32 %s6092_s5, 4 }
  0x59   : > { %s4765_s6 = sshll.u32 %s5807_s27, 4  ;;  %s6523_s19 = sld [smem:[#allocation43_spill]] }
  0x5a   : > { %s734_s21 = scalar_lea.vmem [#allocation4], %s3705_s17  ;;  %p6109_p7 = pnand %p5141_p2, %p6079_p11 }
  0x5b   : > { %s742_s7 = sshll.u32 %s734_s21, 4  ;;  %s752_s12 = sand.u32 1, %s5807_s27   ;;  %s743_s7 = int_to_ptr.vmem [resolvable:$true] %s742_s7 }
  0x5c   : > { %s3708_s14 = sshll.u32 %s6092_s5, 3  ;;  %s731_s16 = scalar_lea.sflag [#allocation5], %s6092_s5 }
  0x5d   : > { %p5621_p9 = pneg %p6109_p7 }
  0x5f   : > { %s739_s0 = scalar_lea.hbm %s6523_s19, %s4765_s6  ;;  %s5624_s6 = scalar_lea.hbm %s6523_s19, 32 }
  0x60   : > { %s740_s8 = sshll.u32 %s739_s0, 4  ;;  %s741_s8 = int_to_ptr.hbm [resolvable:$true] %s740_s8 }
  0x61   : > { %s5617_s18 = sshra.s32 %s741_s8, 4  ;;  %s5618_s18 = int_to_ptr.hbm [resolvable:$true] %s5617_s18 }
  0x62   : > { %s5619_s20 = scalar_lea.hbm %s5618_s18, 16  ;;  %p5625_p11 = scmp.lt.s32.totalorder %s5618_s18, %s6523_s19 }
  0x63   : > { %p5620_p8 = scmp.ne.s32.totalorder %s5618_s18, %s5619_s20  ;;  %p5626_p0 = scmp.lt.s32.totalorder %s5624_s6, %s5619_s20 }
  0x65   : > { %p5622_p10 = pnand %p5621_p9, %p5620_p8  ;;  %p5627_p2 = por %p5626_p0, %p5625_p11 }
  0x67   : > { %p5623_p13 = pneg %p5622_p10 }
  0x69   : > { %p5628_p5 = pnand %p5627_p2, %p5623_p13 }
  0x6b   : > { %5631 = shalt.err (!%p5628_p5)
}
  0x6c   : > { %5118 = dma.hbm_to_vmem [thread:$0]  (!%p6109_p7), %s741_s8, 256, %s743_s7, %s731_s16, %s6515_s24, %s6515_s24, %s6514_s23  }
  0x6d   : > { %s3709_s5 = sshll.u32 %s5807_s27, 3  ;;  %s6525_s28 = sld [smem:[#allocation44_spill]] }
  0x6e   : > { %s756_s26 = scalar_lea.vmem [#allocation7], %s3708_s14  ;;  %s753_s20 = scalar_lea.sflag [#allocation8], %s752_s12 }
  0x6f   : > { %s764_s13 = sshll.u32 %s756_s26, 4  ;;  %s765_s13 = int_to_ptr.vmem [resolvable:$true] %s764_s13 }
  0x73   : > { %s760_s17 = scalar_lea.hbm %s6525_s28, %s3709_s5  ;;  %s5654_s16 = scalar_lea.hbm %s6525_s28, 16 }
  0x74   : > { %s762_s18 = sshll.u32 %s760_s17, 4  ;;  %s763_s18 = int_to_ptr.hbm [resolvable:$true] %s762_s18 }
  0x75   : > { %s5647_s6 = sshra.s32 %s763_s18, 4  ;;  %s5648_s6 = int_to_ptr.hbm [resolvable:$true] %s5647_s6 }
  0x76   : > { %s5649_s3 = scalar_lea.hbm %s5648_s6, 8  ;;  %p5655_p13 = scmp.lt.s32.totalorder %s5648_s6, %s6525_s28 }
  0x77   : > { %p5650_p5 = scmp.ne.s32.totalorder %s5648_s6, %s5649_s3  ;;  %p5656_p11 = scmp.lt.s32.totalorder %s5654_s16, %s5649_s3 }
  0x79   : > { %p5652_p8 = pnand %p5650_p5, %p5621_p9  ;;  %p5657_p0 = por %p5656_p11, %p5655_p13 }
  0x7b   : > { %p5653_p10 = pneg %p5652_p8 }
  0x7d   : > { %p5658_p2 = pnand %p5657_p0, %p5653_p10 }
  0x7f   : > { %5661 = shalt.err (!%p5658_p2)
}
  0x80   : > { %5121 = dma.hbm_to_vmem [thread:$0]  (!%p6109_p7), %s763_s18, 128, %s765_s13, %s753_s20  }
  0x81   : > { %773 = sbr.rel (%p5967_p3) target bundleno = 2805 (0xaf5), region = 100  ;;  %s6150_s12 = sand.u32 (!%p5967_p3), 1, %s5799_s25  }
  0x82   : > { %s3711_s14 = sshll.u32 (!%p5967_p3), %s6150_s12, 4  ;;  %s776_s26 = scalar_lea.sflag (!%p5967_p3), [#allocation5], %s6150_s12 }
  0x83   : > { %s6154_s5 = scalar_lea.vmem (!%p5967_p3), [#allocation4], %s3711_s14 }
  0x86   : > { %5750 = dma.done.wait (%p6085_p12), %s776_s26, 256  }
  0x87   : > { %5752 = vsyncadd (%p6085_p12), %s776_s26, 4294967040  ;;  %s785_s10 = sand.u32 1, %s5962_s4   ;;  %s6162_s30 = sshll.u32 %s6150_s12, 3 }
  0x88   : > { %s786_s0 = scalar_lea.sflag [#allocation8], %s785_s10  ;;  %s789_s21 = scalar_lea.vmem [#allocation7], %s6162_s30 }
  0x89   : > { %5754 = dma.done.wait (%p6085_p12), %s786_s0, 128  }
  0x8a   : > { %5756 = vsyncadd (%p6085_p12), %s786_s0, 4294967168 }
  0x8b   : > { %5758 = dma.done.wait (%p71_p1), [#allocation8], 256  }
  0x8c   : > { %5760 = vsyncadd (%p71_p1), [#allocation8], 4294967040 }
  0x8d   : > { %5762 = dma.done.wait (%p71_p1), [#allocation11], 1152  }
  0x8e   : > { %5764 = vsyncadd (%p71_p1), [#allocation11], 4294966144 }
  0x8f   : > { %5766 = dma.done.wait (%p71_p1), [#allocation14], 1040  }
  0x90   : > { %5768 = vsyncadd (%p71_p1), [#allocation14], 4294966256 }
  0x91   : > { %5770 = dma.done.wait (%p71_p1), [#allocation17], 12304  }
  0x92   : > { %5772 = vsyncadd (%p71_p1), [#allocation17], 4294954992 }
  0x93   : > { %5774 = dma.done.wait (%p71_p1), [#allocation20], 2048  }
  0x94   : > { %5776 = vsyncadd (%p71_p1), [#allocation20], 4294965248 }
  0x95   : > { %5778 = dma.done.wait (%p71_p1), [#allocation23], 2048  }
  0x96   : > { %5780 = vsyncadd (%p71_p1), [#allocation23], 4294965248 }
  0x97   : > { %5782 = dma.done.wait (%p71_p1), [#allocation26], 12288  }
  0x98   : > { %5784 = vsyncadd (%p71_p1), [#allocation26], 4294955008  ;;  %v4773_v0 = vld [vmem:[#allocation12 + $0x38] sm:$0xff]  ;;  %v4772_v1 = vld [vmem:[#allocation12 + $0x30] sm:$0xff]  ;;  %vm5826_vm1 = vmmov 1   ;;  %s6530_s8 = sld [smem:[#allocation60_spill]] }
  0x99   : > { %997 = vmatpush.bf16.msra.mxu0 %v4773_v0  ;;  %v3817_v2 = vld [vmem:[#allocation18 + $0x70] sm:$0xf]  ;;  %v4789_v3 = vld [vmem:[#allocation18 + $0x74] sm:$0xf0]  ;;  %v3809_v7 = vld [vmem:[#allocation18 + $0x60] sm:$0xf] }
  0x9a   : > { %v3881_v4 = vld [vmem:[#allocation18 + $0xf0] sm:$0xf]  ;;  %v3818_v5 = vor.u32 %v4789_v3, %v3817_v2  ;;  %v4805_v6 = vld [vmem:[#allocation18 + $0xf4] sm:$0xf0]  ;;  %v4787_v8 = vld [vmem:[#allocation18 + $0x64] sm:$0xf0] }
  0x9b   : > { %v4771_v9 = vld [vmem:[#allocation12 + $0x28] sm:$0xff]  ;;  %v3882_v10 = vor.u32 %v4805_v6, %v3881_v4  ;;  %v3873_v11 = vld [vmem:[#allocation18 + $0xe0] sm:$0xf]  ;;  %v3810_v13 = vor.u32 %v4787_v8, %v3809_v7  ;;  %v3801_v15 = vld [vmem:[#allocation18 + $0x50] sm:$0xf]  ;;  %s6531_s24 = sld [smem:[#allocation56_spill]] }
  0x9c   : > { %v4803_v12 = vld [vmem:[#allocation18 + $0xe4] sm:$0xf0]  ;;  %1325 = vmatpush.bf16.msra.mxu1 %v3818_v5  ;;  %v4785_v16 = vld [vmem:[#allocation18 + $0x54] sm:$0xf0]  ;;  %v3865_v17 = vld [vmem:[#allocation18 + $0xd0] sm:$0xf] }
  0x9d   : > { %998 = vmatpush.bf16.msra.mxu0 %v4772_v1  ;;  %1339 = vmatpush.bf16.msra.mxu2 %v3882_v10  ;;  %v3874_v14 = vor.u32 %v4803_v12, %v3873_v11  ;;  %v4801_v18 = vld [vmem:[#allocation18 + $0xd4] sm:$0xf0]  ;;  %v3945_v19 = vld [vmem:[#allocation18 + $0x170] sm:$0xf]  ;;  %v4770_v21 = vld [vmem:[#allocation12 + $0x20] sm:$0xff]  ;;  %v3802_v23 = vor.u32 %v4785_v16, %v3801_v15  ;;  %s918_s17 = scalar_lea.vmem [#allocation28], %s6162_s30 }
  0x9e   : > { %v4821_v20 = vld [vmem:[#allocation18 + $0x174] sm:$0xf0]  ;;  %v3793_v24 = vld [vmem:[#allocation18 + $0x40] sm:$0xf]  ;;  %v3866_v25 = vor.u32 %v4801_v18, %v3865_v17  ;;  %v4783_v26 = vld [vmem:[#allocation18 + $0x44] sm:$0xf0] }
  0x9f   : > { %v3946_v22 = vor.u32 %v4821_v20, %v3945_v19  ;;  %v3937_v27 = vld [vmem:[#allocation18 + $0x160] sm:$0xf]  ;;  %v4819_v28 = vld [vmem:[#allocation18 + $0x164] sm:$0xf0]  ;;  %v4769_v32 = vld [vmem:[#allocation12 + $0x18] sm:$0xff]  ;;  %v3794_v35 = vor.u32 %v4783_v26, %v3793_v24  ;;  %s4761_s20 = sshll.u32 %s5962_s4, 3 }
  0xa0   : > { %1326 = vmatpush.bf16.msra.mxu1 %v3810_v13  ;;  %v3857_v29 = vld [vmem:[#allocation18 + $0xc0] sm:$0xf]  ;;  %v4799_v30 = vld [vmem:[#allocation18 + $0xc4] sm:$0xf0]  ;;  %v3938_v31 = vor.u32 %v4819_v28, %v3937_v27  ;;  %v3785_v33 = vld [vmem:[#allocation18 + $0x30] sm:$0xf] }
  0xa1   : > { %999 = vmatpush.bf16.msra.mxu0 %v4771_v9  ;;  %1340 = vmatpush.bf16.msra.mxu2 %v3874_v14  ;;  %v3929_v34 = vld [vmem:[#allocation18 + $0x150] sm:$0xf]  ;;  %v4781_v36 = vld [vmem:[#allocation18 + $0x34] sm:$0xf0]  ;;  %v3858_v42 = vor.u32 %v4799_v30, %v3857_v29  ;;  %v3777_v47 = vld [vmem:[#allocation18 + $0x20] sm:$0xf] }
  0xa2   : > { %1353 = vmatpush.bf16.msra.mxu3 %v3946_v22  ;;  %v3849_v37 = vld [vmem:[#allocation18 + $0xb0] sm:$0xf]  ;;  %v4817_v38 = vld [vmem:[#allocation18 + $0x154] sm:$0xf0]  ;;  %v3786_v45 = vor.u32 %v4781_v36, %v3785_v33  ;;  %v4779_v48 = vld [vmem:[#allocation18 + $0x24] sm:$0xf0] }
  0xa3   : > { %v4768_v39 = vld [vmem:[#allocation12 + $0x10] sm:$0xff]  ;;  %v919_v40 = vld [vmem:[%s6154_s5] sm:$0xff]  ;;  %v3930_v44 = vor.u32 %v4817_v38, %v3929_v34  ;;  %v3841_v51 = vld [vmem:[#allocation18 + $0xa0] sm:$0xf]  ;;  %v3778_v56 = vor.u32 %v4779_v48, %v3777_v47  ;;  %s6533_s7 = sld [smem:[#allocation62_spill]]  ;;  %s3447_s23 = sshll.u32 %s918_s17, 4  ;;  %s3448_s23 = int_to_ptr.vmem [resolvable:$true] %s3447_s23 }
  0xa4   : > { %1327 = vmatpush.bf16.msra.mxu1 %v3802_v23  ;;  %v920_v41 = vld [vmem:[%s6154_s5 + $0x8] sm:$0xff]  ;;  %v4797_v43 = vld [vmem:[#allocation18 + $0xb4] sm:$0xf0]  ;;  %v922_v49 = vadd.f32 %v919_v40, %v919_v40  ;;  %v4795_v52 = vld [vmem:[#allocation18 + $0xa4] sm:$0xf0]  ;;  %s6532_s5 = sld [smem:[#allocation58_spill]] }
  0xa5   : > { %1000 = vmatpush.bf16.msra.mxu0 %v4770_v21  ;;  %1341 = vmatpush.bf16.msra.mxu2 %v3866_v25  ;;  %v3850_v46 = vor.u32 %v4797_v43, %v3849_v37  ;;  %v923_v50 = vadd.f32 %v920_v41, %v920_v41  ;;  %v4767_v53 = vld [vmem:[#allocation12 + $0x8] sm:$0xff]  ;;  %v925_v55 = vld [vmem:[#allocation9 + $0x8] sm:$0xff]  ;;  %v4788_v57 = vld [vmem:[#allocation18 + $0x74] sm:$0xf]  ;;  %v3842_v59 = vor.u32 %v4795_v52, %v3841_v51  ;;  %s3421_s26 = scalar_lea.sflag [#allocation29], %s6150_s12 }
  0xa6   : > { %1354 = vmatpush.bf16.msra.mxu3 %v3938_v31  ;;  %v924_v54 = vld [vmem:[#allocation9] sm:$0xff]  ;;  %v3819_v58 = vld [vmem:[#allocation18 + $0x78] sm:$0xf0]  ;;  %v3811_v1 = vld [vmem:[#allocation18 + $0x68] sm:$0xf0] }
  0xa7   : > { %v6199_v60 = vadd.f32 %v924_v54, %v922_v49  ;;  %v6201_v61 = vadd.f32 %v925_v55, %v923_v50  ;;  %v4766_v62 = vld [vmem:[#allocation12] sm:$0xff]  ;;  %v3822_v63 = vor.u32 %v4788_v57, %v3819_v58  ;;  %v4786_v0 = vld [vmem:[#allocation18 + $0x64] sm:$0xf]  ;;  %v4784_v4 = vld [vmem:[#allocation18 + $0x54] sm:$0xf] }
  0xa8   : > { %1328 = vmatpush.bf16.msra.mxu1 %v3794_v35  ;;  %v3814_v3 = vor.u32 %v4786_v0, %v3811_v1  ;;  %v3803_v5 = vld [vmem:[#allocation18 + $0x58] sm:$0xf0]  ;;  %v3833_v7 = vld [vmem:[#allocation18 + $0x90] sm:$0xf]  ;;  %v4793_v8 = vld [vmem:[#allocation18 + $0x94] sm:$0xf0] }
  0xa9   : > { %1001 = vmatpush.bf16.msra.mxu0 %v4769_v32  ;;  %1342 = vmatpush.bf16.msra.mxu2 %v3858_v42  ;;  %v928_v2 = vpack.c.bf16 %v6201_v61, %v6199_v60  ;;  %v3806_v6 = vor.u32 %v4784_v4, %v3803_v5  ;;  %v3834_v9 = vor.u32 %v4793_v8, %v3833_v7  ;;  %v3825_v10 = vld [vmem:[#allocation18 + $0x80] sm:$0xf]  ;;  %v4791_v11 = vld [vmem:[#allocation18 + $0x84] sm:$0xf0]  ;;  %v4820_v13 = vld [vmem:[#allocation18 + $0x174] sm:$0xf]  ;;  %s3445_s16 = scalar_lea.hbm %s6533_s7, %s4761_s20 }
  0xaa   : > { %1355 = vmatpush.bf16.msra.mxu3 %v3930_v44  ;;  %v3826_v12 = vor.u32 %v4791_v11, %v3825_v10  ;;  %v3947_v14 = vld [vmem:[#allocation18 + $0x178] sm:$0xf0]  ;;  %v3769_v16 = vld [vmem:[#allocation18 + $0x10] sm:$0xf]  ;;  %v4777_v17 = vld [vmem:[#allocation18 + $0x14] sm:$0xf0] }
  0xab   : > { %v3950_v15 = vor.u32 %v4820_v13, %v3947_v14  ;;  %v3770_v18 = vor.u32 %v4777_v17, %v3769_v16  ;;  %v3921_v19 = vld [vmem:[#allocation18 + $0x140] sm:$0xf]  ;;  %v4815_v20 = vld [vmem:[#allocation18 + $0x144] sm:$0xf0]  ;;  %v4782_v21 = vld [vmem:[#allocation18 + $0x44] sm:$0xf] }
  0xac   : > { %1329 = vmatpush.bf16.msra.mxu1 %v3786_v45  ;;  %v3922_v22 = vor.u32 %v4815_v20, %v3921_v19  ;;  %v3795_v23 = vld [vmem:[#allocation18 + $0x48] sm:$0xf0]  ;;  %v4818_v24 = vld [vmem:[#allocation18 + $0x164] sm:$0xf]  ;;  %v3761_v28 = vld [vmem:[#allocation18] sm:$0xf] }
  0xad   : > { %1002 = vmatpush.bf16.msra.mxu0 %v4768_v39  ;;  %1343 = vmatpush.bf16.msra.mxu2 %v3850_v46  ;;  %v3939_v25 = vld [vmem:[#allocation18 + $0x168] sm:$0xf0]  ;;  %v3798_v26 = vor.u32 %v4782_v21, %v3795_v23  ;;  %v4775_v29 = vld [vmem:[#allocation18 + $0x4] sm:$0xf0]  ;;  %v3913_v30 = vld [vmem:[#allocation18 + $0x130] sm:$0xf] }
  0xae   : > { %v3942_v27 = vor.u32 %v4818_v24, %v3939_v25  ;;  %1356 = vmatpush.bf16.msra.mxu3 %v3922_v22  ;;  %v3762_v31 = vor.u32 %v4775_v29, %v3761_v28  ;;  %v4813_v32 = vld [vmem:[#allocation18 + $0x134] sm:$0xf0]  ;;  %v4780_v33 = vld [vmem:[#allocation18 + $0x34] sm:$0xf]  ;;  %v3787_v34 = vld [vmem:[#allocation18 + $0x38] sm:$0xf0] }
  0xaf   : > { %v3914_v35 = vor.u32 %v4813_v32, %v3913_v30  ;;  %v3790_v36 = vor.u32 %v4780_v33, %v3787_v34  ;;  %v4804_v37 = vld [vmem:[#allocation18 + $0xf4] sm:$0xf]  ;;  %v3883_v38 = vld [vmem:[#allocation18 + $0xf8] sm:$0xf0]  ;;  %v5825_v42 = vmov 0.0   ;;  %v1013_v32 = vlaneseq  ;;  %s3449_s14 = sshll.u32 %s3445_s16, 4  ;;  %s3450_s14 = int_to_ptr.hbm [resolvable:$true] %s3449_s14 }
  0xb0   : > { %1330 = vmatpush.bf16.msra.mxu1 %v3778_v56  ;;  %v4816_v39 = vld [vmem:[#allocation18 + $0x154] sm:$0xf]  ;;  %v3886_v40 = vor.u32 %v4804_v37, %v3883_v38  ;;  %v3931_v41 = vld [vmem:[#allocation18 + $0x158] sm:$0xf0]  ;;  %1011 = vst [vmem:[#allocation2] sm:$0xff] %v5825_v42  ;;  %s5691_s10 = sshra.s32 %s3450_s14, 4  ;;  %s5692_s10 = int_to_ptr.hbm [resolvable:$true] %s5691_s10 }
  0xb1   : > { %1003 = vmatpush.bf16.msra.mxu0 %v4767_v53  ;;  %1344 = vmatpush.bf16.msra.mxu2 %v3842_v59  ;;  %v3934_v43 = vor.u32 %v4816_v39, %v3931_v41  ;;  %2067 = vst [vmem:[#allocation3] sm:$0xff] %v5825_v42  ;;  %v3905_v44 = vld [vmem:[#allocation18 + $0x120] sm:$0xf]  ;;  %v4811_v45 = vld [vmem:[#allocation18 + $0x124] sm:$0xf0]  ;;  %v1014_v38 = vshrl.u32 %v1013_v32, 7  ;;  %p5698_p7 = scmp.lt.s32.totalorder %s5692_s10, %s6533_s7 }
  0xb2   : > { %1357 = vmatpush.bf16.msra.mxu3 %v3914_v35  ;;  %1012 = vst [vmem:[#allocation2 + $0x18] sm:$0xff] %v5825_v42  ;;  %v3906_v46 = vor.u32 %v4811_v45, %v3905_v44  ;;  %v4778_v47 = vld [vmem:[#allocation18 + $0x24] sm:$0xf]  ;;  %v3779_v48 = vld [vmem:[#allocation18 + $0x28] sm:$0xf0]  ;;  %s5693_s0 = scalar_lea.hbm %s5692_s10, 8 }
  0xb3   : > { %v4802_v49 = vld [vmem:[#allocation18 + $0xe4] sm:$0xf]  ;;  %v3782_v50 = vor.u32 %v4778_v47, %v3779_v48  ;;  %v3875_v51 = vld [vmem:[#allocation18 + $0xe8] sm:$0xf0]  ;;  %v3897_v55 = vld [vmem:[#allocation18 + $0x110] sm:$0xf]  ;;  %p5694_p1 = scmp.ne.s32.totalorder %s5692_s10, %s5693_s0 }
  0xb4   : > { %1331 = vmatpush.bf16.msra.mxu1 %v3770_v18  ;;  %v4814_v52 = vld [vmem:[#allocation18 + $0x144] sm:$0xf]  ;;  %v3878_v53 = vor.u32 %v4802_v49, %v3875_v51  ;;  %v3923_v54 = vld [vmem:[#allocation18 + $0x148] sm:$0xf0]  ;;  %v4809_v56 = vld [vmem:[#allocation18 + $0x114] sm:$0xf0] }
  0xb5   : > { %1004 = vmatpush.bf16.msra.mxu0 %v4766_v62  ;;  %1345 = vmatpush.bf16.msra.mxu2 %v3834_v9  ;;  %v4776_v57 = vld [vmem:[#allocation18 + $0x14] sm:$0xf]  ;;  %v3926_v58 = vor.u32 %v4814_v52, %v3923_v54  ;;  %v3898_v59 = vor.u32 %v4809_v56, %v3897_v55  ;;  %v3771_v62 = vld [vmem:[#allocation18 + $0x18] sm:$0xf0]  ;;  %v4807_v4 = vld [vmem:[#allocation18 + $0x104] sm:$0xf0]  ;;  %p5695_p3 = pnand %p5694_p1, %p6094_p4 }
  0xb6   : > { %1358 = vmatpush.bf16.msra.mxu3 %v3906_v46  ;;  %v3867_v0 = vld [vmem:[#allocation18 + $0xd8] sm:$0xf0]  ;;  %v3774_v1 = vor.u32 %v4776_v57, %v3771_v62  ;;  %v4774_v5 = vld [vmem:[#allocation18 + $0x4] sm:$0xf]  ;;  %v3763_v7 = vld [vmem:[#allocation18 + $0x8] sm:$0xf0] }
  0xb7   : > { %v4798_v8 = vld [vmem:[#allocation18 + $0xc4] sm:$0xf]  ;;  %v3859_v9 = vld [vmem:[#allocation18 + $0xc8] sm:$0xf0]  ;;  %v3766_v10 = vor.u32 %v4774_v5, %v3763_v7  ;;  %v4812_v11 = vld [vmem:[#allocation18 + $0x134] sm:$0xf]  ;;  %p5696_p12 = pneg %p5695_p3 }
  0xb8   : > { %1005 = vmatmul.bf16.vlgmr.msra.gmra.mxu0 %v928_v2  ;;  %1332 = vmatpush.bf16.msra.mxu1 %v3762_v31  ;;  %v3862_v13 = vor.u32 %v4798_v8, %v3859_v9  ;;  %v3907_v16 = vld [vmem:[#allocation18 + $0x128] sm:$0xf0]  ;;  %v4796_v18 = vld [vmem:[#allocation18 + $0xb4] sm:$0xf]  ;;  %v3851_v19 = vld [vmem:[#allocation18 + $0xb8] sm:$0xf0] }
  0xb9   : > { %1367 = vmatpush.bf16.msrb.mxu0 %v3822_v63  ;;  %1346 = vmatpush.bf16.msra.mxu2 %v3826_v12  ;;  %v4800_v63 = vld [vmem:[#allocation18 + $0xd4] sm:$0xf]  ;;  %v3915_v12 = vld [vmem:[#allocation18 + $0x138] sm:$0xf0]  ;;  %v3854_v21 = vor.u32 %v4796_v18, %v3851_v19  ;;  %v4794_v23 = vld [vmem:[#allocation18 + $0xa4] sm:$0xf] }
  0xba   : > { %v3870_v2 = vor.u32 %v4800_v63, %v3867_v0  ;;  %1359 = vmatpush.bf16.msra.mxu3 %v3898_v59  ;;  %v3918_v14 = vor.u32 %v4812_v11, %v3915_v12  ;;  %v4808_v20 = vld [vmem:[#allocation18 + $0x114] sm:$0xf]  ;;  %v3899_v22 = vld [vmem:[#allocation18 + $0x118] sm:$0xf0]  ;;  %v3843_v24 = vld [vmem:[#allocation18 + $0xa8] sm:$0xf0] }
  0xbb   : > { %v3902_v25 = vor.u32 %v4808_v20, %v3899_v22  ;;  %v3891_v28 = vld [vmem:[#allocation18 + $0x108] sm:$0xf0]  ;;  %v4792_v29 = vld [vmem:[#allocation18 + $0x94] sm:$0xf]  ;;  %v3835_v30 = vld [vmem:[#allocation18 + $0x98] sm:$0xf0] }
  0xbc   : > { %1381 = vmatpush.bf16.msrb.mxu1 %v3886_v40  ;;  %v5205_v33 = vld [vmem:[#allocation13] ss:$0 sm:$0xff]  ;;  %v3838_v34 = vor.u32 %v4792_v29, %v3835_v30  ;;  %v4790_v35 = vld [vmem:[#allocation18 + $0x84] sm:$0xf]  ;;  %v6209_v41 = vadd.s32 8, %v1014_v38  ;;  %s5697_s4 = scalar_lea.hbm %s6533_s7, 16 }
  0xbd   : > { %1368 = vmatpush.bf16.msrb.mxu0 %v3814_v3  ;;  %1395 = vmatpush.bf16.msrb.mxu2 %v3950_v15  ;;  %v3889_v3 = vld [vmem:[#allocation18 + $0x100] sm:$0xf]  ;;  %v4810_v15 = vld [vmem:[#allocation18 + $0x124] sm:$0xf]  ;;  %v4853_v54 = vld [vmem:[#allocation18 + $0x274] sm:$0xf0]  ;;  %p5699_p9 = scmp.lt.s32.totalorder %s5697_s4, %s5693_s0 }
  0xbe   : > { %v3910_v17 = vor.u32 %v4810_v15, %v3907_v16  ;;  %vm1017_vm0 = vcmp.lt.s32.totalorder %v6209_v41, 10  ;;  %v4068_v56 = vld [vmem:[#allocation18 + $0x260] sm:$0xf]  ;;  %v4851_v57 = vld [vmem:[#allocation18 + $0x264] sm:$0xf0] }
  0xbf   : > { %vm6219_vm2 = vmpackc.low %vm1017_vm0, %vm5826_vm1  ;;  %v4012_v59 = vld [vmem:[#allocation18 + $0x1f0] sm:$0xf]  ;;  %v4837_v62 = vld [vmem:[#allocation18 + $0x1f4] sm:$0xf0]  ;;  %p5700_p5 = por %p5699_p9, %p5698_p7 }
  0xc0   : > { %1382 = vmatpush.bf16.msrb.mxu1 %v3878_v53  ;;  %v4076_v53 = vld [vmem:[#allocation18 + $0x270] sm:$0xf]  ;;  %v4836_v63 = vld [vmem:[#allocation18 + $0x1f4] sm:$0xf]  ;;  %v4013_v0 = vor.u32 %v4837_v62, %v4012_v59  ;;  %v4004_v8 = vld [vmem:[#allocation18 + $0x1e0] sm:$0xf] }
  0xc1   : > { %1369 = vmatpush.bf16.msrb.mxu0 %v3806_v6  ;;  %1396 = vmatpush.bf16.msrb.mxu2 %v3942_v27  ;;  %v3890_v6 = vor.u32 %v4807_v4, %v3889_v3  ;;  %v4806_v27 = vld [vmem:[#allocation18 + $0x104] sm:$0xf]  ;;  %v4077_v55 = vor.u32 %v4853_v54, %v4076_v53  ;;  %v4849_v3 = vld [vmem:[#allocation18 + $0x254] sm:$0xf0]  ;;  %v4835_v9 = vld [vmem:[#allocation18 + $0x1e4] sm:$0xf0]  ;;  %p5701_p8 = pnand %p5700_p5, %p5696_p12 }
  0xc2   : > { %v3894_v31 = vor.u32 %v4806_v27, %v3891_v28  ;;  %v4005_v11 = vor.u32 %v4835_v9, %v4004_v8  ;;  %v4006_v12 = vld [vmem:[#allocation18 + $0x1e8] sm:$0xf0]  ;;  %v4833_v18 = vld [vmem:[#allocation18 + $0x1d4] sm:$0xf0]  ;;  %v4832_v19 = vld [vmem:[#allocation18 + $0x1d4] sm:$0xf] }
  0xc3   : > { %1360 = vmatpush.bf16.msra.mxu3 %v3890_v6  ;;  %v4044_v22 = vld [vmem:[#allocation18 + $0x230] sm:$0xf]  ;;  %v6238_v27 = vld [vmem:[%s6455_s9] sm:$0x3]  ;;  %v3988_v29 = vld [vmem:[#allocation18 + $0x1c0] sm:$0xf] }
  0xc4   : > { %1383 = vmatpush.bf16.msrb.mxu1 %v3870_v2  ;;  %v4060_v2 = vld [vmem:[#allocation18 + $0x250] sm:$0xf]  ;;  %v4831_v30 = vld [vmem:[#allocation18 + $0x1c4] sm:$0xf0]  ;;  %v4132_v53 = vld [vmem:[#allocation18 + $0x2e0] sm:$0xf] }
  0xc5   : > { %1370 = vmatpush.bf16.msrb.mxu0 %v3798_v26  ;;  %1397 = vmatpush.bf16.msrb.mxu2 %v3934_v43  ;;  %v3846_v26 = vor.u32 %v4794_v23, %v3843_v24  ;;  %v4061_v6 = vor.u32 %v4849_v3, %v4060_v2  ;;  %v4845_v23 = vld [vmem:[#allocation18 + $0x234] sm:$0xf0]  ;;  %v4867_v54 = vld [vmem:[#allocation18 + $0x2e4] sm:$0xf0]  ;;  %v4826_v3 = vld [vmem:[#allocation18 + $0x1a4] sm:$0xf] }
  0xc6   : > { %v4827_v2 = vld [vmem:[#allocation18 + $0x1a4] sm:$0xf0]  ;;  %v3974_v8 = vld [vmem:[#allocation18 + $0x1a8] sm:$0xf0]  ;;  %v4124_v9 = vld [vmem:[#allocation18 + $0x2d0] sm:$0xf] }
  0xc7   : > { %1762 = vmatpush.bf16.msrb.mxu3 %v4013_v0  ;;  %v4898_v45 = vld [vmem:[#allocation25 + $0x64] sm:$0xf] }
  0xc8   : > { %1384 = vmatpush.bf16.msrb.mxu1 %v3862_v13  ;;  %v4052_v13 = vld [vmem:[#allocation18 + $0x240] sm:$0xf] }
  0xc9   : > { %1371 = vmatpush.bf16.msrb.mxu0 %v3790_v36  ;;  %1398 = vmatpush.bf16.msrb.mxu2 %v3926_v58  ;;  %v3827_v36 = vld [vmem:[#allocation18 + $0x88] sm:$0xf0]  ;;  %v4069_v58 = vor.u32 %v4851_v57, %v4068_v56  ;;  %v4133_v56 = vor.u32 %v4867_v54, %v4132_v53  ;;  %v4028_v57 = vld [vmem:[#allocation18 + $0x210] sm:$0xf] }
  0xca   : > { %v3830_v40 = vor.u32 %v4790_v35, %v3827_v36  ;;  %v4140_v35 = vld [vmem:[#allocation18 + $0x2f0] sm:$0xf]  ;;  %v4869_v36 = vld [vmem:[#allocation18 + $0x2f4] sm:$0xf0] }
  0xcb   : > { %1763 = vmatpush.bf16.msrb.mxu3 %v4005_v11  ;;  %v3977_v11 = vor.u32 %v4826_v3, %v3974_v8  ;;  %v4100_v3 = vld [vmem:[#allocation18 + $0x2a0] sm:$0xf] }
  0xcc   : > { %1385 = vmatpush.bf16.msrb.mxu1 %v3854_v21  ;;  %v3998_v21 = vld [vmem:[#allocation18 + $0x1d8] sm:$0xf0] }
  0xcd   : > { %1372 = vmatpush.bf16.msrb.mxu0 %v3782_v50  ;;  %1399 = vmatpush.bf16.msrb.mxu2 %v3918_v14  ;;  %v4847_v14 = vld [vmem:[#allocation18 + $0x244] sm:$0xf0] }
  0xce   : > { %v4053_v16 = vor.u32 %v4847_v14, %v4052_v13  ;;  %v4020_v13 = vld [vmem:[#allocation18 + $0x200] sm:$0xf]  ;;  %v4839_v14 = vld [vmem:[#allocation18 + $0x204] sm:$0xf0] }
  0xd0   : > { %1386 = vmatpush.bf16.msrb.mxu1 %v3846_v26  ;;  %v4045_v26 = vor.u32 %v4845_v23, %v4044_v22  ;;  %v4824_v22 = vld [vmem:[#allocation18 + $0x194] sm:$0xf] }
  0xd1   : > { %1373 = vmatpush.bf16.msrb.mxu0 %v3774_v1  ;;  %1400 = vmatpush.bf16.msrb.mxu2 %v3910_v17  ;;  %v4014_v1 = vld [vmem:[#allocation18 + $0x1f8] sm:$0xf0]  ;;  %v3996_v17 = vld [vmem:[#allocation18 + $0x1d0] sm:$0xf] }
  0xd2   : > { %v4017_v5 = vor.u32 %v4836_v63, %v4014_v1  ;;  %v3997_v20 = vor.u32 %v4833_v18, %v3996_v17  ;;  %v3972_v1 = vld [vmem:[#allocation18 + $0x1a0] sm:$0xf]  ;;  %v4021_v17 = vor.u32 %v4839_v14, %v4020_v13  ;;  %v4142_v18 = vld [vmem:[#allocation18 + $0x2f8] sm:$0xf0]  ;;  %v4862_v13 = vld [vmem:[#allocation18 + $0x2c4] sm:$0xf] }
  0xd3   : > { %v4118_v14 = vld [vmem:[#allocation18 + $0x2c8] sm:$0xf0] }
  0xd4   : > { %1387 = vmatpush.bf16.msrb.mxu1 %v3838_v34  ;;  %1764 = vmatpush.bf16.msrb.mxu3 %v3997_v20  ;;  %v3990_v34 = vld [vmem:[#allocation18 + $0x1c8] sm:$0xf0]  ;;  %v3964_v20 = vld [vmem:[#allocation18 + $0x190] sm:$0xf] }
  0xd5   : > { %1374 = vmatpush.bf16.msrb.mxu0 %v3766_v10  ;;  %1401 = vmatpush.bf16.msrb.mxu2 %v3902_v25  ;;  %v4834_v10 = vld [vmem:[#allocation18 + $0x1e4] sm:$0xf]  ;;  %v4001_v25 = vor.u32 %v4832_v19, %v3998_v21  ;;  %v4825_v21 = vld [vmem:[#allocation18 + $0x194] sm:$0xf0] }
  0xd6   : > { %v4009_v15 = vor.u32 %v4834_v10, %v4006_v12  ;;  %v4865_v10 = vld [vmem:[#allocation18 + $0x2d4] sm:$0xf0] }
  0xd7   : > { %v4125_v12 = vor.u32 %v4865_v10, %v4124_v9  ;;  %v4850_v9 = vld [vmem:[#allocation18 + $0x264] sm:$0xf]  ;;  %v4070_v10 = vld [vmem:[#allocation18 + $0x268] sm:$0xf0] }
  0xd8   : > { %1388 = vmatpush.bf16.msrb.mxu1 %v3830_v40  ;;  %v4141_v40 = vor.u32 %v4869_v36, %v4140_v35  ;;  %v4134_v35 = vld [vmem:[#allocation18 + $0x2e8] sm:$0xf0] }
  0xd9   : > { %1402 = vmatpush.bf16.msrb.mxu2 %v3894_v31  ;;  %1776 = vmatpush.bf16.msra.mxu0 %v4077_v55  ;;  %v4830_v31 = vld [vmem:[#allocation18 + $0x1c4] sm:$0xf] }
  0xda   : > { %v3993_v38 = vor.u32 %v4830_v31, %v3990_v34  ;;  %v4866_v34 = vld [vmem:[#allocation18 + $0x2e4] sm:$0xf] }
  0xdd   : > { %1777 = vmatpush.bf16.msra.mxu0 %v4069_v58  ;;  %v4841_v58 = vld [vmem:[#allocation18 + $0x214] sm:$0xf0] }
  0xde   : > { %v4029_v62 = vor.u32 %v4841_v58, %v4028_v57  ;;  %v4885_v57 = vld [vmem:[#allocation19 + $0x38] sm:$0xff] }
  0xe1   : > { %1778 = vmatpush.bf16.msra.mxu0 %v4061_v6  ;;  %v3973_v6 = vor.u32 %v4827_v2, %v3972_v1 }
  0xe5   : > { %1779 = vmatpush.bf16.msra.mxu0 %v4053_v16 }
  0xe9   : > { %1780 = vmatpush.bf16.msra.mxu0 %v4045_v26  ;;  %v3965_v26 = vor.u32 %v4825_v21, %v3964_v20 }
 0x135   : > { %v1006_v37 = vpop.f32.mrf.mxu0 }
 0x136   : > { %v6206_v39 = vadd.f32 %v5205_v33, %v1006_v37 }
 0x138   : > { %1020 = vst [vmem:[#allocation2 + $0x8] sm:$0xff] %v6206_v39 }
 0x13d   : > { %v1008_v42 = vpop.f32.mrf.mxu0 }
 0x13e   : > { %v6212_v43 = vadd.f32 %v5205_v33, %v1008_v42  ;;  %v3989_v33 = vor.u32 %v4831_v30, %v3988_v29  ;;  %v4036_v42 = vld [vmem:[#allocation18 + $0x220] sm:$0xf]  ;;  %v3966_v29 = vld [vmem:[#allocation18 + $0x198] sm:$0xf0] }
 0x13f   : > { %v1022_v47 = vld [vmem:[#allocation2 + $0x7] sm:$0xff]  ;;  %v4116_v30 = vld [vmem:[#allocation18 + $0x2c0] sm:$0xf]  ;;  %v3969_v31 = vor.u32 %v4824_v22, %v3966_v29 }
 0x140   : > { %v1019_v44 = vsel %vm1017_vm0, %v6212_v43, 0.0  ;;  %v5246_v46 = vpack.c.bf16 %v6212_v43, %v6206_v39  ;;  %1765 = vmatpush.bf16.msrb.mxu3 %v3989_v33  ;;  %v4863_v33 = vld [vmem:[#allocation18 + $0x2c4] sm:$0xf0]  ;;  %v4054_v29 = vld [vmem:[#allocation18 + $0x248] sm:$0xf0] }
 0x141   : > { %1021 = vst [vmem:[#allocation2 + $0x10] sm:$0xff] %v1019_v44  ;;  %v4843_v44 = vld [vmem:[#allocation18 + $0x224] sm:$0xf0] }
 0x142   : > { %5247 = vmatmul.msk.bf16.vlgmr.msra.gmra.mxu2 %vm6219_vm2, %v5246_v46  ;;  %v4883_v22 = vld [vmem:[#allocation19 + $0x28] sm:$0xff] }
 0x143   : > { %1804 = vmatpush.bf16.msra.mxu2 %v4017_v5 }
 0x147   : > { %1805 = vmatpush.bf16.msra.mxu2 %v4009_v15  ;;  %v4868_v15 = vld [vmem:[#allocation18 + $0x2f4] sm:$0xf] }
 0x148   : > { %v1023_v48 = vld [vmem:[#allocation2 + $0xf] sm:$0xff]  ;;  %v4145_v23 = vor.u32 %v4868_v15, %v4142_v18  ;;  %v4062_v18 = vld [vmem:[#allocation18 + $0x258] sm:$0xf0] }
 0x149   : > { %v1026_v49 = vld [vmem:[#allocation2 + $0x9] sm:$0xff]  ;;  %v1027_v50 = vld [vmem:[#allocation2 + $0x11] sm:$0xff]  ;;  %v1028_v51 = vpack.c.bf16 %v1023_v48, %v1022_v47  ;;  %v4037_v47 = vor.u32 %v4843_v44, %v4036_v42  ;;  %v3956_v42 = vld [vmem:[#allocation18 + $0x180] sm:$0xf] }
 0x14a   : > { %v1030_v52 = vpack.c.bf16 %v1027_v50, %v1026_v49  ;;  %v3980_v48 = vld [vmem:[#allocation18 + $0x1b0] sm:$0xf]  ;;  %v4829_v49 = vld [vmem:[#allocation18 + $0x1b4] sm:$0xf0]  ;;  %v4828_v50 = vld [vmem:[#allocation18 + $0x1b4] sm:$0xf] }
 0x14b   : > { %1333 = vmatmul.bf16.vlgmr.msra.gmra.mxu1 %v1028_v51  ;;  %1375 = vmatmul.bf16.vlgmr.msrb.gmra.mxu0 %v1028_v51  ;;  %v3981_v51 = vor.u32 %v4829_v49, %v3980_v48  ;;  %v4823_v44 = vld [vmem:[#allocation18 + $0x184] sm:$0xf0]  ;;  %v4092_v15 = vld [vmem:[#allocation18 + $0x290] sm:$0xf] }
 0x14c   : > { %1361 = vmatmul.bf16.vlgmr.msra.gmra.mxu3 %v1030_v52  ;;  %1806 = vmatpush.bf16.msra.mxu2 %v4001_v25  ;;  %v3957_v49 = vor.u32 %v4823_v44, %v3956_v42 }
 0x14d   : > { %1790 = vmatpush.bf16.msra.mxu1 %v4141_v40  ;;  %1781 = vmatpush.bf16.msra.mxu0 %v4037_v47  ;;  %v4822_v47 = vld [vmem:[#allocation18 + $0x184] sm:$0xf] }
 0x14e   : > { %1766 = vmatpush.bf16.msrb.mxu3 %v3981_v51  ;;  %v4108_v51 = vld [vmem:[#allocation18 + $0x2b0] sm:$0xf] }
 0x150   : > { %1807 = vmatpush.bf16.msra.mxu2 %v3993_v38  ;;  %v4137_v38 = vor.u32 %v4866_v34, %v4134_v35 }
 0x151   : > { %1791 = vmatpush.bf16.msra.mxu1 %v4133_v56  ;;  %1782 = vmatpush.bf16.msra.mxu0 %v4029_v62  ;;  %v4852_v56 = vld [vmem:[#allocation18 + $0x274] sm:$0xf] }
 0x152   : > { %1403 = vmatmul.bf16.vlgmr.msrb.gmra.mxu2 %v1030_v52  ;;  %v3982_v52 = vld [vmem:[#allocation18 + $0x1b8] sm:$0xf0]  ;;  %1767 = vmatpush.bf16.msrb.mxu3 %v3973_v6  ;;  %v4864_v62 = vld [vmem:[#allocation18 + $0x2d4] sm:$0xf] }
 0x153   : > { %v3985_v55 = vor.u32 %v4828_v50, %v3982_v52  ;;  %v3958_v50 = vld [vmem:[#allocation18 + $0x188] sm:$0xf0]  ;;  %v4861_v52 = vld [vmem:[#allocation18 + $0x2b4] sm:$0xf0] }
 0x154   : > { %v3961_v54 = vor.u32 %v4822_v47, %v3958_v50  ;;  %v4882_v47 = vld [vmem:[#allocation19 + $0x20] sm:$0xff] }
 0x155   : > { %1808 = vmatpush.bf16.msra.mxu2 %v3985_v55  ;;  %1792 = vmatpush.bf16.msra.mxu1 %v4125_v12  ;;  %v4109_v55 = vor.u32 %v4861_v52, %v4108_v51  ;;  %v4073_v12 = vor.u32 %v4850_v9, %v4070_v10  ;;  %v4844_v52 = vld [vmem:[#allocation18 + $0x234] sm:$0xf] }
 0x156   : > { %1783 = vmatpush.bf16.msra.mxu0 %v4021_v17  ;;  %1768 = vmatpush.bf16.msrb.mxu3 %v3965_v26  ;;  %v4848_v17 = vld [vmem:[#allocation18 + $0x254] sm:$0xf]  ;;  %v4846_v26 = vld [vmem:[#allocation18 + $0x244] sm:$0xf] }
 0x157   : > { %v4065_v21 = vor.u32 %v4848_v17, %v4062_v18 }
 0x159   : > { %1809 = vmatpush.bf16.msra.mxu2 %v3977_v11  ;;  %v4884_v11 = vld [vmem:[#allocation19 + $0x30] sm:$0xff] }
 0x15a   : > { %1832 = vmatpush.bf16.msrb.mxu0 %v4145_v23  ;;  %1769 = vmatpush.bf16.msrb.mxu3 %v3957_v49  ;;  %v4084_v23 = vld [vmem:[#allocation18 + $0x280] sm:$0xf] }
 0x15b   : > { %5250 = vmatmul.msk.bf16.vlgmr.msrb.gmra.mxu1 %vm6219_vm2, %v5246_v46  ;;  %v1082_v46 = vperm.slane %v6238_v27, 1 }
 0x15d   : > { %1810 = vmatpush.bf16.msra.mxu2 %v3969_v31  ;;  %v4860_v31 = vld [vmem:[#allocation18 + $0x2b4] sm:$0xf] }
 0x15e   : > { %1833 = vmatpush.bf16.msrb.mxu0 %v4137_v38  ;;  %v4858_v38 = vld [vmem:[#allocation18 + $0x2a4] sm:$0xf] }
 0x161   : > { %1811 = vmatpush.bf16.msra.mxu2 %v3961_v54 }
 0x165   : > { %2054 = vmatpush.bf16.msrb.mxu2 %v4885_v57 }
 0x169   : > { %2055 = vmatpush.bf16.msrb.mxu2 %v4884_v11 }
 0x16d   : > { %2056 = vmatpush.bf16.msrb.mxu2 %v4883_v22  ;;  %v4879_v22 = vld [vmem:[#allocation19 + $0x8] sm:$0xff] }
 0x171   : > { %2057 = vmatpush.bf16.msrb.mxu2 %v4882_v47  ;;  %v4334_v47 = vld [vmem:[#allocation25 + $0xf0] sm:$0xf] }
 0x1c5   : > { %v6229_v4 = vpop.f32.mrf.mxu2 }
 0x1c8   : > { %v6231_v7 = vpop.f32.mrf.mxu1  ;;  %v1376_v37 = vpop.f32.mrf.mxu0 }
 0x1c9   : > { %v1377_v59 = vadd.f32 %v1376_v37, %v1082_v46  ;;  %v4117_v37 = vor.u32 %v4863_v33, %v4116_v30  ;;  %v1081_v30 = vperm.slane %v6238_v27, 0  ;;  %v4110_v33 = vld [vmem:[#allocation18 + $0x2b8] sm:$0xf0] }
 0x1cb   : > { %1793 = vmatpush.bf16.msra.mxu1 %v4117_v37  ;;  %v4113_v37 = vor.u32 %v4860_v31, %v4110_v33  ;;  %v1335_v27 = vadd.f32 %v6231_v7, %v1081_v30  ;;  %v4038_v7 = vld [vmem:[#allocation18 + $0x228] sm:$0xf0] }
 0x1cd   : > { %v6233_v24 = vpop.f32.mrf.mxu2 }
 0x1cf   : > { %1794 = vmatpush.bf16.msra.mxu1 %v4109_v55  ;;  %v1362_v54 = vpop.f32.mrf.mxu3 }
 0x1d0   : > { %v6240_v28 = vpop.f32.mrf.mxu1  ;;  %v1378_v19 = vpop.f32.mrf.mxu0 }
 0x1d1   : > { %v1379_v36 = vadd.f32 %v1378_v19, %v1082_v46  ;;  %v4078_v46 = vld [vmem:[#allocation18 + $0x278] sm:$0xf0]  ;;  %v4121_v19 = vor.u32 %v4862_v13, %v4118_v14  ;;  %v4854_v13 = vld [vmem:[#allocation18 + $0x284] sm:$0xf] }
 0x1d5   : > { %v1404_v0 = vpop.f32.mrf.mxu2 }
 0x1d8   : > { %v1390_v63 = vpop.f32.mrf.mxu1 }
 0x1d9   : > { %v1391_v5 = vadd.f32 %v1390_v63, %v1377_v59  ;;  %v4081_v59 = vor.u32 %v4852_v56, %v4078_v46  ;;  %v4126_v63 = vld [vmem:[#allocation18 + $0x2d8] sm:$0xf0]  ;;  %v4856_v46 = vld [vmem:[#allocation18 + $0x294] sm:$0xf] }
 0x1da   : > { %v4881_v56 = vld [vmem:[#allocation19 + $0x18] sm:$0xff] }
 0x1db   : > { %v1405_v16 = vadd.f32 %v1404_v0, %v1391_v5  ;;  %v4129_v0 = vor.u32 %v4864_v62, %v4126_v63  ;;  %1818 = vmatpush.bf16.msra.mxu3 %v4081_v59  ;;  %v4859_v5 = vld [vmem:[#allocation18 + $0x2a4] sm:$0xf0]  ;;  %v4842_v59 = vld [vmem:[#allocation18 + $0x224] sm:$0xf]  ;;  %v1349_v62 = vadd.f32 %v6229_v4, %v1335_v27  ;;  %v4094_v63 = vld [vmem:[#allocation18 + $0x298] sm:$0xf0]  ;;  %2058 = vmatpush.bf16.msrb.mxu2 %v4881_v56 }
 0x1dc   : > { %v4101_v8 = vor.u32 %v4859_v5, %v4100_v3  ;;  %v4041_v3 = vor.u32 %v4842_v59, %v4038_v7  ;;  %v4880_v5 = vld [vmem:[#allocation19 + $0x10] sm:$0xff]  ;;  %v4097_v9 = vor.u32 %v4856_v46, %v4094_v63  ;;  %v4086_v4 = vld [vmem:[#allocation18 + $0x288] sm:$0xf0]  ;;  %v4913_v56 = vld [vmem:[#allocation25 + $0xd4] sm:$0xf0] }
 0x1dd   : > { %v3951_v25 = vmul.f32 -1.442695, %v1405_v16  ;;  %v1406_v53 = vpop.f32.mrf.mxu2  ;;  %1834 = vmatpush.bf16.msrb.mxu0 %v4129_v0  ;;  %v4857_v16 = vld [vmem:[#allocation18 + $0x294] sm:$0xf0]  ;;  %v1363_v11 = vadd.f32 %v1362_v54, %v1349_v62  ;;  %v4262_v63 = vld [vmem:[#allocation25 + $0x60] sm:$0xf] }
 0x1de   : > { %1795 = vmatpush.bf16.msra.mxu1 %v4101_v8  ;;  %v4093_v20 = vor.u32 %v4857_v16, %v4092_v15  ;;  %v4840_v8 = vld [vmem:[#allocation18 + $0x214] sm:$0xf]  ;;  %v4089_v15 = vor.u32 %v4854_v13, %v4086_v4  ;;  %v1337_v16 = vadd.f32 %v6240_v28, %v1081_v30  ;;  %v1364_v30 = vpop.f32.mrf.mxu3  ;;  %v4901_v54 = vld [vmem:[#allocation25 + $0x74] sm:$0xf0]  ;;  %v4246_v4 = vld [vmem:[#allocation25 + $0x40] sm:$0xf] }
 0x1df   : > { %5213 = vpow2.f32 %v3951_v25  ;;  %1819 = vmatpush.bf16.msra.mxu3 %v4073_v12  ;;  %v4855_v25 = vld [vmem:[#allocation18 + $0x284] sm:$0xf0]  ;;  %v4030_v12 = vld [vmem:[#allocation18 + $0x218] sm:$0xf0]  ;;  %2059 = vmatpush.bf16.msrb.mxu2 %v4880_v5  ;;  %v4254_v5 = vld [vmem:[#allocation25 + $0x50] sm:$0xf] }
 0x1e0   : > { %v1392_v40 = vpop.f32.mrf.mxu1  ;;  %v4085_v35 = vor.u32 %v4855_v25, %v4084_v23  ;;  %v4838_v23 = vld [vmem:[#allocation18 + $0x204] sm:$0xf]  ;;  %v4022_v25 = vld [vmem:[#allocation18 + $0x208] sm:$0xf0]  ;;  %v1351_v28 = vadd.f32 %v6233_v24, %v1337_v16  ;;  %v4911_v16 = vld [vmem:[#allocation25 + $0xc4] sm:$0xf0] }
 0x1e1   : > { %v1393_v48 = vadd.f32 %v1392_v40, %v1379_v36  ;;  %1835 = vmatpush.bf16.msrb.mxu0 %v4121_v19  ;;  %v4057_v36 = vor.u32 %v4846_v26, %v4054_v29  ;;  %v4102_v40 = vld [vmem:[#allocation18 + $0x2a8] sm:$0xf0] }
 0x1e2   : > { %1796 = vmatpush.bf16.msra.mxu1 %v4093_v20  ;;  %v4105_v49 = vor.u32 %v4858_v38, %v4102_v40  ;;  %v4033_v20 = vor.u32 %v4840_v8, %v4030_v12  ;;  %v4897_v8 = vld [vmem:[#allocation25 + $0x54] sm:$0xf0] }
 0x1e3   : > { %v1407_v58 = vadd.f32 %v1406_v53, %v1393_v48  ;;  %1820 = vmatpush.bf16.msra.mxu3 %v4065_v21  ;;  %v4046_v53 = vld [vmem:[#allocation18 + $0x238] sm:$0xf0]  ;;  %2060 = vmatpush.bf16.msrb.mxu2 %v4879_v22  ;;  %v4893_v22 = vld [vmem:[#allocation25 + $0x34] sm:$0xf0] }
 0x1e4   : > { %v4049_v55 = vor.u32 %v4844_v52, %v4046_v53  ;;  %v4270_v53 = vld [vmem:[#allocation25 + $0x70] sm:$0xf] }
 0x1e5   : > { %v5214_v1 = vpop.eup %5213  ;;  %v3952_v2 = vmul.f32 -1.442695, %v1407_v58  ;;  %1836 = vmatpush.bf16.msrb.mxu0 %v4113_v37  ;;  %v4878_v37 = vld [vmem:[#allocation19] sm:$0xff]  ;;  %v4271_v59 = vor.u32 %v4901_v54, %v4270_v53  ;;  %v4887_v54 = vld [vmem:[#allocation25 + $0x4] sm:$0xf0] }
 0x1e6   : > { %v6243_v6 = vadd.f32 1.0, %v5214_v1  ;;  %1797 = vmatpush.bf16.msra.mxu1 %v4085_v35  ;;  %v4025_v35 = vor.u32 %v4838_v23, %v4022_v25  ;;  %v4302_v23 = vld [vmem:[#allocation25 + $0xb0] sm:$0xf]  ;;  %v4214_v53 = vld [vmem:[#allocation25] sm:$0xf] }
 0x1e7   : > { %5215 = vpow2.f32 %v3952_v2  ;;  %1821 = vmatpush.bf16.msra.mxu3 %v4057_v36  ;;  %2061 = vmatpush.bf16.msrb.mxu2 %v4878_v37  ;;  %v4907_v37 = vld [vmem:[#allocation25 + $0xa4] sm:$0xf0] }
 0x1e8   : > { %5217 = vrcp.f32 %v6243_v6  ;;  %v1428_v51 = vand.u32 2147483648, %v6243_v6  ;;  %v1426_v58 = vand.u32 2147483647, %v6243_v6  ;;  %vm1422_vm4 = vweird.f32 %v6243_v6 }
 0x1e9   : > { %1837 = vmatpush.bf16.msrb.mxu0 %v4105_v49 }
 0x1ea   : > { %v1429_v2 = vor.u32 1.1754944e-38, %v1428_v51  ;;  %vm1427_vm6 = vcmp.eq.f32.partialorder %v1426_v58, 8.507059e+37  ;;  %v4915_v51 = vld [vmem:[#allocation25 + $0xe4] sm:$0xf0] }
 0x1eb   : > { %1822 = vmatpush.bf16.msra.mxu3 %v4049_v55  ;;  %v4318_v55 = vld [vmem:[#allocation25 + $0xd0] sm:$0xf] }
 0x1ec   : > { %v4319_v1 = vor.u32 %v4913_v56, %v4318_v55  ;;  %v4278_v55 = vld [vmem:[#allocation25 + $0x80] sm:$0xf]  ;;  %v4215_v56 = vor.u32 %v4887_v54, %v4214_v53  ;;  %v4922_v53 = vld [vmem:[#allocation25 + $0x124] sm:$0xf]  ;;  %v4360_v54 = vld [vmem:[#allocation25 + $0x128] sm:$0xf0] }
 0x1ed   : > { %v5216_v34 = vpop.eup %5215  ;;  %1838 = vmatpush.bf16.msrb.mxu0 %v4097_v9 }
 0x1ee   : > { %v5218_v42 = vpop.eup %5217  ;;  %v6247_v44 = vadd.f32 1.0, %v5216_v34 }
 0x1ef   : > { %v1418_v48 = vmul.f32 %v5218_v42, %v6243_v6  ;;  %vm1423_vm3 = vweird.f32 %v5218_v42  ;;  %1823 = vmatpush.bf16.msra.mxu3 %v4041_v3  ;;  %v921_v3 = vld [vmem:[%s789_s21] sm:$0xff] }
 0x1f0   : > { %5219 = vrcp.f32 %v6247_v44  ;;  %vm6256_vm5 = vmor %vm1422_vm4, %vm1423_vm3  ;;  %v1443_v21 = vand.u32 2147483648, %v6247_v44  ;;  %v1441_v31 = vand.u32 2147483647, %v6247_v44  ;;  %vm1437_vm8 = vweird.f32 %v6247_v44 }
 0x1f1   : > { %v1419_v50 = vsub.f32 1.0, %v1418_v48  ;;  %1839 = vmatpush.bf16.msrb.mxu0 %v4089_v15  ;;  %v4917_v48 = vld [vmem:[#allocation25 + $0xf4] sm:$0xf0]  ;;  %v1982_v9 = vadd.f32 %v921_v3, %v921_v3  ;;  %v4890_v3 = vld [vmem:[#allocation25 + $0x24] sm:$0xf] }
 0x1f2   : > { %v1444_v36 = vor.u32 1.1754944e-38, %v1443_v21  ;;  %vm1442_vm10 = vcmp.eq.f32.partialorder %v1441_v31, 8.507059e+37  ;;  %v4335_v27 = vor.u32 %v4917_v48, %v4334_v47  ;;  %v4238_v21 = vld [vmem:[#allocation25 + $0x30] sm:$0xf]  ;;  %v4264_v31 = vld [vmem:[#allocation25 + $0x68] sm:$0xf0] }
 0x1f3   : > { %v1420_v57 = vmul.f32 %v5218_v42, %v1419_v50  ;;  %1824 = vmatpush.bf16.msra.mxu3 %v4033_v20  ;;  %v4326_v50 = vld [vmem:[#allocation25 + $0xe0] sm:$0xf]  ;;  %v4239_v25 = vor.u32 %v4893_v22, %v4238_v21  ;;  %v4889_v47 = vld [vmem:[#allocation25 + $0x14] sm:$0xf0]  ;;  %v4286_v48 = vld [vmem:[#allocation25 + $0x90] sm:$0xf] }
 0x1f4   : > { %v4384_v22 = vld [vmem:[#allocation25 + $0x158] sm:$0xf0] }
 0x1f5   : > { %v1421_v0 = vadd.f32 %v5218_v42, %v1420_v57 }
 0x1f6   : > { %v5220_v10 = vpop.eup %5219 }
 0x1f7   : > { %v1425_v6 = vsel %vm6256_vm5, %v5218_v42, %v1421_v0  ;;  %v1433_v14 = vmul.f32 %v5220_v10, %v6247_v44  ;;  %vm1438_vm7 = vweird.f32 %v5220_v10  ;;  %1825 = vmatpush.bf16.msra.mxu3 %v4025_v35  ;;  %v4899_v0 = vld [vmem:[#allocation25 + $0x64] sm:$0xf0]  ;;  %v4294_v35 = vld [vmem:[#allocation25 + $0xa0] sm:$0xf] }
 0x1f8   : > { %v1430_v17 = vsel %vm1427_vm6, %v1429_v2, %v1425_v6  ;;  %vm1439_vm9 = vmor %vm1437_vm8, %vm1438_vm7  ;;  %v4263_v2 = vor.u32 %v4899_v0, %v4262_v63  ;;  %v4895_v6 = vld [vmem:[#allocation25 + $0x44] sm:$0xf0]  ;;  %v4932_v63 = vld [vmem:[#allocation25 + $0x174] sm:$0xf] }
 0x1f9   : > { %v1447_v18 = vmul.f32 %v1430_v17, %v1363_v11  ;;  %v1434_v19 = vsub.f32 1.0, %v1433_v14  ;;  %v1983_v11 = vld [vmem:[#allocation10] sm:$0xff]  ;;  %v4310_v14 = vld [vmem:[#allocation25 + $0xc0] sm:$0xf]  ;;  %v4247_v15 = vor.u32 %v4895_v6, %v4246_v4  ;;  %v4392_v4 = vld [vmem:[#allocation25 + $0x168] sm:$0xf0] }
 0x1fa   : > { %v6284_v12 = vadd.f32 %v1983_v11, %v1982_v9  ;;  %v4900_v17 = vld [vmem:[#allocation25 + $0x74] sm:$0xf]  ;;  %v4914_v9 = vld [vmem:[#allocation25 + $0xe4] sm:$0xf] }
 0x1fb   : > { %v1449_v26 = vadd.f32 %v1447_v18, %v6206_v39  ;;  %v1435_v29 = vmul.f32 %v5220_v10, %v1434_v19  ;;  %v1365_v39 = vadd.f32 %v1364_v30, %v1351_v28  ;;  %v4272_v18 = vld [vmem:[#allocation25 + $0x78] sm:$0xf0]  ;;  %v4311_v19 = vor.u32 %v4911_v16, %v4310_v14  ;;  %v4230_v30 = vld [vmem:[#allocation25 + $0x20] sm:$0xf]  ;;  %v4930_v11 = vld [vmem:[#allocation25 + $0x164] sm:$0xf] }
 0x1fc   : > { %v1985_v13 = vpack.c.bf16 %v6284_v12, %v6284_v12  ;;  %v4275_v20 = vor.u32 %v4900_v17, %v4272_v18  ;;  %v4267_v28 = vor.u32 %v4898_v45, %v4264_v31  ;;  %v4395_v6 = vor.u32 %v4930_v11, %v4392_v4  ;;  %v4877_v14 = vld [vmem:[#allocation15 + $0x38] sm:$0xff]  ;;  %v4216_v45 = vld [vmem:[#allocation25 + $0x8] sm:$0xf0]  ;;  %v4910_v31 = vld [vmem:[#allocation25 + $0xc4] sm:$0xf] }
 0x1fd   : > { %v6268_v33 = vmul.f32 0.70710677, %v1449_v26  ;;  %v1436_v34 = vadd.f32 %v5220_v10, %v1435_v29  ;;  %v4909_v26 = vld [vmem:[#allocation25 + $0xb4] sm:$0xf0]  ;;  %v4224_v16 = vld [vmem:[#allocation25 + $0x18] sm:$0xf0]  ;;  %1959 = vmatpush.bf16.msrb.mxu1 %v4877_v14 }
 0x1fe   : > { %v4303_v29 = vor.u32 %v4909_v26, %v4302_v23  ;;  %v4912_v18 = vld [vmem:[#allocation25 + $0xd4] sm:$0xf]  ;;  %v4886_v26 = vld [vmem:[#allocation25 + $0x4] sm:$0xf] }
 0x1ff   : > { %1455 = vst [vmem:[#allocation2 + $0x8] sm:$0xff] %v6268_v33  ;;  %v1440_v38 = vsel %vm1439_vm9, %v5220_v10, %v1436_v34  ;;  %v4255_v10 = vor.u32 %v4897_v8, %v4254_v5  ;;  %v4891_v34 = vld [vmem:[#allocation25 + $0x24] sm:$0xf0]  ;;  %v4232_v5 = vld [vmem:[#allocation25 + $0x28] sm:$0xf0] }
 0x200   : > { %v1445_v40 = vsel %vm1442_vm10, %v1444_v36, %v1440_v38  ;;  %v4231_v36 = vor.u32 %v4891_v34, %v4230_v30  ;;  %v4256_v38 = vld [vmem:[#allocation25 + $0x58] sm:$0xf0]  ;;  %v4235_v8 = vor.u32 %v4890_v3, %v4232_v5  ;;  %v4926_v30 = vld [vmem:[#allocation25 + $0x144] sm:$0xf]  ;;  %v4280_v5 = vld [vmem:[#allocation25 + $0x88] sm:$0xf0] }
 0x201   : > { %v1448_v42 = vmul.f32 %v1445_v40, %v1365_v39  ;;  %v4896_v39 = vld [vmem:[#allocation25 + $0x54] sm:$0xf]  ;;  %v4295_v40 = vor.u32 %v4907_v37, %v4294_v35  ;;  %v4376_v35 = vld [vmem:[#allocation25 + $0x148] sm:$0xf0]  ;;  %v4902_v3 = vld [vmem:[#allocation25 + $0x84] sm:$0xf] }
 0x202   : > { %v4871_v4 = vld [vmem:[#allocation15 + $0x8] sm:$0xff] }
 0x203   : > { %v1450_v24 = vadd.f32 %v1448_v42, %v6212_v43  ;;  %v4327_v43 = vor.u32 %v4915_v51, %v4326_v50  ;;  %v4259_v42 = vor.u32 %v4896_v39, %v4256_v38  ;;  %v4894_v50 = vld [vmem:[#allocation25 + $0x44] sm:$0xf]  ;;  %v4248_v51 = vld [vmem:[#allocation25 + $0x48] sm:$0xf0]  ;;  %v4908_v38 = vld [vmem:[#allocation25 + $0xb4] sm:$0xf] }
 0x204   : > { %v4875_v39 = vld [vmem:[#allocation15 + $0x28] sm:$0xff] }
 0x205   : > { %v6273_v44 = vmul.f32 0.70710677, %v1450_v24  ;;  %v4222_v24 = vld [vmem:[#allocation25 + $0x10] sm:$0xf] }
 0x206   : > { %v1457_v46 = vld [vmem:[#allocation2 + $0x7] sm:$0xff] }
 0x207   : > { %v1454_v49 = vsel %vm1017_vm0, %v6273_v44, 0.0  ;;  %v5252_v52 = vpack.c.bf16 %v6273_v44, %v6268_v33 }
 0x208   : > { %1456 = vst [vmem:[#allocation2 + $0x10] sm:$0xff] %v1454_v49  ;;  %v4223_v49 = vor.u32 %v4889_v47, %v4222_v24  ;;  %v4368_v47 = vld [vmem:[#allocation25 + $0x138] sm:$0xf0] }
 0x209   : > { %5253 = vmatmul.msk.bf16.vlgmr.msra.gmra.mxu0 %vm6219_vm2, %v5252_v52 }
 0x20a   : > { %2385 = vmatpush.bf16.msra.mxu0 %v4335_v27  ;;  %v4905_v27 = vld [vmem:[#allocation25 + $0x94] sm:$0xf0] }
 0x20e   : > { %2386 = vmatpush.bf16.msra.mxu0 %v4327_v43  ;;  %v4251_v43 = vor.u32 %v4894_v50, %v4248_v51  ;;  %v4874_v50 = vld [vmem:[#allocation15 + $0x20] sm:$0xff] }
 0x20f   : > { %v1458_v41 = vld [vmem:[#allocation2 + $0xf] sm:$0xff]  ;;  %v4906_v51 = vld [vmem:[#allocation25 + $0xa4] sm:$0xf] }
 0x210   : > { %v1461_v57 = vld [vmem:[#allocation2 + $0x9] sm:$0xff]  ;;  %v1462_v58 = vld [vmem:[#allocation2 + $0x11] sm:$0xff]  ;;  %v1463_v7 = vpack.c.bf16 %v1458_v41, %v1457_v46  ;;  %v4903_v46 = vld [vmem:[#allocation25 + $0x84] sm:$0xf0] }
 0x211   : > { %v1465_v62 = vpack.c.bf16 %v1462_v58, %v1461_v57  ;;  %v4892_v41 = vld [vmem:[#allocation25 + $0x34] sm:$0xf]  ;;  %v4240_v57 = vld [vmem:[#allocation25 + $0x38] sm:$0xf0]  ;;  %v4279_v58 = vor.u32 %v4903_v46, %v4278_v55  ;;  %v4363_v55 = vor.u32 %v4922_v53, %v4360_v54 }
 0x212   : > { %1770 = vmatmul.bf16.vlgmr.msrb.gmra.mxu3 %v1463_v7  ;;  %1812 = vmatmul.bf16.vlgmr.msra.gmra.mxu2 %v1463_v7  ;;  %v4916_v7 = vld [vmem:[#allocation25 + $0xf4] sm:$0xf] }
 0x213   : > { %1798 = vmatmul.bf16.vlgmr.msra.gmra.mxu1 %v1465_v62  ;;  %2372 = vmatpush.bf16.msrb.mxu3 %v4271_v59  ;;  %v4243_v59 = vor.u32 %v4892_v41, %v4240_v57  ;;  %v4904_v46 = vld [vmem:[#allocation25 + $0x94] sm:$0xf]  ;;  %v4288_v41 = vld [vmem:[#allocation25 + $0x98] sm:$0xf0] }
 0x214   : > { %2387 = vmatpush.bf16.msra.mxu0 %v4319_v1  ;;  %2411 = vmatpush.bf16.msra.mxu2 %v4275_v20  ;;  %v4400_v1 = vld [vmem:[#allocation25 + $0x178] sm:$0xf0]  ;;  %v4928_v20 = vld [vmem:[#allocation25 + $0x154] sm:$0xf] }
 0x215   : > { %v4387_v23 = vor.u32 %v4928_v20, %v4384_v22  ;;  %v4398_v20 = vld [vmem:[#allocation25 + $0x170] sm:$0xf] }
 0x217   : > { %2373 = vmatpush.bf16.msrb.mxu3 %v4263_v2  ;;  %v4403_v2 = vor.u32 %v4932_v63, %v4400_v1  ;;  %v6299_v63 = vld [vmem:[%s6455_s9 + $0x2] sm:$0x3] }
 0x218   : > { %2388 = vmatpush.bf16.msra.mxu0 %v4311_v19  ;;  %2412 = vmatpush.bf16.msra.mxu2 %v4267_v28  ;;  %v4320_v19 = vld [vmem:[#allocation25 + $0xd8] sm:$0xf0]  ;;  %v4312_v28 = vld [vmem:[#allocation25 + $0xc8] sm:$0xf0]  ;;  %v1519_v11 = vperm.slane %v6299_v63, 1 }
 0x219   : > { %1840 = vmatmul.bf16.vlgmr.msrb.gmra.mxu0 %v1465_v62  ;;  %v4336_v62 = vld [vmem:[#allocation25 + $0xf8] sm:$0xf0]  ;;  %v4323_v21 = vor.u32 %v4912_v18, %v4320_v19  ;;  %v4315_v34 = vor.u32 %v4910_v31, %v4312_v28  ;;  %v4382_v28 = vld [vmem:[#allocation25 + $0x150] sm:$0xf] }
 0x21a   : > { %v4339_v0 = vor.u32 %v4916_v7, %v4336_v62  ;;  %v4352_v7 = vld [vmem:[#allocation25 + $0x118] sm:$0xf0] }
 0x21b   : > { %2374 = vmatpush.bf16.msrb.mxu3 %v4255_v10  ;;  %v4328_v10 = vld [vmem:[#allocation25 + $0xe8] sm:$0xf0]  ;;  %v4870_v19 = vld [vmem:[#allocation15] sm:$0xff] }
 0x21c   : > { %2389 = vmatpush.bf16.msra.mxu0 %v4303_v29  ;;  %2413 = vmatpush.bf16.msra.mxu2 %v4259_v42  ;;  %v4219_v29 = vor.u32 %v4886_v26, %v4216_v45  ;;  %v4924_v42 = vld [vmem:[#allocation25 + $0x134] sm:$0xf]  ;;  %v4390_v26 = vld [vmem:[#allocation25 + $0x160] sm:$0xf]  ;;  %v4931_v45 = vld [vmem:[#allocation25 + $0x164] sm:$0xf0] }
 0x21f   : > { %2375 = vmatpush.bf16.msrb.mxu3 %v4247_v15  ;;  %v4888_v15 = vld [vmem:[#allocation25 + $0x14] sm:$0xf] }
 0x220   : > { %2390 = vmatpush.bf16.msra.mxu0 %v4295_v40  ;;  %2414 = vmatpush.bf16.msra.mxu2 %v4251_v43  ;;  %v4227_v17 = vor.u32 %v4888_v15, %v4224_v16  ;;  %v4304_v40 = vld [vmem:[#allocation25 + $0xb8] sm:$0xf0] }
 0x221   : > { %v4307_v24 = vor.u32 %v4908_v38, %v4304_v40  ;;  %v4374_v40 = vld [vmem:[#allocation25 + $0x140] sm:$0xf] }
 0x222   : > { %5256 = vmatmul.msk.bf16.vlgmr.msra.gmra.mxu3 %vm6219_vm2, %v5252_v52  ;;  %2062 = vmatmul.bf16.vlgmr.msrb.gmra.mxu2 %v1985_v13  ;;  %v4287_v52 = vor.u32 %v4905_v27, %v4286_v48  ;;  %v4331_v13 = vor.u32 %v4914_v9, %v4328_v10  ;;  %v4371_v48 = vor.u32 %v4924_v42, %v4368_v47  ;;  %v4918_v9 = vld [vmem:[#allocation25 + $0x104] sm:$0xf]  ;;  %v4344_v10 = vld [vmem:[#allocation25 + $0x108] sm:$0xf0]  ;;  %v4927_v42 = vld [vmem:[#allocation25 + $0x144] sm:$0xf0] }
 0x223   : > { %2376 = vmatpush.bf16.msrb.mxu3 %v4239_v25  ;;  %v4876_v25 = vld [vmem:[#allocation15 + $0x30] sm:$0xff] }
 0x224   : > { %2391 = vmatpush.bf16.msra.mxu0 %v4287_v52  ;;  %2415 = vmatpush.bf16.msra.mxu2 %v4243_v59  ;;  %v4296_v52 = vld [vmem:[#allocation25 + $0xa8] sm:$0xf0]  ;;  %v4920_v59 = vld [vmem:[#allocation25 + $0x114] sm:$0xf] }
 0x225   : > { %1960 = vmatpush.bf16.msrb.mxu1 %v4876_v25  ;;  %v4299_v43 = vor.u32 %v4906_v51, %v4296_v52  ;;  %v4355_v62 = vor.u32 %v4920_v59, %v4352_v7  ;;  %v4375_v52 = vor.u32 %v4927_v42, %v4374_v40 }
 0x227   : > { %2377 = vmatpush.bf16.msrb.mxu3 %v4231_v36  ;;  %v4379_v36 = vor.u32 %v4926_v30, %v4376_v35  ;;  %v4929_v30 = vld [vmem:[#allocation25 + $0x154] sm:$0xf0] }
 0x228   : > { %2392 = vmatpush.bf16.msra.mxu0 %v4279_v58  ;;  %2416 = vmatpush.bf16.msra.mxu2 %v4235_v8  ;;  %v4291_v58 = vor.u32 %v4904_v46, %v4288_v41  ;;  %v4283_v8 = vor.u32 %v4902_v3, %v4280_v5  ;;  %v4358_v46 = vld [vmem:[#allocation25 + $0x120] sm:$0xf]  ;;  %v1518_v3 = vperm.slane %v6299_v63, 0 }
 0x229   : > { %1961 = vmatpush.bf16.msrb.mxu1 %v4875_v39 }
 0x22b   : > { %2378 = vmatpush.bf16.msrb.mxu3 %v4223_v49 }
 0x22c   : > { %2437 = vmatpush.bf16.msrb.mxu0 %v4403_v2  ;;  %2417 = vmatpush.bf16.msra.mxu2 %v4227_v17  ;;  %v4872_v2 = vld [vmem:[#allocation15 + $0x10] sm:$0xff] }
 0x22d   : > { %1962 = vmatpush.bf16.msrb.mxu1 %v4874_v50 }
 0x22f   : > { %2379 = vmatpush.bf16.msrb.mxu3 %v4215_v56  ;;  %v4873_v56 = vld [vmem:[#allocation15 + $0x18] sm:$0xff] }
 0x230   : > { %2438 = vmatpush.bf16.msrb.mxu0 %v4395_v6  ;;  %2418 = vmatpush.bf16.msra.mxu2 %v4219_v29  ;;  %v5206_v6 = vld [vmem:[%s6457_s11] ss:$0 sm:$0xff]  ;;  %v4391_v29 = vor.u32 %v4931_v45, %v4390_v26 }
 0x231   : > { %1963 = vmatpush.bf16.msrb.mxu1 %v4873_v56  ;;  %v4925_v56 = vld [vmem:[#allocation25 + $0x134] sm:$0xf0] }
 0x233   : > { %2424 = vmatpush.bf16.msra.mxu3 %v4339_v0 }
 0x234   : > { %2439 = vmatpush.bf16.msrb.mxu0 %v4387_v23 }
 0x235   : > { %1964 = vmatpush.bf16.msrb.mxu1 %v4872_v2 }
 0x237   : > { %2425 = vmatpush.bf16.msra.mxu3 %v4331_v13  ;;  %v4347_v13 = vor.u32 %v4918_v9, %v4344_v10 }
 0x238   : > { %2440 = vmatpush.bf16.msrb.mxu0 %v4379_v36  ;;  %v4383_v36 = vor.u32 %v4929_v30, %v4382_v28 }
 0x239   : > { %1965 = vmatpush.bf16.msrb.mxu1 %v4871_v4 }
 0x23b   : > { %2426 = vmatpush.bf16.msra.mxu3 %v4323_v21  ;;  %v4933_v21 = vld [vmem:[#allocation25 + $0x174] sm:$0xf0] }
 0x23c   : > { %2441 = vmatpush.bf16.msrb.mxu0 %v4371_v48  ;;  %v4399_v23 = vor.u32 %v4933_v21, %v4398_v20 }
 0x23d   : > { %1966 = vmatpush.bf16.msrb.mxu1 %v4870_v19 }
 0x23f   : > { %2427 = vmatpush.bf16.msra.mxu3 %v4315_v34 }
 0x240   : > { %2442 = vmatpush.bf16.msrb.mxu0 %v4363_v55  ;;  %v4366_v55 = vld [vmem:[#allocation25 + $0x130] sm:$0xf] }
 0x241   : > { %2398 = vmatpush.bf16.msra.mxu1 %v4399_v23  ;;  %v4367_v41 = vor.u32 %v4925_v56, %v4366_v55  ;;  %v4938_v55 = vld [vmem:[#allocation22 + $0x20] sm:$0xff] }
 0x243   : > { %2428 = vmatpush.bf16.msra.mxu3 %v4307_v24 }
 0x244   : > { %2443 = vmatpush.bf16.msrb.mxu0 %v4355_v62  ;;  %v4350_v62 = vld [vmem:[#allocation25 + $0x110] sm:$0xf] }
 0x245   : > { %2399 = vmatpush.bf16.msra.mxu1 %v4391_v29 }
 0x247   : > { %2429 = vmatpush.bf16.msra.mxu3 %v4299_v43 }
 0x248   : > { %2444 = vmatpush.bf16.msrb.mxu0 %v4347_v13  ;;  %v4919_v13 = vld [vmem:[#allocation25 + $0x104] sm:$0xf0] }
 0x249   : > { %2400 = vmatpush.bf16.msra.mxu1 %v4383_v36 }
 0x24b   : > { %2430 = vmatpush.bf16.msra.mxu3 %v4291_v58  ;;  %v4923_v58 = vld [vmem:[#allocation25 + $0x124] sm:$0xf0] }
 0x24c   : > { %v4359_v59 = vor.u32 %v4923_v58, %v4358_v46  ;;  %v4937_v46 = vld [vmem:[#allocation22 + $0x18] sm:$0xff] }
 0x24d   : > { %2401 = vmatpush.bf16.msra.mxu1 %v4375_v52 }
 0x24f   : > { %2431 = vmatpush.bf16.msra.mxu3 %v4283_v8 }
 0x251   : > { %2402 = vmatpush.bf16.msra.mxu1 %v4367_v41  ;;  %v2126_v41 = vld [vmem:[%s6530_s8] sm:$0x3] }
 0x255   : > { %2403 = vmatpush.bf16.msra.mxu1 %v4359_v59 }
 0x286   : > { %v6290_v37 = vpop.f32.mrf.mxu0 }
 0x28e   : > { %v6294_v57 = vpop.f32.mrf.mxu0 }
 0x295   : > { %v6292_v49 = vpop.f32.mrf.mxu3  ;;  %v1813_v27 = vpop.f32.mrf.mxu2 }
 0x296   : > { %v1814_v14 = vadd.f32 %v1813_v27, %v1519_v11  ;;  %v1841_v15 = vpop.f32.mrf.mxu0  ;;  %v1772_v4 = vadd.f32 %v6292_v49, %v1518_v3 }
 0x298   : > { %v1786_v20 = vadd.f32 %v6290_v37, %v1772_v4 }
 0x29d   : > { %v6301_v0 = vpop.f32.mrf.mxu3  ;;  %v1815_v1 = vpop.f32.mrf.mxu2 }
 0x29e   : > { %v1816_v34 = vadd.f32 %v1815_v1, %v1519_v11  ;;  %v1843_v24 = vpop.f32.mrf.mxu0  ;;  %v4921_v1 = vld [vmem:[#allocation25 + $0x114] sm:$0xf0]  ;;  %v4342_v11 = vld [vmem:[#allocation25 + $0x100] sm:$0xf]  ;;  %v1774_v21 = vadd.f32 %v6301_v0, %v1518_v3 }
 0x29f   : > { %v4351_v9 = vor.u32 %v4921_v1, %v4350_v62  ;;  %v2129_v1 = vperm.slane %v2126_v41, 1 }
 0x2a0   : > { %v1788_v30 = vadd.f32 %v6294_v57, %v1774_v21 }
 0x2a1   : > { %2404 = vmatpush.bf16.msra.mxu1 %v4351_v9  ;;  %v4934_v9 = vld [vmem:[#allocation22] sm:$0xff] }
 0x2a5   : > { %v1827_v16 = vpop.f32.mrf.mxu3  ;;  %v2063_v18 = vpop.f32.mrf.mxu2 }
 0x2a6   : > { %v1828_v17 = vadd.f32 %v1827_v16, %v1814_v14  ;;  %v2064_v22 = vadd.f32 %v5206_v6, %v2063_v18  ;;  %v1799_v14 = vpop.f32.mrf.mxu1 }
 0x2a8   : > { %v1842_v25 = vadd.f32 %v1841_v15, %v1828_v17  ;;  %2071 = vst [vmem:[#allocation3 + $0x8] sm:$0xff] %v2064_v22  ;;  %v2077_v16 = vpack.c.bf16 %v2064_v22, %v2064_v22  ;;  %v4343_v17 = vor.u32 %v4919_v13, %v4342_v11  ;;  %v1800_v22 = vadd.f32 %v1799_v14, %v1786_v20 }
 0x2aa   : > { %v4146_v31 = vmul.f32 -1.442695, %v1842_v25  ;;  %2405 = vmatpush.bf16.msra.mxu1 %v4343_v17 }
 0x2ac   : > { %5221 = vpow2.f32 %v4146_v31  ;;  %v5827_v31 = vmov 0.0|0.0  }
 0x2ad   : > { %v1829_v35 = vpop.f32.mrf.mxu3  ;;  %v2065_v38 = vpop.f32.mrf.mxu2  ;;  %v2560_v28 = vunpack.c.l.b16 %v5827_v31  ;;  %v4594_v31 = vld [vmem:[#allocation25 + $0x278] sm:$0xf0] }
 0x2ae   : > { %v1830_v39 = vadd.f32 %v1829_v35, %v1816_v34 }
 0x2af   : > { %v2072_v48 = vld [vmem:[#allocation3 + $0x6] sm:$0xff]  ;;  %v6312_v35 = vpack.c.b16 %v2560_v28, %v2560_v28 }
 0x2b0   : > { %v1844_v47 = vadd.f32 %v1843_v24, %v1830_v39  ;;  %v2073_v27 = vld [vmem:[#allocation3 + $0x7] sm:$0xff]  ;;  %v2075_v50 = vpack.c.bf16 %v2072_v48, %v2072_v48  ;;  %v1801_v39 = vpop.f32.mrf.mxu1 }
 0x2b1   : > { %v2076_v51 = vpack.c.bf16 %v2073_v27, %v2073_v27  ;;  %2565 = vmatpush.bf16.xpose.msrb.mxu2 %v6312_v35  ;;  %v1802_v40 = vadd.f32 %v1801_v39, %v1788_v30 }
 0x2b2   : > { %v5222_v43 = vpop.eup %5221  ;;  %v4147_v53 = vmul.f32 -1.442695, %v1844_v47  ;;  %2380 = vmatmul.bf16.vlgmr.msrb.gmra.mxu3 %v2075_v50  ;;  %2419 = vmatmul.bf16.vlgmr.msra.gmra.mxu2 %v2075_v50 }
 0x2b3   : > { %v1852_v54 = vadd.f32 1.0, %v5222_v43  ;;  %2393 = vmatmul.bf16.vlgmr.msra.gmra.mxu0 %v2076_v51  ;;  %2609 = vmatpush.bf16.msrb.mxu3 %v6312_v35  ;;  %v4939_v43 = vld [vmem:[#allocation22 + $0x28] sm:$0xff] }
 0x2b4   : > { %5223 = vpow2.f32 %v4147_v53 }
 0x2b5   : > { %5225 = vrcp.f32 %v1852_v54  ;;  %v1865_v15 = vand.u32 2147483648, %v1852_v54  ;;  %vm1859_vm12 = vweird.f32 %v1852_v54  ;;  %v1863_v63 = vand.u32 2147483647, %v1852_v54 }
 0x2b7   : > { %v1866_v25 = vor.u32 1.1754944e-38, %v1865_v15  ;;  %vm1864_vm14 = vcmp.eq.f32.partialorder %v1863_v63, 8.507059e+37  ;;  %2610 = vmatpush.bf16.msrb.mxu3 %v6312_v35  ;;  %v2128_v63 = vperm.slane %v2126_v41, 0 }
 0x2b9   : > { %2566 = vmatpush.bf16.xpose.msrb.mxu2 %v6312_v35 }
 0x2ba   : > { %v5224_v7 = vpop.eup %5223 }
 0x2bb   : > { %v5226_v2 = vpop.eup %5225  ;;  %v1853_v5 = vadd.f32 1.0, %v5224_v7  ;;  %2611 = vmatpush.bf16.msrb.mxu3 %v6312_v35  ;;  %v4936_v7 = vld [vmem:[#allocation22 + $0x10] sm:$0xff] }
 0x2bc   : > { %v1855_v8 = vmul.f32 %v5226_v2, %v1852_v54  ;;  %vm1860_vm11 = vweird.f32 %v5226_v2 }
 0x2bd   : > { %5227 = vrcp.f32 %v1853_v5  ;;  %vm1861_vm13 = vmor %vm1859_vm12, %vm1860_vm11  ;;  %v1880_v45 = vand.u32 2147483648, %v1853_v5  ;;  %v1878_v37 = vand.u32 2147483647, %v1853_v5  ;;  %vm1874_vm0 = vweird.f32 %v1853_v5 }
 0x2be   : > { %v1856_v10 = vsub.f32 1.0, %v1855_v8 }
 0x2bf   : > { %v1881_v38 = vor.u32 1.1754944e-38, %v1880_v45  ;;  %vm1879_vm2 = vcmp.eq.f32.partialorder %v1878_v37, 8.507059e+37  ;;  %2612 = vmatpush.bf16.msrb.mxu3 %v6312_v35 }
 0x2c0   : > { %v1857_v6 = vmul.f32 %v5226_v2, %v1856_v10 }
 0x2c1   : > { %2567 = vmatpush.bf16.xpose.msrb.mxu2 %v6312_v35 }
 0x2c2   : > { %v1858_v18 = vadd.f32 %v5226_v2, %v1857_v6  ;;  %2432 = vmatmul.bf16.vlgmr.msra.gmra.mxu3 %v2076_v51  ;;  %v5207_v6 = vld [vmem:[#allocation16] ss:$0 sm:$0xff] }
 0x2c3   : > { %v5228_v19 = vpop.eup %5227  ;;  %2445 = vmatmul.bf16.vlgmr.msrb.gmra.mxu0 %v2077_v16  ;;  %2613 = vmatpush.bf16.msrb.mxu3 %v6312_v35 }
 0x2c4   : > { %v1870_v23 = vmul.f32 %v5228_v19, %v1853_v5  ;;  %v1862_v49 = vsel %vm1861_vm13, %v5226_v2, %v1858_v18  ;;  %vm1875_vm15 = vweird.f32 %v5228_v19  ;;  %v4935_v2 = vld [vmem:[#allocation22 + $0x8] sm:$0xff] }
 0x2c5   : > { %v1867_v29 = vsel %vm1864_vm14, %v1866_v25, %v1862_v49  ;;  %vm1876_vm1 = vmor %vm1874_vm0, %vm1875_vm15 }
 0x2c6   : > { %v1871_v26 = vsub.f32 1.0, %v1870_v23  ;;  %v1884_v36 = vmul.f32 %v1867_v29, %v1800_v22  ;;  %v4980_v29 = vld [vmem:[#allocation25 + $0x274] sm:$0xf] }
 0x2c7   : > { %2614 = vmatpush.bf16.msrb.mxu3 %v6312_v35 }
 0x2c8   : > { %v1872_v34 = vmul.f32 %v5228_v19, %v1871_v26  ;;  %v1886_v47 = vadd.f32 %v1884_v36, %v6268_v33  ;;  %v4941_v33 = vld [vmem:[#allocation22 + $0x38] sm:$0xff] }
 0x2c9   : > { %2568 = vmatpush.bf16.xpose.msrb.mxu2 %v6312_v35 }
 0x2ca   : > { %v1873_v0 = vadd.f32 %v5228_v19, %v1872_v34  ;;  %v1888_v27 = vmul.f32 0.70710677, %v1886_v47  ;;  %v4586_v47 = vld [vmem:[#allocation25 + $0x268] sm:$0xf0] }
 0x2cb   : > { %2615 = vmatpush.bf16.msrb.mxu3 %v6312_v35 }
 0x2cc   : > { %v1877_v42 = vsel %vm1876_vm1, %v5228_v19, %v1873_v0 }
 0x2cd   : > { %v1882_v24 = vsel %vm1879_vm2, %v1881_v38, %v1877_v42  ;;  %v4597_v38 = vor.u32 %v4980_v29, %v4594_v31  ;;  %v4949_v31 = vld [vmem:[#allocation24 + $0x38] sm:$0xff] }
 0x2ce   : > { %v1885_v57 = vmul.f32 %v1882_v24, %v1802_v40  ;;  %2691 = vmatpush.bf16.msra.mxu0 %v4949_v31  ;;  %v4488_v31 = vld [vmem:[#allocation25 + $0x1a0] sm:$0xf] }
 0x2d0   : > { %v1887_v48 = vadd.f32 %v1885_v57, %v6273_v44  ;;  %v4940_v44 = vld [vmem:[#allocation22 + $0x30] sm:$0xff]  ;;  %v4978_v57 = vld [vmem:[#allocation25 + $0x264] sm:$0xf] }
 0x2d1   : > { %2569 = vmatpush.bf16.xpose.msrb.mxu2 %v6312_v35 }
 0x2d2   : > { %v1889_v50 = vmul.f32 0.70710677, %v1887_v48 }
 0x2d4   : > { %v1890_v51 = vpack.c.bf16 %v1889_v50, %v1888_v27 }
 0x2d6   : > { %1967 = vmatmul.bf16.vlgmr.msrb.gmra.mxu1 %v1890_v51 }
 0x2d7   : > { %2539 = vmatpush.bf16.msrb.mxu1 %v4941_v33 }
 0x2d9   : > { %2570 = vmatpush.bf16.xpose.msrb.mxu2 %v6312_v35 }
 0x2db   : > { %2540 = vmatpush.bf16.msrb.mxu1 %v4940_v44 }
 0x2df   : > { %2541 = vmatpush.bf16.msrb.mxu1 %v4939_v43  ;;  %v4589_v43 = vor.u32 %v4978_v57, %v4586_v47  ;;  %v4943_v57 = vld [vmem:[#allocation24 + $0x8] sm:$0xff] }
 0x2e1   : > { %2571 = vmatpush.bf16.xpose.msrb.mxu2 %v6312_v35 }
 0x2e3   : > { %2542 = vmatpush.bf16.msrb.mxu1 %v4938_v55  ;;  %v4578_v55 = vld [vmem:[#allocation25 + $0x258] sm:$0xf0] }
 0x2e6   : > { %2406 = vmatmul.bf16.vlgmr.msra.gmra.mxu1 %v2077_v16 }
 0x2e7   : > { %2543 = vmatpush.bf16.msrb.mxu1 %v4937_v46 }
 0x2eb   : > { %2544 = vmatpush.bf16.msrb.mxu1 %v4936_v7 }
 0x2ef   : > { %2545 = vmatpush.bf16.msrb.mxu1 %v4935_v2  ;;  %v4562_v2 = vld [vmem:[#allocation25 + $0x238] sm:$0xf0] }
 0x2f3   : > { %2546 = vmatpush.bf16.msrb.mxu1 %v4934_v9 }
 0x330   : > { %v2394_v52 = vpop.f32.mrf.mxu0 }
 0x335   : > { %v2381_v53 = vpop.f32.mrf.mxu3  ;;  %v2420_v54 = vpop.f32.mrf.mxu2 }
 0x336   : > { %v2421_v3 = vadd.f32 %v2420_v54, %v2129_v1  ;;  %v2382_v26 = vadd.f32 %v2381_v53, %v2128_v63  ;;  %v4976_v54 = vld [vmem:[#allocation25 + $0x254] sm:$0xf] }
 0x337   : > { %v4581_v41 = vor.u32 %v4976_v54, %v4578_v55  ;;  %v4972_v1 = vld [vmem:[#allocation25 + $0x234] sm:$0xf]  ;;  %v4963_v54 = vld [vmem:[#allocation25 + $0x1e4] sm:$0xf0]  ;;  %v4592_v55 = vld [vmem:[#allocation25 + $0x270] sm:$0xf] }
 0x338   : > { %v2396_v56 = vpop.f32.mrf.mxu0  ;;  %v2395_v42 = vadd.f32 %v2394_v52, %v2382_v26 }
 0x33d   : > { %v2383_v58 = vpop.f32.mrf.mxu3  ;;  %v2422_v59 = vpop.f32.mrf.mxu2 }
 0x33e   : > { %v4974_v58 = vld [vmem:[#allocation25 + $0x244] sm:$0xf]  ;;  %v4570_v59 = vld [vmem:[#allocation25 + $0x248] sm:$0xf0] }
 0x340   : > { %v2446_v62 = vpop.f32.mrf.mxu0 }
 0x345   : > { %v2433_v5 = vpop.f32.mrf.mxu3 }
 0x346   : > { %v2434_v8 = vadd.f32 %v2433_v5, %v2421_v3  ;;  %v4565_v3 = vor.u32 %v4972_v1, %v4562_v2  ;;  %v4970_v5 = vld [vmem:[#allocation25 + $0x224] sm:$0xf]  ;;  %v4979_v1 = vld [vmem:[#allocation25 + $0x264] sm:$0xf0] }
 0x348   : > { %v2448_v10 = vpop.f32.mrf.mxu0  ;;  %v2447_v11 = vadd.f32 %v2446_v62, %v2434_v8  ;;  %v4573_v62 = vor.u32 %v4974_v58, %v4570_v59  ;;  %v4554_v8 = vld [vmem:[#allocation25 + $0x228] sm:$0xf0]  ;;  %v4981_v58 = vld [vmem:[#allocation25 + $0x274] sm:$0xf0] }
 0x349   : > { %v4557_v9 = vor.u32 %v4970_v5, %v4554_v8  ;;  %v4968_v10 = vld [vmem:[#allocation25 + $0x214] sm:$0xf]  ;;  %v4961_v59 = vld [vmem:[#allocation25 + $0x1d4] sm:$0xf0] }
 0x34a   : > { %v4404_v13 = vmul.f32 -1.442695, %v2447_v11  ;;  %v4546_v11 = vld [vmem:[#allocation25 + $0x218] sm:$0xf0]  ;;  %v4977_v8 = vld [vmem:[#allocation25 + $0x254] sm:$0xf0] }
 0x34c   : > { %5229 = vpow2.f32 %v4404_v13  ;;  %v4549_v13 = vor.u32 %v4968_v10, %v4546_v11  ;;  %v4997_v10 = vld [vmem:[#allocation25 + $0x2f4] sm:$0xf0]  ;;  %v4504_v11 = vld [vmem:[#allocation25 + $0x1c0] sm:$0xf] }
 0x34d   : > { %v2435_v4 = vpop.f32.mrf.mxu3 }
 0x34e   : > { %v4966_v4 = vld [vmem:[#allocation25 + $0x204] sm:$0xf] }
 0x352   : > { %v5230_v14 = vpop.eup %5229 }
 0x353   : > { %v1968_v15 = vpop.f32.mrf.mxu1  ;;  %v2453_v16 = vadd.f32 1.0, %v5230_v14 }
 0x354   : > { %v1969_v17 = vadd.f32 %v5207_v6, %v1968_v15  ;;  %v5208_v15 = vld [vmem:[%s6531_s24] ss:$0 sm:$0xff] }
 0x355   : > { %5231 = vrcp.f32 %v2453_v16  ;;  %v2465_v30 = vand.u32 2147483648, %v2453_v16  ;;  %v2463_v39 = vand.u32 2147483647, %v2453_v16  ;;  %vm2459_vm4 = vweird.f32 %v2453_v16 }
 0x356   : > { %v1973_v18 = vadd.f32 %v1969_v17, %v6199_v60  ;;  %v1977_v23 = vpack.c.bf16 %v1969_v17, %v1969_v17 }
 0x357   : > { %v2466_v33 = vor.u32 1.1754944e-38, %v2465_v30  ;;  %vm2464_vm6 = vcmp.eq.f32.partialorder %v2463_v39, 8.507059e+37 }
 0x358   : > { %v1975_v21 = vmul.f32 0.70710677, %v1973_v18  ;;  %v2558_v37 = vunpack.c.l.b16 %v1977_v23 }
 0x35a   : > { %v1980_v34 = vpack.c.bf16 %v1975_v21, %v1975_v21  ;;  %v6354_v21 = vand.u32 127, %v1013_v32  ;;  %v4947_v32 = vld [vmem:[#allocation24 + $0x28] sm:$0xff] }
 0x35b   : > { %v1970_v19 = vpop.f32.mrf.mxu1  ;;  %v5232_v20 = vpop.eup %5231 }
 0x35c   : > { %v1971_v49 = vadd.f32 %v5207_v6, %v1970_v19  ;;  %v2455_v25 = vmul.f32 %v5232_v20, %v2453_v16  ;;  %vm2460_vm3 = vweird.f32 %v5232_v20  ;;  %v2605_v27 = vunpack.c.l.b16 %v1980_v34  ;;  %v4538_v6 = vld [vmem:[#allocation25 + $0x208] sm:$0xf0]  ;;  %v4946_v34 = vld [vmem:[#allocation24 + $0x20] sm:$0xff] }
 0x35d   : > { %vm2461_vm5 = vmor %vm2459_vm4, %vm2460_vm3  ;;  %v4541_v14 = vor.u32 %v4966_v4, %v4538_v6  ;;  %vm2070_vm7 = vcmp.lt.s32.totalorder %v6354_v21, 10  ;;  %v5009_v21 = vld [vmem:[#allocation24 + $0x18] sm:$0xff] }
 0x35e   : > { %v1974_v22 = vadd.f32 %v1971_v49, %v6201_v61  ;;  %v1978_v45 = vpack.c.bf16 %v1971_v49, %v1971_v49  ;;  %v2456_v28 = vsub.f32 1.0, %v2455_v25 }
 0x360   : > { %v1976_v0 = vmul.f32 0.70710677, %v1974_v22  ;;  %v2559_v36 = vunpack.c.l.b16 %v1978_v45  ;;  %v2457_v60 = vmul.f32 %v5232_v20, %v2456_v28  ;;  %v4948_v28 = vld [vmem:[#allocation24 + $0x30] sm:$0xff] }
 0x361   : > { %2692 = vmatpush.bf16.msra.mxu0 %v4948_v28  ;;  %v4955_v28 = vld [vmem:[#allocation25 + $0x1a4] sm:$0xf0] }
 0x362   : > { %v1981_v40 = vpack.c.bf16 %v1976_v0, %v1976_v0  ;;  %v6335_v24 = vpack.c.b16 %v2559_v36, %v2558_v37  ;;  %v2458_v48 = vadd.f32 %v5232_v20, %v2457_v60  ;;  %v4945_v37 = vld [vmem:[#allocation24 + $0x18] sm:$0xff]  ;;  %v4944_v60 = vld [vmem:[#allocation24 + $0x10] sm:$0xff] }
 0x363   : > { %v2407_v61 = vpop.f32.mrf.mxu1 }
 0x364   : > { %v2606_v50 = vunpack.c.l.b16 %v1981_v40  ;;  %v2408_v51 = vadd.f32 %v2407_v61, %v2395_v42  ;;  %2572 = vmatpush.bf16.xpose.msrb.mxu2 %v6335_v24  ;;  %v2462_v44 = vsel %vm2461_vm5, %v5232_v20, %v2458_v48 }
 0x365   : > { %v2467_v53 = vsel %vm2464_vm6, %v2466_v33, %v2462_v44  ;;  %2693 = vmatpush.bf16.msra.mxu0 %v4947_v32  ;;  %v4942_v33 = vld [vmem:[#allocation24] sm:$0xff]  ;;  %v4528_v44 = vld [vmem:[#allocation25 + $0x1f0] sm:$0xf] }
 0x366   : > { %v2607_v52 = vpack.c.b16 %v2606_v50, %v2605_v27  ;;  %v6338_v56 = vmul.f32 %v2467_v53, %v2408_v51  ;;  %v4520_v53 = vld [vmem:[#allocation25 + $0x1e0] sm:$0xf] }
 0x368   : > { %2616 = vmatpush.bf16.msrb.mxu3 %v2607_v52  ;;  %v2470_v46 = vpack.c.bf16 %v6338_v56, %v6338_v56 }
 0x369   : > { %2694 = vmatpush.bf16.msra.mxu0 %v4946_v34  ;;  %v4552_v34 = vld [vmem:[#allocation25 + $0x220] sm:$0xf] }
 0x36a   : > { %2547 = vmatmul.bf16.vlgmr.msrb.gmra.mxu1 %v2470_v46  ;;  %v4521_v46 = vor.u32 %v4963_v54, %v4520_v53  ;;  %v4991_v53 = vld [vmem:[#allocation25 + $0x2c4] sm:$0xf0]  ;;  %v4624_v54 = vld [vmem:[#allocation25 + $0x2b0] sm:$0xf] }
 0x36b   : > { %v2409_v7 = vpop.f32.mrf.mxu1 }
 0x36c   : > { %3063 = vmatpush.bf16.msra.mxu2 %v4597_v38  ;;  %v4593_v7 = vor.u32 %v4981_v58, %v4592_v55  ;;  %v4989_v55 = vld [vmem:[#allocation25 + $0x2b4] sm:$0xf0]  ;;  %v4514_v58 = vld [vmem:[#allocation25 + $0x1d8] sm:$0xf0] }
 0x36d   : > { %2695 = vmatpush.bf16.msra.mxu0 %v4945_v37  ;;  %v4971_v37 = vld [vmem:[#allocation25 + $0x224] sm:$0xf0] }
 0x36e   : > { %3024 = vmatpush.bf16.msra.mxu3 %v4593_v7  ;;  %v4544_v7 = vld [vmem:[#allocation25 + $0x210] sm:$0xf] }
 0x370   : > { %3064 = vmatpush.bf16.msra.mxu2 %v4589_v43  ;;  %v4965_v43 = vld [vmem:[#allocation25 + $0x1f4] sm:$0xf0] }
 0x371   : > { %2696 = vmatpush.bf16.msra.mxu0 %v4944_v60  ;;  %v4553_v60 = vor.u32 %v4971_v37, %v4552_v34  ;;  %v4952_v34 = vld [vmem:[#allocation25 + $0x194] sm:$0xf] }
 0x374   : > { %3065 = vmatpush.bf16.msra.mxu2 %v4581_v41  ;;  %v4512_v41 = vld [vmem:[#allocation25 + $0x1d0] sm:$0xf] }
 0x375   : > { %2697 = vmatpush.bf16.msra.mxu0 %v4943_v57  ;;  %v4513_v5 = vor.u32 %v4961_v59, %v4512_v41  ;;  %v4960_v41 = vld [vmem:[#allocation25 + $0x1d4] sm:$0xf] }
 0x376   : > { %v4517_v59 = vor.u32 %v4960_v41, %v4514_v58 }
 0x378   : > { %3066 = vmatpush.bf16.msra.mxu2 %v4573_v62  ;;  %v4584_v62 = vld [vmem:[#allocation25 + $0x260] sm:$0xf] }
 0x379   : > { %2698 = vmatpush.bf16.msra.mxu0 %v4942_v33  ;;  %v4585_v2 = vor.u32 %v4979_v1, %v4584_v62  ;;  %v4969_v62 = vld [vmem:[#allocation25 + $0x214] sm:$0xf0] }
 0x37a   : > { %v4545_v1 = vor.u32 %v4969_v62, %v4544_v7 }
 0x37b   : > { %3025 = vmatpush.bf16.msra.mxu3 %v4585_v2  ;;  %v4616_v2 = vld [vmem:[#allocation25 + $0x2a0] sm:$0xf] }
 0x37c   : > { %3067 = vmatpush.bf16.msra.mxu2 %v4565_v3  ;;  %v4576_v3 = vld [vmem:[#allocation25 + $0x250] sm:$0xf] }
 0x37d   : > { %v4577_v6 = vor.u32 %v4977_v8, %v4576_v3  ;;  %v4987_v3 = vld [vmem:[#allocation25 + $0x2a4] sm:$0xf0]  ;;  %v4958_v8 = vld [vmem:[#allocation25 + $0x1c4] sm:$0xf] }
 0x37f   : > { %3026 = vmatpush.bf16.msra.mxu3 %v4577_v6  ;;  %v4996_v6 = vld [vmem:[#allocation25 + $0x2f4] sm:$0xf] }
 0x380   : > { %3068 = vmatpush.bf16.msra.mxu2 %v4557_v9  ;;  %v4656_v9 = vld [vmem:[#allocation25 + $0x2f0] sm:$0xf] }
 0x381   : > { %v4657_v4 = vor.u32 %v4997_v10, %v4656_v9  ;;  %v4506_v9 = vld [vmem:[#allocation25 + $0x1c8] sm:$0xf0] }
 0x382   : > { %v4509_v10 = vor.u32 %v4958_v8, %v4506_v9 }
 0x383   : > { %3037 = vmatpush.bf16.msrb.mxu0 %v4657_v4 }
 0x384   : > { %3069 = vmatpush.bf16.msra.mxu2 %v4549_v13  ;;  %v4959_v13 = vld [vmem:[#allocation25 + $0x1c4] sm:$0xf0] }
 0x388   : > { %3070 = vmatpush.bf16.msra.mxu2 %v4541_v14  ;;  %v4648_v14 = vld [vmem:[#allocation25 + $0x2e0] sm:$0xf] }
 0x3e7   : > { %v2548_v16 = vpop.f32.mrf.mxu1 }
 0x3e8   : > { %v2549_v17 = vadd.f32 %v5208_v15, %v2548_v16  ;;  %v4995_v15 = vld [vmem:[#allocation25 + $0x2e4] sm:$0xf0]  ;;  %v4505_v16 = vor.u32 %v4959_v13, %v4504_v11  ;;  %v4536_v11 = vld [vmem:[#allocation25 + $0x200] sm:$0xf] }
 0x3e9   : > { %v4967_v13 = vld [vmem:[#allocation25 + $0x204] sm:$0xf0] }
 0x3ea   : > { %v2552_v18 = vadd.f32 %v2549_v17, %v6284_v12  ;;  %v4496_v17 = vld [vmem:[#allocation25 + $0x1b0] sm:$0xf]  ;;  %v4537_v4 = vor.u32 %v4967_v13, %v4536_v11 }
 0x3eb   : > { %v5004_v11 = vld [vmem:[#allocation22 + $0x30] sm:$0xff] }
 0x3ec   : > { %v2553_v63 = vmul.f32 0.70710677, %v2552_v18  ;;  %v4568_v18 = vld [vmem:[#allocation25 + $0x240] sm:$0xf] }
 0x3ee   : > { %v2554_v19 = vpack.c.bf16 %v2553_v63, %v2553_v63  ;;  %v4975_v63 = vld [vmem:[#allocation25 + $0x244] sm:$0xf0] }
 0x3ef   : > { %v2550_v20 = vpop.f32.mrf.mxu1 }
 0x3f0   : > { %2573 = vmatmul.bf16.vlgmr.msrb.gmra.mxu2 %v2554_v19  ;;  %v4649_v19 = vor.u32 %v4995_v15, %v4648_v14  ;;  %v4957_v20 = vld [vmem:[#allocation25 + $0x1b4] sm:$0xf0]  ;;  %v4658_v14 = vld [vmem:[#allocation25 + $0x2f8] sm:$0xf0]  ;;  %v4608_v15 = vld [vmem:[#allocation25 + $0x290] sm:$0xf] }
 0x3f1   : > { %3232 = vmatpush.bf16.msrb.mxu2 %v6312_v35 }
 0x3f2   : > { %3038 = vmatpush.bf16.msrb.mxu0 %v4649_v19 }
 0x3f5   : > { %3233 = vmatpush.bf16.msrb.mxu2 %v6312_v35 }
 0x3f9   : > { %3234 = vmatpush.bf16.msrb.mxu2 %v6312_v35 }
 0x3fd   : > { %3235 = vmatpush.bf16.msrb.mxu2 %v6312_v35 }
 0x401   : > { %3236 = vmatpush.bf16.msrb.mxu2 %v6312_v35 }
 0x405   : > { %3237 = vmatpush.bf16.msrb.mxu2 %v6312_v35 }
 0x409   : > { %3238 = vmatpush.bf16.msrb.mxu2 %v6312_v35 }
 0x40d   : > { %3239 = vmatpush.bf16.msrb.mxu2 %v2607_v52  ;;  %v4529_v52 = vor.u32 %v4965_v43, %v4528_v44  ;;  %v4632_v43 = vld [vmem:[#allocation25 + $0x2c0] sm:$0xf] }
 0x40f   : > { %3011 = vmatpush.bf16.msra.mxu1 %v4529_v52  ;;  %v4633_v52 = vor.u32 %v4991_v53, %v4632_v43  ;;  %v5209_v43 = vld [vmem:[%s6532_s5] ss:$0 sm:$0xff] }
 0x413   : > { %3012 = vmatpush.bf16.msra.mxu1 %v4521_v46  ;;  %v4625_v46 = vor.u32 %v4989_v55, %v4624_v54  ;;  %v4602_v54 = vld [vmem:[#allocation25 + $0x288] sm:$0xf0] }
 0x417   : > { %3013 = vmatpush.bf16.msra.mxu1 %v4513_v5  ;;  %v4617_v5 = vor.u32 %v4987_v3, %v4616_v2 }
 0x41b   : > { %3014 = vmatpush.bf16.msra.mxu1 %v4505_v16  ;;  %v4661_v16 = vor.u32 %v4996_v6, %v4658_v14  ;;  %v5003_v6 = vld [vmem:[#allocation22 + $0x28] sm:$0xff]  ;;  %v5002_v14 = vld [vmem:[#allocation22 + $0x20] sm:$0xff] }
 0x473   : > { %v2574_v23 = vpop.f32.mrf.mxu2 }
 0x474   : > { %v2578_v49 = vsel %vm2070_vm7, %v2574_v23, -1e+30  ;;  %v4640_v23 = vld [vmem:[#allocation25 + $0x2d0] sm:$0xf] }
 0x475   : > { %2579 = vmax.xlane.f32.xlu0 %v2578_v49 }
 0x47b   : > { %v2576_v25 = vpop.f32.mrf.mxu2 }
 0x47c   : > { %v4569_v25 = vor.u32 %v4975_v63, %v4568_v18  ;;  %v4956_v18 = vld [vmem:[#allocation25 + $0x1b4] sm:$0xf]  ;;  %v4498_v63 = vld [vmem:[#allocation25 + $0x1b8] sm:$0xf0] }
 0x47e   : > { %3027 = vmatpush.bf16.msra.mxu3 %v4569_v25  ;;  %v4600_v25 = vld [vmem:[#allocation25 + $0x280] sm:$0xf] }
 0x4e8   : > { %v2580_v26 = vpop.xlane.xlu0 %2579 }
 0x4e9   : > { %v2581_v22 = vsub.f32 %v2578_v49, %v2580_v26  ;;  %v4993_v49 = vld [vmem:[#allocation25 + $0x2d4] sm:$0xf0] }
 0x4ea   : > { %v4641_v26 = vor.u32 %v4993_v49, %v4640_v23  ;;  %v4994_v23 = vld [vmem:[#allocation25 + $0x2e4] sm:$0xf]  ;;  %v4650_v49 = vld [vmem:[#allocation25 + $0x2e8] sm:$0xf0] }
 0x4eb   : > { %v2582_v45 = vmul.f32 1.442695, %v2581_v22  ;;  %v4497_v22 = vor.u32 %v4957_v20, %v4496_v17  ;;  %v4985_v17 = vld [vmem:[#allocation25 + $0x294] sm:$0xf0]  ;;  %v4501_v20 = vor.u32 %v4956_v18, %v4498_v63  ;;  %v5000_v63 = vld [vmem:[#allocation22 + $0x10] sm:$0xff] }
 0x4ec   : > { %3039 = vmatpush.bf16.msrb.mxu0 %v4641_v26  ;;  %v4609_v19 = vor.u32 %v4985_v17, %v4608_v15  ;;  %v4653_v26 = vor.u32 %v4994_v23, %v4650_v49  ;;  %v5001_v18 = vld [vmem:[#allocation22 + $0x18] sm:$0xff]  ;;  %v4999_v23 = vld [vmem:[#allocation22 + $0x8] sm:$0xff] }
 0x4ed   : > { %5233 = vpow2.f32 %v2582_v45  ;;  %v4560_v45 = vld [vmem:[#allocation25 + $0x230] sm:$0xf]  ;;  %3015 = vmatpush.bf16.msra.mxu1 %v4497_v22  ;;  %v4983_v22 = vld [vmem:[#allocation25 + $0x284] sm:$0xf0] }
 0x4f0   : > { %3040 = vmatpush.bf16.msrb.mxu0 %v4633_v52  ;;  %v4982_v52 = vld [vmem:[#allocation25 + $0x284] sm:$0xf] }
 0x4f1   : > { %v4605_v55 = vor.u32 %v4982_v52, %v4602_v54 }
 0x4f3   : > { %v5234_v29 = vpop.eup %5233 }
 0x4f4   : > { %2584 = vadd.xlane.f32.xlu0 %v5234_v29  ;;  %3041 = vmatpush.bf16.msrb.mxu0 %v4625_v46 }
 0x4f8   : > { %3042 = vmatpush.bf16.msrb.mxu0 %v4617_v5 }
 0x4fc   : > { %3043 = vmatpush.bf16.msrb.mxu0 %v4609_v19 }
 0x567   : > { %v2585_v30 = vpop.xlane.xlu0 %2584 }
 0x568   : > { %5235 = vrcp.f32 %v2585_v30  ;;  %v2597_v38 = vand.u32 2147483648, %v2585_v30  ;;  %v2595_v42 = vand.u32 2147483647, %v2585_v30  ;;  %vm2591_vm9 = vweird.f32 %v2585_v30 }
 0x56a   : > { %v2598_v61 = vor.u32 1.1754944e-38, %v2597_v38  ;;  %vm2596_vm11 = vcmp.eq.f32.partialorder %v2595_v42, 8.507059e+37  ;;  %v4951_v42 = vld [vmem:[#allocation25 + $0x184] sm:$0xf0] }
 0x56e   : > { %v5236_v0 = vpop.eup %5235 }
 0x56f   : > { %v2587_v36 = vmul.f32 %v5236_v0, %v2585_v30  ;;  %vm2592_vm8 = vweird.f32 %v5236_v0  ;;  %v4489_v30 = vor.u32 %v4955_v28, %v4488_v31  ;;  %v4601_v31 = vor.u32 %v4983_v22, %v4600_v25 }
 0x570   : > { %vm2593_vm10 = vmor %vm2591_vm9, %vm2592_vm8 }
 0x571   : > { %v2588_v39 = vsub.f32 1.0, %v2587_v36  ;;  %v4953_v36 = vld [vmem:[#allocation25 + $0x194] sm:$0xf0]  ;;  %3016 = vmatpush.bf16.msra.mxu1 %v4489_v30  ;;  %v4642_v30 = vld [vmem:[#allocation25 + $0x2d8] sm:$0xf0]  ;;  %3044 = vmatpush.bf16.msrb.mxu0 %v4601_v31 }
 0x573   : > { %v2589_v40 = vmul.f32 %v5236_v0, %v2588_v39 }
 0x575   : > { %v2590_v47 = vadd.f32 %v5236_v0, %v2589_v40  ;;  %v4472_v40 = vld [vmem:[#allocation25 + $0x180] sm:$0xf] }
 0x577   : > { %v2594_v48 = vsel %vm2593_vm10, %v5236_v0, %v2590_v47  ;;  %v4480_v0 = vld [vmem:[#allocation25 + $0x190] sm:$0xf]  ;;  %v4964_v47 = vld [vmem:[#allocation25 + $0x1f4] sm:$0xf] }
 0x578   : > { %v2599_v27 = vsel %vm2596_vm11, %v2598_v61, %v2594_v48  ;;  %v4481_v39 = vor.u32 %v4953_v36, %v4480_v0  ;;  %v4530_v61 = vld [vmem:[#allocation25 + $0x1f8] sm:$0xf0]  ;;  %v4473_v48 = vor.u32 %v4951_v42, %v4472_v40  ;;  %v4990_v36 = vld [vmem:[#allocation25 + $0x2c4] sm:$0xf]  ;;  %v4474_v40 = vld [vmem:[#allocation25 + $0x188] sm:$0xf0] }
 0x579   : > { %v2601_v50 = vmul.f32 %v5234_v29, %v2599_v27  ;;  %v4973_v29 = vld [vmem:[#allocation25 + $0x234] sm:$0xf0]  ;;  %v4533_v27 = vor.u32 %v4964_v47, %v4530_v61  ;;  %v4482_v0 = vld [vmem:[#allocation25 + $0x198] sm:$0xf0]  ;;  %v4988_v47 = vld [vmem:[#allocation25 + $0x2b4] sm:$0xf] }
 0x57a   : > { %v4561_v32 = vor.u32 %v4973_v29, %v4560_v45  ;;  %3017 = vmatpush.bf16.msra.mxu1 %v4481_v39  ;;  %v4954_v45 = vld [vmem:[#allocation25 + $0x1a4] sm:$0xf]  ;;  %v4490_v29 = vld [vmem:[#allocation25 + $0x1a8] sm:$0xf0]  ;;  %v4485_v39 = vor.u32 %v4952_v34, %v4482_v0  ;;  %v4626_v61 = vld [vmem:[#allocation25 + $0x2b8] sm:$0xf0] }
 0x57b   : > { %v2602_v51 = vpack.c.bf16 %v2601_v50, %v2601_v50  ;;  %v4962_v50 = vld [vmem:[#allocation25 + $0x1e4] sm:$0xf]  ;;  %v4493_v28 = vor.u32 %v4954_v45, %v4490_v29 }
 0x57c   : > { %3028 = vmatpush.bf16.msra.mxu3 %v4561_v32  ;;  %v4992_v32 = vld [vmem:[#allocation25 + $0x2d4] sm:$0xf] }
 0x57d   : > { %2617 = vmatmul.bf16.vlgmr.msrb.gmra.mxu3 %v2602_v51  ;;  %v4522_v51 = vld [vmem:[#allocation25 + $0x1e8] sm:$0xf0]  ;;  %v4645_v37 = vor.u32 %v4992_v32, %v4642_v30 }
 0x57e   : > { %3018 = vmatpush.bf16.msra.mxu1 %v4473_v48  ;;  %v4525_v44 = vor.u32 %v4962_v50, %v4522_v51  ;;  %v4629_v48 = vor.u32 %v4988_v47, %v4626_v61  ;;  %v4618_v50 = vld [vmem:[#allocation25 + $0x2a8] sm:$0xf0] }
 0x580   : > { %3029 = vmatpush.bf16.msra.mxu3 %v4553_v60  ;;  %v4634_v60 = vld [vmem:[#allocation25 + $0x2c8] sm:$0xf0] }
 0x581   : > { %v4637_v42 = vor.u32 %v4990_v36, %v4634_v60 }
 0x582   : > { %3050 = vmatpush.bf16.msrb.mxu1 %v4533_v27  ;;  %v4986_v27 = vld [vmem:[#allocation25 + $0x2a4] sm:$0xf] }
 0x583   : > { %v4621_v51 = vor.u32 %v4986_v27, %v4618_v50 }
 0x584   : > { %3030 = vmatpush.bf16.msra.mxu3 %v4545_v1 }
 0x586   : > { %3051 = vmatpush.bf16.msrb.mxu1 %v4525_v44  ;;  %v4610_v44 = vld [vmem:[#allocation25 + $0x298] sm:$0xf0] }
 0x588   : > { %3031 = vmatpush.bf16.msra.mxu3 %v4537_v4 }
 0x58a   : > { %3052 = vmatpush.bf16.msrb.mxu1 %v4517_v59 }
 0x58c   : > { %3076 = vmatpush.bf16.msrb.mxu3 %v4661_v16 }
 0x58e   : > { %3053 = vmatpush.bf16.msrb.mxu1 %v4509_v10  ;;  %v5005_v10 = vld [vmem:[#allocation22 + $0x38] sm:$0xff] }
 0x590   : > { %3077 = vmatpush.bf16.msrb.mxu3 %v4653_v26  ;;  %v4998_v26 = vld [vmem:[#allocation22] sm:$0xff] }
 0x592   : > { %3054 = vmatpush.bf16.msrb.mxu1 %v4501_v20 }
 0x594   : > { %3078 = vmatpush.bf16.msrb.mxu3 %v4645_v37 }
 0x596   : > { %3055 = vmatpush.bf16.msrb.mxu1 %v4493_v28 }
 0x598   : > { %3079 = vmatpush.bf16.msrb.mxu3 %v4637_v42 }
 0x59a   : > { %3056 = vmatpush.bf16.msrb.mxu1 %v4485_v39 }
 0x59c   : > { %3080 = vmatpush.bf16.msrb.mxu3 %v4629_v48 }
 0x5a0   : > { %3081 = vmatpush.bf16.msrb.mxu3 %v4621_v51 }
 0x600   : > { %v2618_v38 = vpop.f32.mrf.mxu3 }
 0x601   : > { %v2622_v57 = vpack.c.bf16 %v2618_v38, %v2618_v38  ;;  %v4950_v38 = vld [vmem:[#allocation25 + $0x184] sm:$0xf] }
 0x603   : > { %2699 = vmatmul.bf16.vlgmr.msra.gmra.mxu0 %v2622_v57  ;;  %v4477_v57 = vor.u32 %v4950_v38, %v4474_v40 }
 0x604   : > { %3178 = vmatpush.bf16.msra.mxu0 %v5005_v10 }
 0x605   : > { %3057 = vmatpush.bf16.msrb.mxu1 %v4477_v57 }
 0x608   : > { %v2620_v33 = vpop.f32.mrf.mxu3  ;;  %3179 = vmatpush.bf16.msra.mxu0 %v5004_v11  ;;  %v5008_v11 = vld [vmem:[#allocation24 + $0x10] sm:$0xff] }
 0x609   : > { %v4984_v33 = vld [vmem:[#allocation25 + $0x294] sm:$0xf] }
 0x60a   : > { %v4613_v53 = vor.u32 %v4984_v33, %v4610_v44  ;;  %v5210_v44 = vld [vmem:[%s6531_s24] ss:$0 sm:$0xff] }
 0x60c   : > { %3082 = vmatpush.bf16.msrb.mxu3 %v4613_v53  ;;  %3180 = vmatpush.bf16.msra.mxu0 %v5003_v6 }
 0x610   : > { %3083 = vmatpush.bf16.msrb.mxu3 %v4605_v55  ;;  %3181 = vmatpush.bf16.msra.mxu0 %v5002_v14 }
 0x614   : > { %3182 = vmatpush.bf16.msra.mxu0 %v5001_v18 }
 0x618   : > { %3183 = vmatpush.bf16.msra.mxu0 %v5000_v63 }
 0x61c   : > { %3184 = vmatpush.bf16.msra.mxu0 %v4999_v23  ;;  %v5020_v23 = vld [vmem:[#allocation21 + $0x30] sm:$0xff] }
 0x620   : > { %3185 = vmatpush.bf16.msra.mxu0 %v4998_v26  ;;  %v5017_v26 = vld [vmem:[#allocation21 + $0x18] sm:$0xff] }
 0x680   : > { %v2700_v46 = vpop.f32.mrf.mxu0 }
 0x681   : > { %v2701_v41 = vadd.f32 %v5209_v43, %v2700_v46 }
 0x683   : > { %v2704_v58 = vadd.f32 %v2701_v41, %v6338_v56 }
 0x685   : > { %v2705_v59 = vmul.f32 0.70710677, %v2704_v58 }
 0x687   : > { %v2706_v7 = vadd.f32 %v2705_v59, %v6338_v56 }
 0x688   : > { %v2702_v62 = vpop.f32.mrf.mxu0 }
 0x689   : > { %v2707_v1 = vmul.f32 0.70710677, %v2706_v7 }
 0x68b   : > { %2708 = vst [vmem:[#allocation3 + $0x8] sm:$0xff] %v2707_v1  ;;  %v2714_v2 = vpack.c.bf16 %v2707_v1, %v2707_v1 }
 0x68d   : > { %3045 = vmatmul.bf16.vlgmr.msrb.gmra.mxu0 %v2714_v2 }
 0x692   : > { %v2709_v3 = vld [vmem:[#allocation3 + $0x6] sm:$0xff] }
 0x693   : > { %v2710_v5 = vld [vmem:[#allocation3 + $0x7] sm:$0xff]  ;;  %v2712_v8 = vpack.c.bf16 %v2709_v3, %v2709_v3  ;;  %v5013_v3 = vld [vmem:[#allocation24 + $0x38] sm:$0xff] }
 0x694   : > { %v2713_v9 = vpack.c.bf16 %v2710_v5, %v2710_v5  ;;  %v5012_v5 = vld [vmem:[#allocation24 + $0x30] sm:$0xff] }
 0x695   : > { %3019 = vmatmul.bf16.vlgmr.msra.gmra.mxu1 %v2712_v8 }
 0x696   : > { %3032 = vmatmul.bf16.vlgmr.msra.gmra.mxu3 %v2713_v9  ;;  %3071 = vmatmul.bf16.vlgmr.msra.gmra.mxu2 %v2713_v9  ;;  %v5010_v9 = vld [vmem:[#allocation24 + $0x20] sm:$0xff] }
 0x697   : > { %3194 = vmatpush.bf16.xpose.msra.mxu1 %v6312_v35  ;;  %3314 = vmatpush.bf16.msra.mxu3 %v5013_v3 }
 0x69b   : > { %3315 = vmatpush.bf16.msra.mxu3 %v5012_v5 }
 0x69f   : > { %3195 = vmatpush.bf16.xpose.msra.mxu1 %v6312_v35 }
 0x6a5   : > { %3058 = vmatmul.bf16.vlgmr.msrb.gmra.mxu1 %v2712_v8 }
 0x6a6   : > { %3084 = vmatmul.bf16.vlgmr.msrb.gmra.mxu3 %v2714_v2 }
 0x6a7   : > { %3196 = vmatpush.bf16.xpose.msra.mxu1 %v6312_v35 }
 0x6af   : > { %3197 = vmatpush.bf16.xpose.msra.mxu1 %v6312_v35 }
 0x6b7   : > { %3198 = vmatpush.bf16.xpose.msra.mxu1 %v6312_v35 }
 0x6bf   : > { %3199 = vmatpush.bf16.xpose.msra.mxu1 %v6312_v35 }
 0x6c7   : > { %3200 = vmatpush.bf16.xpose.msra.mxu1 %v6312_v35  ;;  %v4469_v35 = vld [vmem:[%s6530_s8 + $0x2] sm:$0x3] }
 0x6c8   : > { %v2767_v37 = vperm.slane %v4469_v35, 0 }
 0x6cf   : > { %3201 = vmatpush.bf16.xpose.msra.mxu1 %v6335_v24  ;;  %v2768_v24 = vperm.slane %v4469_v35, 1 }
 0x70a   : > { %v3046_v56 = vpop.f32.mrf.mxu0 }
 0x712   : > { %v3020_v13 = vpop.f32.mrf.mxu1  ;;  %v3048_v4 = vpop.f32.mrf.mxu0 }
 0x713   : > { %v3021_v60 = vadd.f32 %v3020_v13, %v2767_v37 }
 0x719   : > { %v3033_v15 = vpop.f32.mrf.mxu3  ;;  %v3072_v16 = vpop.f32.mrf.mxu2 }
 0x71a   : > { %v3022_v17 = vpop.f32.mrf.mxu1  ;;  %v3034_v40 = vadd.f32 %v3033_v15, %v3021_v60  ;;  %v5007_v15 = vld [vmem:[#allocation24 + $0x8] sm:$0xff] }
 0x71c   : > { %v3047_v48 = vadd.f32 %v3046_v56, %v3034_v40 }
 0x721   : > { %v3035_v19 = vpop.f32.mrf.mxu3  ;;  %v3074_v20 = vpop.f32.mrf.mxu2 }
 0x722   : > { %v3059_v49 = vpop.f32.mrf.mxu1  ;;  %v5006_v19 = vld [vmem:[#allocation24] sm:$0xff]  ;;  %v5021_v20 = vld [vmem:[#allocation21 + $0x38] sm:$0xff] }
 0x723   : > { %v3060_v25 = vadd.f32 %v3059_v49, %v2768_v24  ;;  %3400 = vmatpush.bf16.msrb.mxu0 %v5021_v20  ;;  %v5019_v49 = vld [vmem:[#allocation21 + $0x28] sm:$0xff] }
 0x725   : > { %v3073_v22 = vadd.f32 %v3072_v16, %v3060_v25  ;;  %v5018_v25 = vld [vmem:[#allocation21 + $0x20] sm:$0xff] }
 0x727   : > { %3401 = vmatpush.bf16.msrb.mxu0 %v5020_v23 }
 0x729   : > { %v3085_v45 = vpop.f32.mrf.mxu3 }
 0x72a   : > { %v3086_v29 = vadd.f32 %v3085_v45, %v3073_v22  ;;  %v3061_v31 = vpop.f32.mrf.mxu1 }
 0x72b   : > { %3402 = vmatpush.bf16.msrb.mxu0 %v5019_v49  ;;  %v5016_v31 = vld [vmem:[#allocation21 + $0x10] sm:$0xff] }
 0x72c   : > { %v4662_v28 = vmul.f32 -1.442695, %v3086_v29 }
 0x72e   : > { %5237 = vpow2.f32 %v4662_v28  ;;  %v5015_v28 = vld [vmem:[#allocation21 + $0x8] sm:$0xff] }
 0x72f   : > { %3403 = vmatpush.bf16.msrb.mxu0 %v5018_v25 }
 0x731   : > { %v3087_v32 = vpop.f32.mrf.mxu3 }
 0x732   : > { %v5014_v32 = vld [vmem:[#allocation21] sm:$0xff] }
 0x733   : > { %3404 = vmatpush.bf16.msrb.mxu0 %v5017_v26 }
 0x734   : > { %v5238_v30 = vpop.eup %5237 }
 0x735   : > { %v3092_v34 = vadd.f32 1.0, %v5238_v30  ;;  %v5211_v30 = vld [vmem:[%s6532_s5] ss:$0 sm:$0xff] }
 0x737   : > { %5239 = vrcp.f32 %v3092_v34  ;;  %v3104_v38 = vand.u32 2147483648, %v3092_v34  ;;  %v3102_v57 = vand.u32 2147483647, %v3092_v34  ;;  %vm3098_vm13 = vweird.f32 %v3092_v34  ;;  %3405 = vmatpush.bf16.msrb.mxu0 %v5016_v31 }
 0x739   : > { %v3105_v61 = vor.u32 1.1754944e-38, %v3104_v38  ;;  %vm3103_vm15 = vcmp.eq.f32.partialorder %v3102_v57, 8.507059e+37 }
 0x73b   : > { %3406 = vmatpush.bf16.msrb.mxu0 %v5015_v28 }
 0x73d   : > { %v5240_v0 = vpop.eup %5239 }
 0x73e   : > { %v3094_v36 = vmul.f32 %v5240_v0, %v3092_v34  ;;  %vm3099_vm12 = vweird.f32 %v5240_v0 }
 0x73f   : > { %vm3100_vm14 = vmor %vm3098_vm13, %vm3099_vm12  ;;  %3407 = vmatpush.bf16.msrb.mxu0 %v5014_v32 }
 0x740   : > { %v3095_v39 = vsub.f32 1.0, %v3094_v36 }
 0x742   : > { %v3096_v42 = vmul.f32 %v5240_v0, %v3095_v39 }
 0x744   : > { %v3097_v47 = vadd.f32 %v5240_v0, %v3096_v42 }
 0x746   : > { %v3101_v27 = vsel %vm3100_vm14, %v5240_v0, %v3097_v47 }
 0x747   : > { %v3106_v50 = vsel %vm3103_vm15, %v3105_v61, %v3101_v27 }
 0x748   : > { %v6375_v51 = vmul.f32 %v3106_v50, %v3047_v48 }
 0x74a   : > { %v3109_v33 = vpack.c.bf16 %v6375_v51, %v6375_v51 }
 0x74c   : > { %3186 = vmatmul.bf16.vlgmr.msra.gmra.mxu0 %v3109_v33 }
 0x7c9   : > { %v3187_v43 = vpop.f32.mrf.mxu0 }
 0x7ca   : > { %v3188_v53 = vadd.f32 %v5210_v44, %v3187_v43 }
 0x7cc   : > { %v3191_v52 = vadd.f32 %v3188_v53, %v6284_v12  ;;  %v5011_v12 = vld [vmem:[#allocation24 + $0x28] sm:$0xff] }
 0x7cd   : > { %3316 = vmatpush.bf16.msra.mxu3 %v5011_v12 }
 0x7ce   : > { %v3192_v54 = vmul.f32 0.70710677, %v3191_v52 }
 0x7d0   : > { %v3193_v55 = vpack.c.bf16 %v3192_v54, %v3192_v54 }
 0x7d1   : > { %v3189_v46 = vpop.f32.mrf.mxu0  ;;  %3317 = vmatpush.bf16.msra.mxu3 %v5010_v9 }
 0x7d2   : > { %3202 = vmatmul.bf16.vlgmr.msra.gmra.mxu1 %v3193_v55 }
 0x7d5   : > { %3318 = vmatpush.bf16.msra.mxu3 %v5009_v21 }
 0x7d9   : > { %3319 = vmatpush.bf16.msra.mxu3 %v5008_v11 }
 0x7dd   : > { %3320 = vmatpush.bf16.msra.mxu3 %v5007_v15 }
 0x7e1   : > { %3321 = vmatpush.bf16.msra.mxu3 %v5006_v19 }
 0x84f   : > { %v3203_v41 = vpop.f32.mrf.mxu1 }
 0x850   : > { %v3207_v58 = vsel %vm2070_vm7, %v3203_v41, -1e+30 }
 0x851   : > { %3208 = vmax.xlane.f32.xlu1 %v3207_v58 }
 0x857   : > { %v3205_v59 = vpop.f32.mrf.mxu1 }
 0x8c4   : > { %v3209_v7 = vpop.xlane.xlu1 %3208 }
 0x8c5   : > { %v3210_v62 = vsub.f32 %v3207_v58, %v3209_v7 }
 0x8c7   : > { %v3211_v1 = vmul.f32 1.442695, %v3210_v62 }
 0x8c9   : > { %5241 = vpow2.f32 %v3211_v1 }
 0x8cf   : > { %v5242_v2 = vpop.eup %5241 }
 0x8d0   : > { %3213 = vadd.xlane.f32.xlu1 %v5242_v2 }
 0x943   : > { %v3214_v8 = vpop.xlane.xlu1 %3213 }
 0x944   : > { %5243 = vrcp.f32 %v3214_v8  ;;  %v3226_v4 = vand.u32 2147483648, %v3214_v8  ;;  %v3224_v14 = vand.u32 2147483647, %v3214_v8  ;;  %vm3220_vm1 = vweird.f32 %v3214_v8 }
 0x946   : > { %v3227_v17 = vor.u32 1.1754944e-38, %v3226_v4  ;;  %vm3225_vm3 = vcmp.eq.f32.partialorder %v3224_v14, 8.507059e+37 }
 0x94a   : > { %v5244_v56 = vpop.eup %5243 }
 0x94b   : > { %v3216_v10 = vmul.f32 %v5244_v56, %v3214_v8  ;;  %vm3221_vm0 = vweird.f32 %v5244_v56 }
 0x94c   : > { %vm3222_vm2 = vmor %vm3220_vm1, %vm3221_vm0 }
 0x94d   : > { %v3217_v13 = vsub.f32 1.0, %v3216_v10 }
 0x94f   : > { %v3218_v6 = vmul.f32 %v5244_v56, %v3217_v13 }
 0x951   : > { %v3219_v16 = vadd.f32 %v5244_v56, %v3218_v6 }
 0x953   : > { %v3223_v18 = vsel %vm3222_vm2, %v5244_v56, %v3219_v16 }
 0x954   : > { %v3228_v35 = vsel %vm3225_vm3, %v3227_v17, %v3223_v18 }
 0x955   : > { %v3230_v24 = vmul.f32 %v5242_v2, %v3228_v35 }
 0x957   : > { %v3231_v63 = vpack.c.bf16 %v3230_v24, %v3230_v24  ;;  %3414 = vst [vmem:[%s918_s17] sm:$0xff] %v3230_v24 }
 0x959   : > { %3240 = vmatmul.bf16.vlgmr.msrb.gmra.mxu2 %v3231_v63 }
 0x9dc   : > { %v3241_v22 = vpop.f32.mrf.mxu2 }
 0x9dd   : > { %v3245_v45 = vpack.c.bf16 %v3241_v22, %v3241_v22 }
 0x9df   : > { %3322 = vmatmul.bf16.vlgmr.msra.gmra.mxu3 %v3245_v45 }
 0x9e4   : > { %v3243_v29 = vpop.f32.mrf.mxu2 }
 0xa62   : > { %v3323_v34 = vpop.f32.mrf.mxu3 }
 0xa63   : > { %v3324_v37 = vadd.f32 %v5211_v30, %v3323_v34 }
 0xa65   : > { %v3327_v0 = vadd.f32 %v3324_v37, %v6375_v51 }
 0xa67   : > { %v3328_v36 = vmul.f32 0.70710677, %v3327_v0 }
 0xa69   : > { %v3329_v60 = vadd.f32 %v3328_v36, %v6375_v51 }
 0xa6a   : > { %v3325_v39 = vpop.f32.mrf.mxu3 }
 0xa6b   : > { %v3330_v38 = vmul.f32 0.70710677, %v3329_v60 }
 0xa6d   : > { %v3331_v40 = vpack.c.bf16 %v3330_v38, %v3330_v38 }
 0xa6f   : > { %3408 = vmatmul.bf16.vlgmr.msrb.gmra.mxu0 %v3331_v40 }
 0xa70   : > { %5704 = shalt.err (!%p5701_p8)
}
 0xa71   : > { %5075 = dma.vmem_to_hbm [thread:$0]  (%p6094_p4), %s3448_s23, 128, %s3450_s14, %s3421_s26  }
 0xa72   : > { %s6534_s3 = sld [smem:[#allocation61_spill]]  ;;  %s911_s13 = scalar_lea.vmem [#allocation27], %s6162_s30 }
 0xa73   : > { %s6535_s5 = sld [smem:[#allocation54_spill]]  ;;  %s3433_s10 = sshll.u32 %s911_s13, 4  ;;  %s3434_s10 = int_to_ptr.vmem [resolvable:$true] %s3433_s10 }
 0xa74   : > { %s3416_s4 = scalar_lea.sflag [#allocation6], %s6150_s12 }
 0xa78   : > { %s3431_s16 = scalar_lea.hbm %s6534_s3, %s4761_s20 }
 0xa79   : > { %v5212_v42 = vld [vmem:[%s6535_s5] ss:$0 sm:$0xff]  ;;  %s3435_s0 = sshll.u32 %s3431_s16, 4  ;;  %s5725_s5 = scalar_lea.hbm %s6534_s3, 16  ;;  %s3436_s0 = int_to_ptr.hbm [resolvable:$true] %s3435_s0 }
 0xa7a   : > { %s5719_s18 = sshra.s32 %s3436_s0, 4  ;;  %s5720_s18 = int_to_ptr.hbm [resolvable:$true] %s5719_s18 }
 0xa7b   : > { %s5721_s23 = scalar_lea.hbm %s5720_s18, 8  ;;  %p5726_p0 = scmp.lt.s32.totalorder %s5720_s18, %s6534_s3 }
 0xa7c   : > { %p5722_p10 = scmp.ne.s32.totalorder %s5720_s18, %s5721_s23  ;;  %p5727_p2 = scmp.lt.s32.totalorder %s5725_s5, %s5721_s23 }
 0xa7e   : > { %p5723_p13 = pnand %p5722_p10, %p6094_p4  ;;  %p5728_p1 = por %p5727_p2, %p5726_p0 }
 0xa80   : > { %p5724_p11 = pneg %p5723_p13 }
 0xa82   : > { %p5729_p3 = pnand %p5728_p1, %p5724_p11 }
 0xaec   : > { %v3409_v57 = vpop.f32.mrf.mxu0 }
 0xaed   : > { %v3410_v47 = vadd.f32 %v5212_v42, %v3409_v57 }
 0xaef   : > { %3413 = vst [vmem:[%s911_s13] sm:$0xff] %v3410_v47 }
 0xaf0   : > { %5732 = shalt.err (!%p5729_p3)
}
 0xaf1   : > { %5074 = dma.vmem_to_hbm [thread:$0]  (%p6094_p4), %s3434_s10, 128, %s3436_s0, %s3416_s4  }
 0xaf4   : > { %v3411_v61 = vpop.f32.mrf.mxu0 }
 0xaf5 PF: > { %s3461_s12 = sand.u32 1, %s5795_s2   ;;  %p6536_p12 = scmp.ge.s32.totalorder %s5807_s27, 2 }
 0xaf6   : > { %s3462_s17 = scalar_lea.sflag [#allocation6], %s3461_s12 }
 0xaf7   : > { %p5123_p7 = pnand %p6536_p12, %p6098_p6 }
 0xaf9   : > { %p5124_p9 = pneg %p5123_p7 }
 0xafb   : > { %5786 = dma.done.wait (%p5124_p9), %s3462_s17, 128  }
 0xafc   : > { %5788 = vsyncadd (%p5124_p9), %s3462_s17, 4294967168  ;;  %s3472_s6 = scalar_lea.sflag [#allocation29], %s3461_s12 }
 0xafd   : > { %5790 = dma.done.wait (%p5124_p9), %s3472_s6, 128  }
 0xafe   : > { %5792 = vsyncadd (%p5124_p9), %s3472_s6, 4294967168  ;;  %s6537_s15 = sld [smem:[#allocation41_spill]]  ;;  %p47_p4 = scmp.ge.s32.totalorder %s6066_s22, 4  }
 0xaff   : > { %s6538_s26 = sld [smem:[#allocation42_spill]]  ;;  %s6539_s2 = smov %s5799_s25 }
 0xb00   : > { %s6541_s27 = smov %s6066_s22  ;;  %49 = sbr.rel (!%p47_p4) target bundleno = 36 (0x24), region = 227 }
 0xb04   : > { %s6540_s25 = smov %s6537_s15 }
 0xb05   :  { %3478 = vsyncpa [#allocation5], 1 }
 0xb06   :  { %3480 = vsyncpa [#allocation5 + $0x1], 1 }
 0xb07   :  { %3481 = vsyncpa [#allocation8], 1 }
 0xb08   :  { %3483 = vsyncpa [#allocation8 + $0x1], 1 }
 0xb09   :  { %3484 = vsyncpa [#allocation11], 1 }
 0xb0a   :  { %3485 = vsyncpa [#allocation14], 1 }
 0xb0b   :  { %3486 = vsyncpa [#allocation17], 1 }
 0xb0c   :  { %3487 = vsyncpa [#allocation20], 1 }
 0xb0d   :  { %3488 = vsyncpa [#allocation23], 1 }
 0xb0e   :  { %3489 = vsyncpa [#allocation26], 1 }
 0xb0f   :  { %3490 = vsyncpa [#allocation6], 1 }
 0xb10   :  { %3492 = vsyncpa [#allocation6 + $0x1], 1 }
 0xb11   :  { %3493 = vsyncpa [#allocation29], 1 }
 0xb12   :  { %3495 = vsyncpa [#allocation29 + $0x1], 1 }

</bundles_post_ra>
